<compile_context>
chip_gen: v5e
topology: v5e:2x2
jax: 0.10.0
libtpu: 0.0.40
codegen_flags: <defaults>
</compile_context>

<pallas_src>
import math
from functools import partial

import jax
import jax.numpy as jnp
from jax.experimental import pallas as pl
from jax.experimental.pallas import tpu as pltpu
from jax.scipy.special import gammaln, digamma

LANE = 128                 # TPU lane width; all kernel feature dims pad to this
LEAKY_SLOPE = 0.01
BN_EPS = 1e-5
EPS = 1e-8
LOG_2PI = math.log(2.0 * math.pi)

# static row indices into the consolidated f32 vector slab ("vrow")
ROW_LSX = 0
ROW_QWZ = 1          # rows 1..6 : b1,g1,be1,b2,g2,be2
ROW_QWZ_B3 = 7
ROW_QYD = 8          # rows 8..13 (fused Qy|Qd)
ROW_QYD_B3 = 14
ROW_PX = 15          # rows 15..20
ROW_PX_B3 = 21
ROW_PZ = 22          # rows 22..27
ROW_PZ_B3 = 28
NVROWS = 32


def _rup(n, m=LANE):
    return ((n + m - 1) // m) * m


def _pad2(a, rows, cols):
    out = jnp.zeros((rows, cols), a.dtype)
    return out.at[:a.shape[0], :a.shape[1]].set(a)


# --------------------------------------------------------------------------
# In-kernel helpers
# --------------------------------------------------------------------------
def _softplus(t):
    return jnp.maximum(t, 0.0) + jnp.log(1.0 + jnp.exp(-jnp.abs(t)))


def _softclip(t, lo=-8.0, hi=8.0):
    t = lo + _softplus(t - lo)
    t = hi - _softplus(hi - t)
    return t


def _dot(a, w_bf16):
    # bf16 MXU inputs, f32 accumulation
    return jnp.dot(a.astype(jnp.bfloat16), w_bf16,
                   preferred_element_type=jnp.float32)


# --------------------------------------------------------------------------
# Fused forward + loss-reduction kernel (single launch, no grid)
# --------------------------------------------------------------------------
def fused_forward_kernel(
        xe_ref, vrow_ref,
        qwz_w1, qwz_w2, qwz_w3,
        qyd_w1, qyd_w2, qyd_w3,
        px_w1, px_w2, px_w3,
        pz_w1, pz_w2, pz_w3,
        slab_ref, rec_ref, loss_ref,
        *, nx, nz, nclasses, nxp, nhq_p, nhp_p, hyd, mupad, zscale, wscale):

    def vr(row, width):                      # (1, width) f32 parameter row
        return vrow_ref[row:row + 1, :width]

    def bn_lrelu(h, g, b):
        # train-mode BatchNorm1d (biased batch var), one E[x]/E[x^2] pass,
        # then LeakyReLU(0.01).  All f32 (no bf16 VPU on v5e).
        mean = jnp.mean(h, axis=0, keepdims=True)
        var = jnp.maximum(jnp.mean(h * h, axis=0, keepdims=True) - mean * mean,
                          0.0)
        h = (h - mean) * jax.lax.rsqrt(var + BN_EPS) * g + b
        return jnp.where(h > 0, h, LEAKY_SLOPE * h)

    def hidden2(h, w1_ref, w2_ref, row0, width):
        # Linear -> (Dropout: identity) -> BN -> LeakyReLU, x2
        # TODO(synk): dropout omitted (identity).
        h = _dot(h, w1_ref[...]) + vr(row0 + 0, width)
        h = bn_lrelu(h, vr(row0 + 1, width), vr(row0 + 2, width))
        h = _dot(h, w2_ref[...]) + vr(row0 + 3, width)
        h = bn_lrelu(h, vr(row0 + 4, width), vr(row0 + 5, width))
        return h

    x = xe_ref[:, :nxp]
    eps_w = xe_ref[:, nxp:nxp + LANE]
    eps_z = xe_ref[:, nxp + LANE:nxp + 2 * LANE]

    lane_c = jax.lax.broadcasted_iota(jnp.int32, (1, LANE), 1)
    lane_x = jax.lax.broadcasted_iota(jnp.int32, (1, nxp), 1)

    # ---------------- Q(w, z | x) ----------------
    h = hidden2(x, qwz_w1, qwz_w2, ROW_QWZ, nhq_p)
    wzc = _dot(h, qwz_w3[...]) + vr(ROW_QWZ_B3, 4 * LANE)   # (B, 4*LANE)
    mu_w = wzc[:, 0 * LANE:1 * LANE]
    lv_w = wzc[:, 1 * LANE:2 * LANE]
    mu_z = wzc[:, 2 * LANE:3 * LANE]
    lv_z = wzc[:, 3 * LANE:4 * LANE]
    slab_ref[:, 0 * LANE:1 * LANE] = mu_w
    slab_ref[:, 1 * LANE:2 * LANE] = lv_w
    slab_ref[:, 2 * LANE:3 * LANE] = mu_z
    slab_ref[:, 3 * LANE:4 * LANE] = lv_z

    # re-parameterized samples (noise from host; padded lanes are zero)
    w = mu_w + eps_w * jnp.exp(0.5 * lv_w)
    z = mu_z + eps_z * jnp.exp(0.5 * lv_z)
    slab_ref[:, 4 * LANE:5 * LANE] = w
    slab_ref[:, 5 * LANE:6 * LANE] = z

    # ------------- fused Q(y|w,z,x) + Q(d|w,z,x) -------------
    wzx = jnp.concatenate([w, z, x], axis=-1)               # (B, 2*LANE+nxp)
    h = hidden2(wzx, qyd_w1, qyd_w2, ROW_QYD, hyd)
    yd = _dot(h, qyd_w3[...]) + vr(ROW_QYD_B3, 2 * LANE)    # (B, 2*LANE)
    qy_logits = yd[:, :LANE]
    d_logits = yd[:, LANE:2 * LANE]
    slab_ref[:, 7 * LANE:8 * LANE] = d_logits

    cls_mask = lane_c < nclasses
    lm = jnp.where(cls_mask, qy_logits, -1e30)
    lm = lm - jnp.max(lm, axis=-1, keepdims=True)
    e = jnp.exp(lm)                                         # padded lanes -> 0
    q_y = e / jnp.sum(e, axis=-1, keepdims=True)            # exact division
    q_y = EPS / nclasses + (1.0 - EPS) * q_y
    q_y = jnp.where(cls_mask, q_y, 0.0)
    slab_ref[:, 6 * LANE:7 * LANE] = q_y

    # ---------------- P(x | z) -------------------
    h = hidden2(z, px_w1, px_w2, ROW_PX, nhp_p)
    rec = _dot(h, px_w3[...]) + vr(ROW_PX_B3, nxp)          # (B, nxp)
    rec_ref[...] = rec

    # ---------------- P(z | w, y) ----------------
    # dense layout: mu_c at lanes [c*nz:(c+1)*nz], lv_c at [mupad + c*nz : ...]
    h = hidden2(w, pz_w1, pz_w2, ROW_PZ, nhp_p)
    zw = _dot(h, pz_w3[...]) + vr(ROW_PZ_B3, 2 * mupad)     # (B, 2*mupad)

    # ---------------- loss reductions ------------
    # reconstruction (reclosstype == 'Gauss')
    ls = _softclip(vr(ROW_LSX, nxp))
    dif = (x - rec) * jnp.exp(-ls)
    logprob = -0.5 * dif * dif - ls - 0.5 * LOG_2PI
    logprob = jnp.where(lane_x < nx, logprob, 0.0)
    loss_rec = -jnp.mean(jnp.sum(logprob, axis=-1, keepdims=True),
                         axis=0, keepdims=True)

    # loss_z: sum_c q_y[:,c] * KL(Q(z|x) || P(z|w, y=c)), on nz-wide slices
    mu_z_r = mu_z[:, :nz]
    lv_z_r = lv_z[:, :nz]
    exp_lv_z_r = jnp.exp(lv_z_r)
    z_acc = jnp.zeros((mu_z.shape[0], 1), jnp.float32)
    for c in range(nclasses):
        mu_c = zw[:, c * nz:(c + 1) * nz]
        lv_c = zw[:, mupad + c * nz:mupad + (c + 1) * nz]
        kld = 0.5 * (-1.0 + (exp_lv_z_r + (mu_z_r - mu_c) ** 2)
                     * jnp.exp(-lv_c) + lv_c - lv_z_r)
        s_c = jnp.sum(kld, axis=-1, keepdims=True)          # (B, 1)
        z_acc = z_acc + q_y[:, c:c + 1] * s_c
    loss_z = zscale * jnp.mean(z_acc, axis=0, keepdims=True)

    # loss_w: KL(Q(w|x) || N(0, I)) (zero-padded lanes contribute exactly 0)
    kld_w = -0.5 * (1.0 + lv_w - mu_w * mu_w - jnp.exp(lv_w))
    loss_w = wscale * jnp.mean(jnp.sum(kld_w, axis=-1, keepdims=True),
                               axis=0, keepdims=True)

    # loss_y = -mean(max_c q_y)  (recorded only; not in total_loss, as in ref)
    loss_y = -jnp.mean(jnp.max(q_y, axis=-1, keepdims=True),
                       axis=0, keepdims=True)

    # num_clusters: classes where any q_y > 0.5
    thr = jnp.where(q_y > 0.5, 1.0, 0.0)
    per_class = jnp.sum(thr, axis=0, keepdims=True)
    ncl = jnp.sum(jnp.where(per_class > 0.0, 1.0, 0.0),
                  axis=-1, keepdims=True)

    loss_ref[...] = (jnp.where(lane_c == 0, loss_rec, 0.0)
                     + jnp.where(lane_c == 1, loss_z, 0.0)
                     + jnp.where(lane_c == 2, loss_w, 0.0)
                     + jnp.where(lane_c == 3, loss_y, 0.0)
                     + jnp.where(lane_c == 4, ncl, 0.0))


# --------------------------------------------------------------------------
# Parameter init (PyTorch layout) + lane-dense / bf16 packing
# --------------------------------------------------------------------------
def init_linear(key, fan_in, fan_out):
    kw, kb = jax.random.split(key)
    bound = 1.0 / math.sqrt(fan_in)
    w = jax.random.uniform(kw, (fan_in, fan_out), jnp.float32, -bound, bound)
    b = jax.random.uniform(kb, (1, fan_out), jnp.float32, -bound, bound)
    return w, b


def init_mlp3(key, dims):   # dims = [d_in, h1, h2, d_out]  (buildNetworkv5)
    k1, k2, k3 = jax.random.split(key, 3)
    w1, b1 = init_linear(k1, dims[0], dims[1])
    w2, b2 = init_linear(k2, dims[1], dims[2])
    w3, b3 = init_linear(k3, dims[2], dims[3])
    return dict(w1=w1, b1=b1,
                g1=jnp.ones((1, dims[1]), jnp.float32),
                be1=jnp.zeros((1, dims[1]), jnp.float32),
                w2=w2, b2=b2,
                g2=jnp.ones((1, dims[2]), jnp.float32),
                be2=jnp.zeros((1, dims[2]), jnp.float32),
                w3=w3, b3=b3)


def init_vae_params(key, *, nx, nhq, nhp, nz, nw, nclasses):
    k = jax.random.split(key, 5)
    return dict(
        Qwz=init_mlp3(k[0], [nx, nhq, nhq, 2 * nw + 2 * nz]),
        Qy=init_mlp3(k[1], [nw + nz + nx, nhq, nhq, nclasses]),
        Qd=init_mlp3(k[2], [nw + nz + nx, nhq, nhq, nclasses]),
        Px=init_mlp3(k[3], [nz, nhp, nhp, nx]),
        Pz=init_mlp3(k[4], [nw, nhp, nhp, 2 * nclasses * nz]),
        logsigma_x=jnp.zeros((1, nx), jnp.float32),
    )


def pack_params(params, *, nx, nhq, nhp, nz, nw, nclasses):
    """Zero-pad to 128-lane multiples, cast matmul weights to bf16, lane-fuse
    Qy/Qd into one network, build one K=384 [w|z|x] first layer, densely pack
    the Pz last layer, and put every (1, N) f32 vector in one row slab."""
    assert max(nw, nz, nclasses) <= LANE, "latent / class dims must be <= 128"
    NXP, NHQ, NHP = _rup(nx), _rup(nhq), _rup(nhp)
    HYD = _rup(2 * nhq)                       # fused Qy|Qd hidden width
    MUPAD = _rup(nclasses * nz)               # dense Pz mu / lv region width
    VW = max(NXP, NHQ, NHP, HYD, 4 * LANE, 2 * LANE, 2 * MUPAD)
    bf16, f32 = jnp.bfloat16, jnp.float32
    cnz = nclasses * nz

    vrow = jnp.zeros((NVROWS, VW), f32)

    def set_row(vr_, r, vec2d):
        return vr_.at[r, :vec2d.shape[1]].set(vec2d[0])

    vrow = set_row(vrow, ROW_LSX, params["logsigma_x"])

    # --- Qwz: last-layer chunks are [mu_w | lv_w | mu_z | lv_z] --------------
    q = params["Qwz"]
    for i, k in enumerate(("b1", "g1", "be1", "b2", "g2", "be2")):
        vrow = set_row(vrow, ROW_QWZ + i, q[k])
    w3, b3 = q["w3"], q["b3"]
    w3c = jnp.zeros((nhq, 4 * LANE), f32)
    w3c = w3c.at[:, 0 * LANE:0 * LANE + nw].set(w3[:, :nw])
    w3c = w3c.at[:, 1 * LANE:1 * LANE + nw].set(w3[:, nw + nz:2 * nw + nz])
    w3c = w3c.at[:, 2 * LANE:2 * LANE + nz].set(w3[:, nw:nw + nz])
    w3c = w3c.at[:, 3 * LANE:3 * LANE + nz].set(w3[:, 2 * nw + nz:])
    b3c = jnp.zeros((1, 4 * LANE), f32)
    b3c = b3c.at[:, 0 * LANE:0 * LANE + nw].set(b3[:, :nw])
    b3c = b3c.at[:, 1 * LANE:1 * LANE + nw].set(b3[:, nw + nz:2 * nw + nz])
    b3c = b3c.at[:, 2 * LANE:2 * LANE + nz].set(b3[:, nw:nw + nz])
    b3c = b3c.at[:, 3 * LANE:3 * LANE + nz].set(b3[:, 2 * nw + nz:])
    vrow = vrow.at[ROW_QWZ_B3, :4 * LANE].set(b3c[0])
    qwz_w1 = _pad2(q["w1"], NXP, NHQ).astype(bf16)
    qwz_w2 = _pad2(q["w2"], NHQ, NHQ).astype(bf16)
    qwz_w3 = _pad2(w3c, NHQ, 4 * LANE).astype(bf16)

    # --- Qy + Qd lane-fused: Qy in lanes [0:nhq], Qd in [nhq:2*nhq] ----------
    qy, qd = params["Qy"], params["Qd"]
    for i, k in enumerate(("b1", "g1", "be1", "b2", "g2", "be2")):
        row = jnp.zeros((1, HYD), f32)
        row = row.at[:, :nhq].set(qy[k]).at[:, nhq:2 * nhq].set(qd[k])
        vrow = vrow.at[ROW_QYD + i, :HYD].set(row[0])
    b3row = jnp.zeros((1, 2 * LANE), f32)
    b3row = b3row.at[:, :nclasses].set(qy["b3"])
    b3row = b3row.at[:, LANE:LANE + nclasses].set(qd["b3"])
    vrow = vrow.at[ROW_QYD_B3, :2 * LANE].set(b3row[0])

    a, b = qy["w1"], qd["w1"]                      # rows follow cat([w, z, x])
    qyd_w1 = jnp.zeros((2 * LANE + NXP, HYD), f32)
    qyd_w1 = qyd_w1.at[0:nw, :nhq].set(a[:nw])
    qyd_w1 = qyd_w1.at[0:nw, nhq:2 * nhq].set(b[:nw])
    qyd_w1 = qyd_w1.at[LANE:LANE + nz, :nhq].set(a[nw:nw + nz])
    qyd_w1 = qyd_w1.at[LANE:LANE + nz, nhq:2 * nhq].set(b[nw:nw + nz])
    qyd_w1 = qyd_w1.at[2 * LANE:2 * LANE + nx, :nhq].set(a[nw + nz:])
    qyd_w1 = qyd_w1.at[2 * LANE:2 * LANE + nx, nhq:2 * nhq].set(b[nw + nz:])
    qyd_w1 = qyd_w1.astype(bf16)

    qyd_w2 = jnp.zeros((HYD, HYD), f32)            # block-diagonal layer 2
    qyd_w2 = qyd_w2.at[:nhq, :nhq].set(qy["w2"])
    qyd_w2 = qyd_w2.at[nhq:2 * nhq, nhq:2 * nhq].set(qd["w2"])
    qyd_w2 = qyd_w2.astype(bf16)

    qyd_w3 = jnp.zeros((HYD, 2 * LANE), f32)       # [qy_logits | d_logits]
    qyd_w3 = qyd_w3.at[:nhq, :nclasses].set(qy["w3"])
    qyd_w3 = qyd_w3.at[nhq:2 * nhq, LANE:LANE + nclasses].set(qd["w3"])
    qyd_w3 = qyd_w3.astype(bf16)

    # --- Px -------------------------------------------------------------------
    p = params["Px"]
    for i, k in enumerate(("b1", "g1", "be1", "b2", "g2", "be2")):
        vrow = set_row(vrow, ROW_PX + i, p[k])
    vrow = vrow.at[ROW_PX_B3, :nx].set(p["b3"][0])
    px_w1 = _pad2(p["w1"], LANE, NHP).astype(bf16)
    px_w2 = _pad2(p["w2"], NHP, NHP).astype(bf16)
    px_w3 = _pad2(p["w3"], NHP, NXP).astype(bf16)

    # --- Pz: DENSE last layer: mu lanes [0:C*nz], lv lanes [MUPAD:MUPAD+C*nz] -
    p = params["Pz"]
    for i, k in enumerate(("b1", "g1", "be1", "b2", "g2", "be2")):
        vrow = set_row(vrow, ROW_PZ + i, p[k])
    w3 = p["w3"].reshape(nhp, nclasses, 2, nz)
    w3d = jnp.zeros((nhp, 2 * MUPAD), f32)
    w3d = w3d.at[:, :cnz].set(w3[:, :, 0, :].reshape(nhp, cnz))
    w3d = w3d.at[:, MUPAD:MUPAD + cnz].set(w3[:, :, 1, :].reshape(nhp, cnz))
    b3 = p["b3"].reshape(1, nclasses, 2, nz)
    b3d = jnp.zeros((1, 2 * MUPAD), f32)
    b3d = b3d.at[:, :cnz].set(b3[:, :, 0, :].reshape(1, cnz))
    b3d = b3d.at[:, MUPAD:MUPAD + cnz].set(b3[:, :, 1, :].reshape(1, cnz))
    vrow = vrow.at[ROW_PZ_B3, :2 * MUPAD].set(b3d[0])
    pz_w1 = _pad2(p["w1"], LANE, NHP).astype(bf16)
    pz_w2 = _pad2(p["w2"], NHP, NHP).astype(bf16)
    pz_w3 = _pad2(w3d, NHP, 2 * MUPAD).astype(bf16)

    weights = [qwz_w1, qwz_w2, qwz_w3, qyd_w1, qyd_w2, qyd_w3,
               px_w1, px_w2, px_w3, pz_w1, pz_w2, pz_w3]
    return {"vrow": vrow, "weights": weights}


# --------------------------------------------------------------------------
# Forward pass (y=None, b=None branch; Gauss recon, no tanh, relax=False)
# --------------------------------------------------------------------------
def vae_forward(packed, x_img, key, *, nx, nw, nz, nclasses,
                dscale=1.0, wscale=1.0, yscale=1.0, zscale=1.0,
                concentration=0.5):
    B = x_img.shape[0]
    W = packed["weights"]
    NXP, NHQ = W[0].shape            # qwz_w1
    NHP = W[6].shape[1]              # px_w1
    HYD = W[4].shape[0]              # qyd_w2
    MUPAD = W[11].shape[1] // 2      # pz_w3

    x = x_img.reshape(B, -1).astype(jnp.float32)          # nn.Flatten()
    k_w, k_z, k_dir = jax.random.split(key, 3)
    eps_w = jax.random.normal(k_w, (B, nw), jnp.float32)
    eps_z = jax.random.normal(k_z, (B, nz), jnp.float32)

    # single input slab: [ x (NXP lanes) | eps_w (128) | eps_z (128) ]
    xe = jnp.zeros((B, NXP + 2 * LANE), jnp.float32)
    xe = xe.at[:, :nx].set(x)
    xe = xe.at[:, NXP:NXP + nw].set(eps_w)
    xe = xe.at[:, NXP + LANE:NXP + LANE + nz].set(eps_z)

    kern = partial(fused_forward_kernel, nx=nx, nz=nz, nclasses=nclasses,
                   nxp=NXP, nhq_p=NHQ, nhp_p=NHP, hyd=HYD, mupad=MUPAD,
                   zscale=zscale, wscale=wscale)
    # single launch: whole (tiny) batch resident in VMEM (full-batch BN stats).
    slab, rec_p, loss_vec = pl.pallas_call(
        kern,
        out_shape=(jax.ShapeDtypeStruct((B, 8 * LANE), jnp.float32),
                   jax.ShapeDtypeStruct((B, NXP), jnp.float32),
                   jax.ShapeDtypeStruct((1, LANE), jnp.float32)),
        compiler_params=pltpu.CompilerParams(
            vmem_limit_bytes=32 * 1024 * 1024),
    )(xe, packed["vrow"], *W)

    def sl(k, d):
        return slab[:, k * LANE:k * LANE + d]

    mu_w, logvar_w = sl(0, nw), sl(1, nw)
    mu_z, logvar_z = sl(2, nz), sl(3, nz)
    w, z = sl(4, nw), sl(5, nz)
    q_y, d_logits = sl(6, nclasses), sl(7, nclasses)
    rec = rec_p[:, :nx]

    loss_rec = loss_vec[0, 0]
    loss_z = loss_vec[0, 1]
    loss_w = loss_vec[0, 2]
    loss_y = loss_vec[0, 3]
    num_clusters = loss_vec[0, 4].astype(jnp.int32)

    # Dirichlet rsample: gamma sampling has no Pallas TPU lowering -> host JAX.
    alpha = jnp.exp(d_logits)
    p_y = jax.random.dirichlet(k_dir, alpha)
    p_y = EPS / nclasses + (1.0 - EPS) * p_y
    # loss_y_alt needs the freshly sampled p_y -> tiny host-side reduction.
    loss_y_alt = yscale * jnp.mean(
        jnp.sum(q_y * (jnp.log(q_y) - jnp.log(p_y)), axis=-1))

    # loss_d = dscale * KL(Dirichlet(alpha) || Dirichlet(concentration))
    # (lgamma / digamma have no Pallas TPU lowering -> host JAX)
    beta = jnp.full_like(alpha, concentration)
    a0 = jnp.sum(alpha, axis=-1)
    b0 = jnp.sum(beta, axis=-1)
    kl_d = (gammaln(a0) - gammaln(b0)
            - jnp.sum(gammaln(alpha), axis=-1) + jnp.sum(gammaln(beta), axis=-1)
            + jnp.sum((alpha - beta) * (digamma(alpha) - digamma(a0)[:, None]),
                      axis=-1))
    loss_d = dscale * jnp.mean(kl_d)

    loss_y_alt2 = jnp.asarray(0.0, jnp.float32)           # y is None branch
    total_loss = loss_rec + loss_z + loss_w + loss_d + loss_y_alt + loss_y_alt2

    wz = jnp.stack([jnp.concatenate([mu_w, mu_z], axis=-1),
                    jnp.concatenate([logvar_w, logvar_z], axis=-1)], axis=1)

    losses = dict(rec=loss_rec, loss_z=loss_z, loss_w=loss_w, loss_y=loss_y,
                  loss_d=loss_d, loss_y_alt=loss_y_alt, loss_y_alt2=loss_y_alt2,
                  total_loss=total_loss, num_clusters=num_clusters)
    # TODO(synk): torch.distributions objects (Qw, Qz, Pz, Py, Qy, D_y) are not
    # materialized; their parameters (mu/logvar/logits/probs) are returned.
    return dict(wz=wz, mu_z=mu_z, mu_w=mu_w, logvar_z=logvar_z,
                logvar_w=logvar_w, q_y=q_y, d_logits=d_logits, w=w, z=z,
                rec=rec, losses=losses)


# --------------------------------------------------------------------------
if __name__ == "__main__":
    # small shapes consistent with the module: (B, 1, 8, 8) images -> nx = 64.
    # B = 8 exactly fills the f32 sublane axis, so the full-batch BatchNorm
    # statistics need no batch padding and stay exact.
    B, C, H, Wd = 8, 1, 8, 8
    nx = C * H * Wd
    nhq = nhp = 32
    nz, nw, nclasses = 16, 8, 10

    root = jax.random.PRNGKey(0)
    k_params, k_input, k_noise = jax.random.split(root, 3)

    params = init_vae_params(k_params, nx=nx, nhq=nhq, nhp=nhp,
                             nz=nz, nw=nw, nclasses=nclasses)
    packed = pack_params(params, nx=nx, nhq=nhq, nhp=nhp,
                         nz=nz, nw=nw, nclasses=nclasses)
    x_img = jax.random.uniform(k_input, (B, C, H, Wd), jnp.float32)

    fwd = jax.jit(partial(vae_forward, nx=nx, nw=nw, nz=nz, nclasses=nclasses))
    out = fwd(packed, x_img, k_noise)
    jax.block_until_ready(out["losses"]["total_loss"])
    jax.block_until_ready(out["rec"])
    print("KERNEL_OK")
</pallas_src>

<mosaic_0001>
module attributes {stable_mosaic.version = 11 : i64} {
  func.func @fused_forward_kernel(%arg0: memref<8x384xf32, #tpu.memory_space<vmem>>, %arg1: memref<32x512xf32, #tpu.memory_space<vmem>>, %arg2: memref<128x128xbf16, #tpu.memory_space<vmem>>, %arg3: memref<128x128xbf16, #tpu.memory_space<vmem>>, %arg4: memref<128x512xbf16, #tpu.memory_space<vmem>>, %arg5: memref<384x128xbf16, #tpu.memory_space<vmem>>, %arg6: memref<128x128xbf16, #tpu.memory_space<vmem>>, %arg7: memref<128x256xbf16, #tpu.memory_space<vmem>>, %arg8: memref<128x128xbf16, #tpu.memory_space<vmem>>, %arg9: memref<128x128xbf16, #tpu.memory_space<vmem>>, %arg10: memref<128x128xbf16, #tpu.memory_space<vmem>>, %arg11: memref<128x128xbf16, #tpu.memory_space<vmem>>, %arg12: memref<128x128xbf16, #tpu.memory_space<vmem>>, %arg13: memref<128x512xbf16, #tpu.memory_space<vmem>>, %arg14: memref<8x1024xf32, #tpu.memory_space<vmem>>, %arg15: memref<8x128xf32, #tpu.memory_space<vmem>>, %arg16: memref<1x128xf32, #tpu.memory_space<vmem>>) attributes {dimension_semantics = [], scalar_prefetch = 0 : i64, scratch_operands = 0 : i64, tpu.core_type = #tpu.core_type<tc>} {
    %c0 = arith.constant 0 : index
    %c0_0 = arith.constant 0 : index
    %0 = vector.load %arg0[%c0, %c0_0] : memref<8x384xf32, #tpu.memory_space<vmem>>, vector<8x128xf32>
    %c0_1 = arith.constant 0 : index
    %c128 = arith.constant 128 : index
    %1 = vector.load %arg0[%c0_1, %c128] : memref<8x384xf32, #tpu.memory_space<vmem>>, vector<8x128xf32>
    %c0_2 = arith.constant 0 : index
    %c256 = arith.constant 256 : index
    %2 = vector.load %arg0[%c0_2, %c256] : memref<8x384xf32, #tpu.memory_space<vmem>>, vector<8x128xf32>
    %3 = tpu.iota {dimensions = array<i32: 1>} : vector<1x128xi32>
    %4 = tpu.iota {dimensions = array<i32: 1>} : vector<1x128xi32>
    %c0_3 = arith.constant 0 : index
    %c0_4 = arith.constant 0 : index
    %5 = vector.load %arg2[%c0_3, %c0_4] : memref<128x128xbf16, #tpu.memory_space<vmem>>, vector<128x128xbf16>
    %6 = arith.truncf %0 : vector<8x128xf32> to vector<8x128xbf16>
    %cst = arith.constant dense<0.000000e+00> : vector<8x128xf32>
    %7 = tpu.matmul %6, %5, %cst {dimension_numbers = #tpu.dot_dimension_numbers<[1], [0], [0], [1], [0, 0, 1, 1], [], []>} : vector<8x128xbf16>, vector<128x128xbf16>, vector<8x128xf32> -> vector<8x128xf32>
    %c1 = arith.constant 1 : index
    %c0_5 = arith.constant 0 : index
    %8 = vector.load %arg1[%c1, %c0_5] : memref<32x512xf32, #tpu.memory_space<vmem>>, vector<1x128xf32>
    %9 = vector.broadcast %8 : vector<1x128xf32> to vector<8x128xf32>
    %10 = arith.addf %7, %9 : vector<8x128xf32>
    %c2 = arith.constant 2 : index
    %c0_6 = arith.constant 0 : index
    %11 = vector.load %arg1[%c2, %c0_6] : memref<32x512xf32, #tpu.memory_space<vmem>>, vector<1x128xf32>
    %c3 = arith.constant 3 : index
    %c0_7 = arith.constant 0 : index
    %12 = vector.load %arg1[%c3, %c0_7] : memref<32x512xf32, #tpu.memory_space<vmem>>, vector<1x128xf32>
    %cst_8 = arith.constant dense<0.000000e+00> : vector<128xf32>
    %13 = vector.multi_reduction <add>, %10, %cst_8 [0] : vector<8x128xf32> to vector<128xf32>
    %14 = vector.shape_cast %13 : vector<128xf32> to vector<1x128xf32>
    %cst_9 = arith.constant 8.000000e+00 : f32
    %15 = vector.broadcast %cst_9 : f32 to vector<1x128xf32>
    %16 = arith.divf %14, %15 : vector<1x128xf32>
    %17 = arith.mulf %10, %10 : vector<8x128xf32>
    %cst_10 = arith.constant dense<0.000000e+00> : vector<128xf32>
    %18 = vector.multi_reduction <add>, %17, %cst_10 [0] : vector<8x128xf32> to vector<128xf32>
    %19 = vector.shape_cast %18 : vector<128xf32> to vector<1x128xf32>
    %cst_11 = arith.constant 8.000000e+00 : f32
    %20 = vector.broadcast %cst_11 : f32 to vector<1x128xf32>
    %21 = arith.divf %19, %20 : vector<1x128xf32>
    %22 = arith.mulf %16, %16 : vector<1x128xf32>
    %23 = arith.subf %21, %22 : vector<1x128xf32>
    %cst_12 = arith.constant 0.000000e+00 : f32
    %24 = vector.broadcast %cst_12 : f32 to vector<1x128xf32>
    %25 = arith.maximumf %23, %24 : vector<1x128xf32>
    %26 = vector.broadcast %16 : vector<1x128xf32> to vector<8x128xf32>
    %27 = arith.subf %10, %26 : vector<8x128xf32>
    %cst_13 = arith.constant 9.99999974E-6 : f32
    %28 = vector.broadcast %cst_13 : f32 to vector<1x128xf32>
    %29 = arith.addf %25, %28 : vector<1x128xf32>
    %30 = math.rsqrt %29 : vector<1x128xf32>
    %31 = vector.broadcast %30 : vector<1x128xf32> to vector<8x128xf32>
    %32 = arith.mulf %27, %31 : vector<8x128xf32>
    %33 = vector.broadcast %11 : vector<1x128xf32> to vector<8x128xf32>
    %34 = arith.mulf %32, %33 : vector<8x128xf32>
    %35 = vector.broadcast %12 : vector<1x128xf32> to vector<8x128xf32>
    %36 = arith.addf %34, %35 : vector<8x128xf32>
    %cst_14 = arith.constant 0.000000e+00 : f32
    %37 = vector.broadcast %cst_14 : f32 to vector<8x128xf32>
    %38 = arith.cmpf ogt, %36, %37 : vector<8x128xf32>
    %cst_15 = arith.constant 0.00999999977 : f32
    %39 = vector.broadcast %cst_15 : f32 to vector<8x128xf32>
    %40 = arith.mulf %39, %36 : vector<8x128xf32>
    %41 = arith.select %38, %36, %40 : vector<8x128xi1>, vector<8x128xf32>
    %c0_16 = arith.constant 0 : index
    %c0_17 = arith.constant 0 : index
    %42 = vector.load %arg3[%c0_16, %c0_17] : memref<128x128xbf16, #tpu.memory_space<vmem>>, vector<128x128xbf16>
    %43 = arith.truncf %41 : vector<8x128xf32> to vector<8x128xbf16>
    %cst_18 = arith.constant dense<0.000000e+00> : vector<8x128xf32>
    %44 = tpu.matmul %43, %42, %cst_18 {dimension_numbers = #tpu.dot_dimension_numbers<[1], [0], [0], [1], [0, 0, 1, 1], [], []>} : vector<8x128xbf16>, vector<128x128xbf16>, vector<8x128xf32> -> vector<8x128xf32>
    %c4 = arith.constant 4 : index
    %c0_19 = arith.constant 0 : index
    %45 = vector.load %arg1[%c4, %c0_19] : memref<32x512xf32, #tpu.memory_space<vmem>>, vector<1x128xf32>
    %46 = vector.broadcast %45 : vector<1x128xf32> to vector<8x128xf32>
    %47 = arith.addf %44, %46 : vector<8x128xf32>
    %c5 = arith.constant 5 : index
    %c0_20 = arith.constant 0 : index
    %48 = vector.load %arg1[%c5, %c0_20] : memref<32x512xf32, #tpu.memory_space<vmem>>, vector<1x128xf32>
    %c6 = arith.constant 6 : index
    %c0_21 = arith.constant 0 : index
    %49 = vector.load %arg1[%c6, %c0_21] : memref<32x512xf32, #tpu.memory_space<vmem>>, vector<1x128xf32>
    %cst_22 = arith.constant dense<0.000000e+00> : vector<128xf32>
    %50 = vector.multi_reduction <add>, %47, %cst_22 [0] : vector<8x128xf32> to vector<128xf32>
    %51 = vector.shape_cast %50 : vector<128xf32> to vector<1x128xf32>
    %cst_23 = arith.constant 8.000000e+00 : f32
    %52 = vector.broadcast %cst_23 : f32 to vector<1x128xf32>
    %53 = arith.divf %51, %52 : vector<1x128xf32>
    %54 = arith.mulf %47, %47 : vector<8x128xf32>
    %cst_24 = arith.constant dense<0.000000e+00> : vector<128xf32>
    %55 = vector.multi_reduction <add>, %54, %cst_24 [0] : vector<8x128xf32> to vector<128xf32>
    %56 = vector.shape_cast %55 : vector<128xf32> to vector<1x128xf32>
    %cst_25 = arith.constant 8.000000e+00 : f32
    %57 = vector.broadcast %cst_25 : f32 to vector<1x128xf32>
    %58 = arith.divf %56, %57 : vector<1x128xf32>
    %59 = arith.mulf %53, %53 : vector<1x128xf32>
    %60 = arith.subf %58, %59 : vector<1x128xf32>
    %cst_26 = arith.constant 0.000000e+00 : f32
    %61 = vector.broadcast %cst_26 : f32 to vector<1x128xf32>
    %62 = arith.maximumf %60, %61 : vector<1x128xf32>
    %63 = vector.broadcast %53 : vector<1x128xf32> to vector<8x128xf32>
    %64 = arith.subf %47, %63 : vector<8x128xf32>
    %cst_27 = arith.constant 9.99999974E-6 : f32
    %65 = vector.broadcast %cst_27 : f32 to vector<1x128xf32>
    %66 = arith.addf %62, %65 : vector<1x128xf32>
    %67 = math.rsqrt %66 : vector<1x128xf32>
    %68 = vector.broadcast %67 : vector<1x128xf32> to vector<8x128xf32>
    %69 = arith.mulf %64, %68 : vector<8x128xf32>
    %70 = vector.broadcast %48 : vector<1x128xf32> to vector<8x128xf32>
    %71 = arith.mulf %69, %70 : vector<8x128xf32>
    %72 = vector.broadcast %49 : vector<1x128xf32> to vector<8x128xf32>
    %73 = arith.addf %71, %72 : vector<8x128xf32>
    %cst_28 = arith.constant 0.000000e+00 : f32
    %74 = vector.broadcast %cst_28 : f32 to vector<8x128xf32>
    %75 = arith.cmpf ogt, %73, %74 : vector<8x128xf32>
    %cst_29 = arith.constant 0.00999999977 : f32
    %76 = vector.broadcast %cst_29 : f32 to vector<8x128xf32>
    %77 = arith.mulf %76, %73 : vector<8x128xf32>
    %78 = arith.select %75, %73, %77 : vector<8x128xi1>, vector<8x128xf32>
    %c0_30 = arith.constant 0 : index
    %c0_31 = arith.constant 0 : index
    %79 = vector.load %arg4[%c0_30, %c0_31] : memref<128x512xbf16, #tpu.memory_space<vmem>>, vector<128x512xbf16>
    %80 = arith.truncf %78 : vector<8x128xf32> to vector<8x128xbf16>
    %cst_32 = arith.constant dense<0.000000e+00> : vector<8x512xf32>
    %81 = tpu.matmul %80, %79, %cst_32 {dimension_numbers = #tpu.dot_dimension_numbers<[1], [0], [0], [1], [0, 0, 1, 1], [], []>} : vector<8x128xbf16>, vector<128x512xbf16>, vector<8x512xf32> -> vector<8x512xf32>
    %c7 = arith.constant 7 : index
    %c0_33 = arith.constant 0 : index
    %82 = vector.load %arg1[%c7, %c0_33] : memref<32x512xf32, #tpu.memory_space<vmem>>, vector<1x512xf32>
    %83 = vector.broadcast %82 : vector<1x512xf32> to vector<8x512xf32>
    %84 = arith.addf %81, %83 : vector<8x512xf32>
    %85 = vector.extract_strided_slice %84 {offsets = [0, 0], sizes = [8, 128], strides = [1, 1]} : vector<8x512xf32> to vector<8x128xf32>
    %86 = vector.extract_strided_slice %84 {offsets = [0, 128], sizes = [8, 128], strides = [1, 1]} : vector<8x512xf32> to vector<8x128xf32>
    %87 = vector.extract_strided_slice %84 {offsets = [0, 256], sizes = [8, 128], strides = [1, 1]} : vector<8x512xf32> to vector<8x128xf32>
    %88 = vector.extract_strided_slice %84 {offsets = [0, 384], sizes = [8, 128], strides = [1, 1]} : vector<8x512xf32> to vector<8x128xf32>
    %c0_34 = arith.constant 0 : index
    %c0_35 = arith.constant 0 : index
    %89 = vector.load %arg14[%c0_34, %c0_35] : memref<8x1024xf32, #tpu.memory_space<vmem>>, vector<8x128xf32>
    tpu.vector_store %arg14[%c0_34, %c0_35], %85 {strides = array<i32>} : memref<8x1024xf32, #tpu.memory_space<vmem>>, vector<8x128xf32>,
    %c0_36 = arith.constant 0 : index
    %c128_37 = arith.constant 128 : index
    %90 = vector.load %arg14[%c0_36, %c128_37] : memref<8x1024xf32, #tpu.memory_space<vmem>>, vector<8x128xf32>
    tpu.vector_store %arg14[%c0_36, %c128_37], %86 {strides = array<i32>} : memref<8x1024xf32, #tpu.memory_space<vmem>>, vector<8x128xf32>,
    %c0_38 = arith.constant 0 : index
    %c256_39 = arith.constant 256 : index
    %91 = vector.load %arg14[%c0_38, %c256_39] : memref<8x1024xf32, #tpu.memory_space<vmem>>, vector<8x128xf32>
    tpu.vector_store %arg14[%c0_38, %c256_39], %87 {strides = array<i32>} : memref<8x1024xf32, #tpu.memory_space<vmem>>, vector<8x128xf32>,
    %c0_40 = arith.constant 0 : index
    %c384 = arith.constant 384 : index
    %92 = vector.load %arg14[%c0_40, %c384] : memref<8x1024xf32, #tpu.memory_space<vmem>>, vector<8x128xf32>
    tpu.vector_store %arg14[%c0_40, %c384], %88 {strides = array<i32>} : memref<8x1024xf32, #tpu.memory_space<vmem>>, vector<8x128xf32>,
    %cst_41 = arith.constant 5.000000e-01 : f32
    %93 = vector.broadcast %cst_41 : f32 to vector<8x128xf32>
    %94 = arith.mulf %93, %86 : vector<8x128xf32>
    %95 = math.exp %94 : vector<8x128xf32>
    %96 = arith.mulf %1, %95 : vector<8x128xf32>
    %97 = arith.addf %85, %96 : vector<8x128xf32>
    %cst_42 = arith.constant 5.000000e-01 : f32
    %98 = vector.broadcast %cst_42 : f32 to vector<8x128xf32>
    %99 = arith.mulf %98, %88 : vector<8x128xf32>
    %100 = math.exp %99 : vector<8x128xf32>
    %101 = arith.mulf %2, %100 : vector<8x128xf32>
    %102 = arith.addf %87, %101 : vector<8x128xf32>
    %c0_43 = arith.constant 0 : index
    %c512 = arith.constant 512 : index
    %103 = vector.load %arg14[%c0_43, %c512] : memref<8x1024xf32, #tpu.memory_space<vmem>>, vector<8x128xf32>
    tpu.vector_store %arg14[%c0_43, %c512], %97 {strides = array<i32>} : memref<8x1024xf32, #tpu.memory_space<vmem>>, vector<8x128xf32>,
    %c0_44 = arith.constant 0 : index
    %c640 = arith.constant 640 : index
    %104 = vector.load %arg14[%c0_44, %c640] : memref<8x1024xf32, #tpu.memory_space<vmem>>, vector<8x128xf32>
    tpu.vector_store %arg14[%c0_44, %c640], %102 {strides = array<i32>} : memref<8x1024xf32, #tpu.memory_space<vmem>>, vector<8x128xf32>,
    %105 = tpu.concatenate %97, %102, %0 in 1 : vector<8x128xf32>, vector<8x128xf32>, vector<8x128xf32> -> vector<8x384xf32>
    %c0_45 = arith.constant 0 : index
    %c0_46 = arith.constant 0 : index
    %106 = vector.load %arg5[%c0_45, %c0_46] : memref<384x128xbf16, #tpu.memory_space<vmem>>, vector<384x128xbf16>
    %107 = arith.truncf %105 : vector<8x384xf32> to vector<8x384xbf16>
    %cst_47 = arith.constant dense<0.000000e+00> : vector<8x128xf32>
    %108 = tpu.matmul %107, %106, %cst_47 {dimension_numbers = #tpu.dot_dimension_numbers<[1], [0], [0], [1], [0, 0, 1, 1], [], []>} : vector<8x384xbf16>, vector<384x128xbf16>, vector<8x128xf32> -> vector<8x128xf32>
    %c8 = arith.constant 8 : index
    %c0_48 = arith.constant 0 : index
    %109 = vector.load %arg1[%c8, %c0_48] : memref<32x512xf32, #tpu.memory_space<vmem>>, vector<1x128xf32>
    %110 = vector.broadcast %109 : vector<1x128xf32> to vector<8x128xf32>
    %111 = arith.addf %108, %110 : vector<8x128xf32>
    %c9 = arith.constant 9 : index
    %c0_49 = arith.constant 0 : index
    %112 = vector.load %arg1[%c9, %c0_49] : memref<32x512xf32, #tpu.memory_space<vmem>>, vector<1x128xf32>
    %c10 = arith.constant 10 : index
    %c0_50 = arith.constant 0 : index
    %113 = vector.load %arg1[%c10, %c0_50] : memref<32x512xf32, #tpu.memory_space<vmem>>, vector<1x128xf32>
    %cst_51 = arith.constant dense<0.000000e+00> : vector<128xf32>
    %114 = vector.multi_reduction <add>, %111, %cst_51 [0] : vector<8x128xf32> to vector<128xf32>
    %115 = vector.shape_cast %114 : vector<128xf32> to vector<1x128xf32>
    %cst_52 = arith.constant 8.000000e+00 : f32
    %116 = vector.broadcast %cst_52 : f32 to vector<1x128xf32>
    %117 = arith.divf %115, %116 : vector<1x128xf32>
    %118 = arith.mulf %111, %111 : vector<8x128xf32>
    %cst_53 = arith.constant dense<0.000000e+00> : vector<128xf32>
    %119 = vector.multi_reduction <add>, %118, %cst_53 [0] : vector<8x128xf32> to vector<128xf32>
    %120 = vector.shape_cast %119 : vector<128xf32> to vector<1x128xf32>
    %cst_54 = arith.constant 8.000000e+00 : f32
    %121 = vector.broadcast %cst_54 : f32 to vector<1x128xf32>
    %122 = arith.divf %120, %121 : vector<1x128xf32>
    %123 = arith.mulf %117, %117 : vector<1x128xf32>
    %124 = arith.subf %122, %123 : vector<1x128xf32>
    %cst_55 = arith.constant 0.000000e+00 : f32
    %125 = vector.broadcast %cst_55 : f32 to vector<1x128xf32>
    %126 = arith.maximumf %124, %125 : vector<1x128xf32>
    %127 = vector.broadcast %117 : vector<1x128xf32> to vector<8x128xf32>
    %128 = arith.subf %111, %127 : vector<8x128xf32>
    %cst_56 = arith.constant 9.99999974E-6 : f32
    %129 = vector.broadcast %cst_56 : f32 to vector<1x128xf32>
    %130 = arith.addf %126, %129 : vector<1x128xf32>
    %131 = math.rsqrt %130 : vector<1x128xf32>
    %132 = vector.broadcast %131 : vector<1x128xf32> to vector<8x128xf32>
    %133 = arith.mulf %128, %132 : vector<8x128xf32>
    %134 = vector.broadcast %112 : vector<1x128xf32> to vector<8x128xf32>
    %135 = arith.mulf %133, %134 : vector<8x128xf32>
    %136 = vector.broadcast %113 : vector<1x128xf32> to vector<8x128xf32>
    %137 = arith.addf %135, %136 : vector<8x128xf32>
    %cst_57 = arith.constant 0.000000e+00 : f32
    %138 = vector.broadcast %cst_57 : f32 to vector<8x128xf32>
    %139 = arith.cmpf ogt, %137, %138 : vector<8x128xf32>
    %cst_58 = arith.constant 0.00999999977 : f32
    %140 = vector.broadcast %cst_58 : f32 to vector<8x128xf32>
    %141 = arith.mulf %140, %137 : vector<8x128xf32>
    %142 = arith.select %139, %137, %141 : vector<8x128xi1>, vector<8x128xf32>
    %c0_59 = arith.constant 0 : index
    %c0_60 = arith.constant 0 : index
    %143 = vector.load %arg6[%c0_59, %c0_60] : memref<128x128xbf16, #tpu.memory_space<vmem>>, vector<128x128xbf16>
    %144 = arith.truncf %142 : vector<8x128xf32> to vector<8x128xbf16>
    %cst_61 = arith.constant dense<0.000000e+00> : vector<8x128xf32>
    %145 = tpu.matmul %144, %143, %cst_61 {dimension_numbers = #tpu.dot_dimension_numbers<[1], [0], [0], [1], [0, 0, 1, 1], [], []>} : vector<8x128xbf16>, vector<128x128xbf16>, vector<8x128xf32> -> vector<8x128xf32>
    %c11 = arith.constant 11 : index
    %c0_62 = arith.constant 0 : index
    %146 = vector.load %arg1[%c11, %c0_62] : memref<32x512xf32, #tpu.memory_space<vmem>>, vector<1x128xf32>
    %147 = vector.broadcast %146 : vector<1x128xf32> to vector<8x128xf32>
    %148 = arith.addf %145, %147 : vector<8x128xf32>
    %c12 = arith.constant 12 : index
    %c0_63 = arith.constant 0 : index
    %149 = vector.load %arg1[%c12, %c0_63] : memref<32x512xf32, #tpu.memory_space<vmem>>, vector<1x128xf32>
    %c13 = arith.constant 13 : index
    %c0_64 = arith.constant 0 : index
    %150 = vector.load %arg1[%c13, %c0_64] : memref<32x512xf32, #tpu.memory_space<vmem>>, vector<1x128xf32>
    %cst_65 = arith.constant dense<0.000000e+00> : vector<128xf32>
    %151 = vector.multi_reduction <add>, %148, %cst_65 [0] : vector<8x128xf32> to vector<128xf32>
    %152 = vector.shape_cast %151 : vector<128xf32> to vector<1x128xf32>
    %cst_66 = arith.constant 8.000000e+00 : f32
    %153 = vector.broadcast %cst_66 : f32 to vector<1x128xf32>
    %154 = arith.divf %152, %153 : vector<1x128xf32>
    %155 = arith.mulf %148, %148 : vector<8x128xf32>
    %cst_67 = arith.constant dense<0.000000e+00> : vector<128xf32>
    %156 = vector.multi_reduction <add>, %155, %cst_67 [0] : vector<8x128xf32> to vector<128xf32>
    %157 = vector.shape_cast %156 : vector<128xf32> to vector<1x128xf32>
    %cst_68 = arith.constant 8.000000e+00 : f32
    %158 = vector.broadcast %cst_68 : f32 to vector<1x128xf32>
    %159 = arith.divf %157, %158 : vector<1x128xf32>
    %160 = arith.mulf %154, %154 : vector<1x128xf32>
    %161 = arith.subf %159, %160 : vector<1x128xf32>
    %cst_69 = arith.constant 0.000000e+00 : f32
    %162 = vector.broadcast %cst_69 : f32 to vector<1x128xf32>
    %163 = arith.maximumf %161, %162 : vector<1x128xf32>
    %164 = vector.broadcast %154 : vector<1x128xf32> to vector<8x128xf32>
    %165 = arith.subf %148, %164 : vector<8x128xf32>
    %cst_70 = arith.constant 9.99999974E-6 : f32
    %166 = vector.broadcast %cst_70 : f32 to vector<1x128xf32>
    %167 = arith.addf %163, %166 : vector<1x128xf32>
    %168 = math.rsqrt %167 : vector<1x128xf32>
    %169 = vector.broadcast %168 : vector<1x128xf32> to vector<8x128xf32>
    %170 = arith.mulf %165, %169 : vector<8x128xf32>
    %171 = vector.broadcast %149 : vector<1x128xf32> to vector<8x128xf32>
    %172 = arith.mulf %170, %171 : vector<8x128xf32>
    %173 = vector.broadcast %150 : vector<1x128xf32> to vector<8x128xf32>
    %174 = arith.addf %172, %173 : vector<8x128xf32>
    %cst_71 = arith.constant 0.000000e+00 : f32
    %175 = vector.broadcast %cst_71 : f32 to vector<8x128xf32>
    %176 = arith.cmpf ogt, %174, %175 : vector<8x128xf32>
    %cst_72 = arith.constant 0.00999999977 : f32
    %177 = vector.broadcast %cst_72 : f32 to vector<8x128xf32>
    %178 = arith.mulf %177, %174 : vector<8x128xf32>
    %179 = arith.select %176, %174, %178 : vector<8x128xi1>, vector<8x128xf32>
    %c0_73 = arith.constant 0 : index
    %c0_74 = arith.constant 0 : index
    %180 = vector.load %arg7[%c0_73, %c0_74] : memref<128x256xbf16, #tpu.memory_space<vmem>>, vector<128x256xbf16>
    %181 = arith.truncf %179 : vector<8x128xf32> to vector<8x128xbf16>
    %cst_75 = arith.constant dense<0.000000e+00> : vector<8x256xf32>
    %182 = tpu.matmul %181, %180, %cst_75 {dimension_numbers = #tpu.dot_dimension_numbers<[1], [0], [0], [1], [0, 0, 1, 1], [], []>} : vector<8x128xbf16>, vector<128x256xbf16>, vector<8x256xf32> -> vector<8x256xf32>
    %c14 = arith.constant 14 : index
    %c0_76 = arith.constant 0 : index
    %183 = vector.load %arg1[%c14, %c0_76] : memref<32x512xf32, #tpu.memory_space<vmem>>, vector<1x256xf32>
    %184 = vector.broadcast %183 : vector<1x256xf32> to vector<8x256xf32>
    %185 = arith.addf %182, %184 : vector<8x256xf32>
    %186 = vector.extract_strided_slice %185 {offsets = [0, 0], sizes = [8, 128], strides = [1, 1]} : vector<8x256xf32> to vector<8x128xf32>
    %187 = vector.extract_strided_slice %185 {offsets = [0, 128], sizes = [8, 128], strides = [1, 1]} : vector<8x256xf32> to vector<8x128xf32>
    %c0_77 = arith.constant 0 : index
    %c896 = arith.constant 896 : index
    %188 = vector.load %arg14[%c0_77, %c896] : memref<8x1024xf32, #tpu.memory_space<vmem>>, vector<8x128xf32>
    tpu.vector_store %arg14[%c0_77, %c896], %187 {strides = array<i32>} : memref<8x1024xf32, #tpu.memory_space<vmem>>, vector<8x128xf32>,
    %c10_i32 = arith.constant 10 : i32
    %189 = vector.broadcast %c10_i32 : i32 to vector<1x128xi32>
    %190 = arith.cmpi slt, %3, %189 : vector<1x128xi32>
    %cst_78 = arith.constant -1.000000e+30 : f32
    %191 = vector.shape_cast %190 : vector<1x128xi1> to vector<1x128xi1>
    %192 = vector.broadcast %191 : vector<1x128xi1> to vector<8x128xi1>
    %193 = vector.broadcast %cst_78 : f32 to vector<8x128xf32>
    %194 = arith.select %192, %186, %193 : vector<8x128xi1>, vector<8x128xf32>
    %cst_79 = arith.constant dense<0xFF800000> : vector<8xf32>
    %195 = vector.multi_reduction <maximumf>, %194, %cst_79 [1] : vector<8x128xf32> to vector<8xf32>
    %196 = vector.shape_cast %195 : vector<8xf32> to vector<8x1xf32>
    %197 = vector.broadcast %196 : vector<8x1xf32> to vector<8x128xf32>
    %198 = arith.subf %194, %197 : vector<8x128xf32>
    %199 = math.exp %198 : vector<8x128xf32>
    %cst_80 = arith.constant dense<0.000000e+00> : vector<8xf32>
    %200 = vector.multi_reduction <add>, %199, %cst_80 [1] : vector<8x128xf32> to vector<8xf32>
    %201 = vector.shape_cast %200 : vector<8xf32> to vector<8x1xf32>
    %202 = vector.broadcast %201 : vector<8x1xf32> to vector<8x128xf32>
    %203 = arith.divf %199, %202 : vector<8x128xf32>
    %cst_81 = arith.constant 1.000000e+00 : f32
    %204 = vector.broadcast %cst_81 : f32 to vector<8x128xf32>
    %205 = arith.mulf %204, %203 : vector<8x128xf32>
    %cst_82 = arith.constant 9.99999971E-10 : f32
    %206 = vector.broadcast %cst_82 : f32 to vector<8x128xf32>
    %207 = arith.addf %206, %205 : vector<8x128xf32>
    %cst_83 = arith.constant 0.000000e+00 : f32
    %208 = vector.shape_cast %190 : vector<1x128xi1> to vector<1x128xi1>
    %209 = vector.broadcast %208 : vector<1x128xi1> to vector<8x128xi1>
    %210 = vector.broadcast %cst_83 : f32 to vector<8x128xf32>
    %211 = arith.select %209, %207, %210 : vector<8x128xi1>, vector<8x128xf32>
    %c0_84 = arith.constant 0 : index
    %c768 = arith.constant 768 : index
    %212 = vector.load %arg14[%c0_84, %c768] : memref<8x1024xf32, #tpu.memory_space<vmem>>, vector<8x128xf32>
    tpu.vector_store %arg14[%c0_84, %c768], %211 {strides = array<i32>} : memref<8x1024xf32, #tpu.memory_space<vmem>>, vector<8x128xf32>,
    %c0_85 = arith.constant 0 : index
    %c0_86 = arith.constant 0 : index
    %213 = vector.load %arg8[%c0_85, %c0_86] : memref<128x128xbf16, #tpu.memory_space<vmem>>, vector<128x128xbf16>
    %214 = arith.truncf %102 : vector<8x128xf32> to vector<8x128xbf16>
    %cst_87 = arith.constant dense<0.000000e+00> : vector<8x128xf32>
    %215 = tpu.matmul %214, %213, %cst_87 {dimension_numbers = #tpu.dot_dimension_numbers<[1], [0], [0], [1], [0, 0, 1, 1], [], []>} : vector<8x128xbf16>, vector<128x128xbf16>, vector<8x128xf32> -> vector<8x128xf32>
    %c15 = arith.constant 15 : index
    %c0_88 = arith.constant 0 : index
    %216 = vector.load %arg1[%c15, %c0_88] : memref<32x512xf32, #tpu.memory_space<vmem>>, vector<1x128xf32>
    %217 = vector.broadcast %216 : vector<1x128xf32> to vector<8x128xf32>
    %218 = arith.addf %215, %217 : vector<8x128xf32>
    %c16 = arith.constant 16 : index
    %c0_89 = arith.constant 0 : index
    %219 = vector.load %arg1[%c16, %c0_89] : memref<32x512xf32, #tpu.memory_space<vmem>>, vector<1x128xf32>
    %c17 = arith.constant 17 : index
    %c0_90 = arith.constant 0 : index
    %220 = vector.load %arg1[%c17, %c0_90] : memref<32x512xf32, #tpu.memory_space<vmem>>, vector<1x128xf32>
    %cst_91 = arith.constant dense<0.000000e+00> : vector<128xf32>
    %221 = vector.multi_reduction <add>, %218, %cst_91 [0] : vector<8x128xf32> to vector<128xf32>
    %222 = vector.shape_cast %221 : vector<128xf32> to vector<1x128xf32>
    %cst_92 = arith.constant 8.000000e+00 : f32
    %223 = vector.broadcast %cst_92 : f32 to vector<1x128xf32>
    %224 = arith.divf %222, %223 : vector<1x128xf32>
    %225 = arith.mulf %218, %218 : vector<8x128xf32>
    %cst_93 = arith.constant dense<0.000000e+00> : vector<128xf32>
    %226 = vector.multi_reduction <add>, %225, %cst_93 [0] : vector<8x128xf32> to vector<128xf32>
    %227 = vector.shape_cast %226 : vector<128xf32> to vector<1x128xf32>
    %cst_94 = arith.constant 8.000000e+00 : f32
    %228 = vector.broadcast %cst_94 : f32 to vector<1x128xf32>
    %229 = arith.divf %227, %228 : vector<1x128xf32>
    %230 = arith.mulf %224, %224 : vector<1x128xf32>
    %231 = arith.subf %229, %230 : vector<1x128xf32>
    %cst_95 = arith.constant 0.000000e+00 : f32
    %232 = vector.broadcast %cst_95 : f32 to vector<1x128xf32>
    %233 = arith.maximumf %231, %232 : vector<1x128xf32>
    %234 = vector.broadcast %224 : vector<1x128xf32> to vector<8x128xf32>
    %235 = arith.subf %218, %234 : vector<8x128xf32>
    %cst_96 = arith.constant 9.99999974E-6 : f32
    %236 = vector.broadcast %cst_96 : f32 to vector<1x128xf32>
    %237 = arith.addf %233, %236 : vector<1x128xf32>
    %238 = math.rsqrt %237 : vector<1x128xf32>
    %239 = vector.broadcast %238 : vector<1x128xf32> to vector<8x128xf32>
    %240 = arith.mulf %235, %239 : vector<8x128xf32>
    %241 = vector.broadcast %219 : vector<1x128xf32> to vector<8x128xf32>
    %242 = arith.mulf %240, %241 : vector<8x128xf32>
    %243 = vector.broadcast %220 : vector<1x128xf32> to vector<8x128xf32>
    %244 = arith.addf %242, %243 : vector<8x128xf32>
    %cst_97 = arith.constant 0.000000e+00 : f32
    %245 = vector.broadcast %cst_97 : f32 to vector<8x128xf32>
    %246 = arith.cmpf ogt, %244, %245 : vector<8x128xf32>
    %cst_98 = arith.constant 0.00999999977 : f32
    %247 = vector.broadcast %cst_98 : f32 to vector<8x128xf32>
    %248 = arith.mulf %247, %244 : vector<8x128xf32>
    %249 = arith.select %246, %244, %248 : vector<8x128xi1>, vector<8x128xf32>
    %c0_99 = arith.constant 0 : index
    %c0_100 = arith.constant 0 : index
    %250 = vector.load %arg9[%c0_99, %c0_100] : memref<128x128xbf16, #tpu.memory_space<vmem>>, vector<128x128xbf16>
    %251 = arith.truncf %249 : vector<8x128xf32> to vector<8x128xbf16>
    %cst_101 = arith.constant dense<0.000000e+00> : vector<8x128xf32>
    %252 = tpu.matmul %251, %250, %cst_101 {dimension_numbers = #tpu.dot_dimension_numbers<[1], [0], [0], [1], [0, 0, 1, 1], [], []>} : vector<8x128xbf16>, vector<128x128xbf16>, vector<8x128xf32> -> vector<8x128xf32>
    %c18 = arith.constant 18 : index
    %c0_102 = arith.constant 0 : index
    %253 = vector.load %arg1[%c18, %c0_102] : memref<32x512xf32, #tpu.memory_space<vmem>>, vector<1x128xf32>
    %254 = vector.broadcast %253 : vector<1x128xf32> to vector<8x128xf32>
    %255 = arith.addf %252, %254 : vector<8x128xf32>
    %c19 = arith.constant 19 : index
    %c0_103 = arith.constant 0 : index
    %256 = vector.load %arg1[%c19, %c0_103] : memref<32x512xf32, #tpu.memory_space<vmem>>, vector<1x128xf32>
    %c20 = arith.constant 20 : index
    %c0_104 = arith.constant 0 : index
    %257 = vector.load %arg1[%c20, %c0_104] : memref<32x512xf32, #tpu.memory_space<vmem>>, vector<1x128xf32>
    %cst_105 = arith.constant dense<0.000000e+00> : vector<128xf32>
    %258 = vector.multi_reduction <add>, %255, %cst_105 [0] : vector<8x128xf32> to vector<128xf32>
    %259 = vector.shape_cast %258 : vector<128xf32> to vector<1x128xf32>
    %cst_106 = arith.constant 8.000000e+00 : f32
    %260 = vector.broadcast %cst_106 : f32 to vector<1x128xf32>
    %261 = arith.divf %259, %260 : vector<1x128xf32>
    %262 = arith.mulf %255, %255 : vector<8x128xf32>
    %cst_107 = arith.constant dense<0.000000e+00> : vector<128xf32>
    %263 = vector.multi_reduction <add>, %262, %cst_107 [0] : vector<8x128xf32> to vector<128xf32>
    %264 = vector.shape_cast %263 : vector<128xf32> to vector<1x128xf32>
    %cst_108 = arith.constant 8.000000e+00 : f32
    %265 = vector.broadcast %cst_108 : f32 to vector<1x128xf32>
    %266 = arith.divf %264, %265 : vector<1x128xf32>
    %267 = arith.mulf %261, %261 : vector<1x128xf32>
    %268 = arith.subf %266, %267 : vector<1x128xf32>
    %cst_109 = arith.constant 0.000000e+00 : f32
    %269 = vector.broadcast %cst_109 : f32 to vector<1x128xf32>
    %270 = arith.maximumf %268, %269 : vector<1x128xf32>
    %271 = vector.broadcast %261 : vector<1x128xf32> to vector<8x128xf32>
    %272 = arith.subf %255, %271 : vector<8x128xf32>
    %cst_110 = arith.constant 9.99999974E-6 : f32
    %273 = vector.broadcast %cst_110 : f32 to vector<1x128xf32>
    %274 = arith.addf %270, %273 : vector<1x128xf32>
    %275 = math.rsqrt %274 : vector<1x128xf32>
    %276 = vector.broadcast %275 : vector<1x128xf32> to vector<8x128xf32>
    %277 = arith.mulf %272, %276 : vector<8x128xf32>
    %278 = vector.broadcast %256 : vector<1x128xf32> to vector<8x128xf32>
    %279 = arith.mulf %277, %278 : vector<8x128xf32>
    %280 = vector.broadcast %257 : vector<1x128xf32> to vector<8x128xf32>
    %281 = arith.addf %279, %280 : vector<8x128xf32>
    %cst_111 = arith.constant 0.000000e+00 : f32
    %282 = vector.broadcast %cst_111 : f32 to vector<8x128xf32>
    %283 = arith.cmpf ogt, %281, %282 : vector<8x128xf32>
    %cst_112 = arith.constant 0.00999999977 : f32
    %284 = vector.broadcast %cst_112 : f32 to vector<8x128xf32>
    %285 = arith.mulf %284, %281 : vector<8x128xf32>
    %286 = arith.select %283, %281, %285 : vector<8x128xi1>, vector<8x128xf32>
    %c0_113 = arith.constant 0 : index
    %c0_114 = arith.constant 0 : index
    %287 = vector.load %arg10[%c0_113, %c0_114] : memref<128x128xbf16, #tpu.memory_space<vmem>>, vector<128x128xbf16>
    %288 = arith.truncf %286 : vector<8x128xf32> to vector<8x128xbf16>
    %cst_115 = arith.constant dense<0.000000e+00> : vector<8x128xf32>
    %289 = tpu.matmul %288, %287, %cst_115 {dimension_numbers = #tpu.dot_dimension_numbers<[1], [0], [0], [1], [0, 0, 1, 1], [], []>} : vector<8x128xbf16>, vector<128x128xbf16>, vector<8x128xf32> -> vector<8x128xf32>
    %c21 = arith.constant 21 : index
    %c0_116 = arith.constant 0 : index
    %290 = vector.load %arg1[%c21, %c0_116] : memref<32x512xf32, #tpu.memory_space<vmem>>, vector<1x128xf32>
    %291 = vector.broadcast %290 : vector<1x128xf32> to vector<8x128xf32>
    %292 = arith.addf %289, %291 : vector<8x128xf32>
    %c0_117 = arith.constant 0 : index
    %c0_118 = arith.constant 0 : index
    %293 = vector.load %arg15[%c0_117, %c0_118] : memref<8x128xf32, #tpu.memory_space<vmem>>, vector<8x128xf32>
    tpu.vector_store %arg15[%c0_117, %c0_118], %292 {strides = array<i32>} : memref<8x128xf32, #tpu.memory_space<vmem>>, vector<8x128xf32>,
    %c0_119 = arith.constant 0 : index
    %c0_120 = arith.constant 0 : index
    %294 = vector.load %arg11[%c0_119, %c0_120] : memref<128x128xbf16, #tpu.memory_space<vmem>>, vector<128x128xbf16>
    %295 = arith.truncf %97 : vector<8x128xf32> to vector<8x128xbf16>
    %cst_121 = arith.constant dense<0.000000e+00> : vector<8x128xf32>
    %296 = tpu.matmul %295, %294, %cst_121 {dimension_numbers = #tpu.dot_dimension_numbers<[1], [0], [0], [1], [0, 0, 1, 1], [], []>} : vector<8x128xbf16>, vector<128x128xbf16>, vector<8x128xf32> -> vector<8x128xf32>
    %c22 = arith.constant 22 : index
    %c0_122 = arith.constant 0 : index
    %297 = vector.load %arg1[%c22, %c0_122] : memref<32x512xf32, #tpu.memory_space<vmem>>, vector<1x128xf32>
    %298 = vector.broadcast %297 : vector<1x128xf32> to vector<8x128xf32>
    %299 = arith.addf %296, %298 : vector<8x128xf32>
    %c23 = arith.constant 23 : index
    %c0_123 = arith.constant 0 : index
    %300 = vector.load %arg1[%c23, %c0_123] : memref<32x512xf32, #tpu.memory_space<vmem>>, vector<1x128xf32>
    %c24 = arith.constant 24 : index
    %c0_124 = arith.constant 0 : index
    %301 = vector.load %arg1[%c24, %c0_124] : memref<32x512xf32, #tpu.memory_space<vmem>>, vector<1x128xf32>
    %cst_125 = arith.constant dense<0.000000e+00> : vector<128xf32>
    %302 = vector.multi_reduction <add>, %299, %cst_125 [0] : vector<8x128xf32> to vector<128xf32>
    %303 = vector.shape_cast %302 : vector<128xf32> to vector<1x128xf32>
    %cst_126 = arith.constant 8.000000e+00 : f32
    %304 = vector.broadcast %cst_126 : f32 to vector<1x128xf32>
    %305 = arith.divf %303, %304 : vector<1x128xf32>
    %306 = arith.mulf %299, %299 : vector<8x128xf32>
    %cst_127 = arith.constant dense<0.000000e+00> : vector<128xf32>
    %307 = vector.multi_reduction <add>, %306, %cst_127 [0] : vector<8x128xf32> to vector<128xf32>
    %308 = vector.shape_cast %307 : vector<128xf32> to vector<1x128xf32>
    %cst_128 = arith.constant 8.000000e+00 : f32
    %309 = vector.broadcast %cst_128 : f32 to vector<1x128xf32>
    %310 = arith.divf %308, %309 : vector<1x128xf32>
    %311 = arith.mulf %305, %305 : vector<1x128xf32>
    %312 = arith.subf %310, %311 : vector<1x128xf32>
    %cst_129 = arith.constant 0.000000e+00 : f32
    %313 = vector.broadcast %cst_129 : f32 to vector<1x128xf32>
    %314 = arith.maximumf %312, %313 : vector<1x128xf32>
    %315 = vector.broadcast %305 : vector<1x128xf32> to vector<8x128xf32>
    %316 = arith.subf %299, %315 : vector<8x128xf32>
    %cst_130 = arith.constant 9.99999974E-6 : f32
    %317 = vector.broadcast %cst_130 : f32 to vector<1x128xf32>
    %318 = arith.addf %314, %317 : vector<1x128xf32>
    %319 = math.rsqrt %318 : vector<1x128xf32>
    %320 = vector.broadcast %319 : vector<1x128xf32> to vector<8x128xf32>
    %321 = arith.mulf %316, %320 : vector<8x128xf32>
    %322 = vector.broadcast %300 : vector<1x128xf32> to vector<8x128xf32>
    %323 = arith.mulf %321, %322 : vector<8x128xf32>
    %324 = vector.broadcast %301 : vector<1x128xf32> to vector<8x128xf32>
    %325 = arith.addf %323, %324 : vector<8x128xf32>
    %cst_131 = arith.constant 0.000000e+00 : f32
    %326 = vector.broadcast %cst_131 : f32 to vector<8x128xf32>
    %327 = arith.cmpf ogt, %325, %326 : vector<8x128xf32>
    %cst_132 = arith.constant 0.00999999977 : f32
    %328 = vector.broadcast %cst_132 : f32 to vector<8x128xf32>
    %329 = arith.mulf %328, %325 : vector<8x128xf32>
    %330 = arith.select %327, %325, %329 : vector<8x128xi1>, vector<8x128xf32>
    %c0_133 = arith.constant 0 : index
    %c0_134 = arith.constant 0 : index
    %331 = vector.load %arg12[%c0_133, %c0_134] : memref<128x128xbf16, #tpu.memory_space<vmem>>, vector<128x128xbf16>
    %332 = arith.truncf %330 : vector<8x128xf32> to vector<8x128xbf16>
    %cst_135 = arith.constant dense<0.000000e+00> : vector<8x128xf32>
    %333 = tpu.matmul %332, %331, %cst_135 {dimension_numbers = #tpu.dot_dimension_numbers<[1], [0], [0], [1], [0, 0, 1, 1], [], []>} : vector<8x128xbf16>, vector<128x128xbf16>, vector<8x128xf32> -> vector<8x128xf32>
    %c25 = arith.constant 25 : index
    %c0_136 = arith.constant 0 : index
    %334 = vector.load %arg1[%c25, %c0_136] : memref<32x512xf32, #tpu.memory_space<vmem>>, vector<1x128xf32>
    %335 = vector.broadcast %334 : vector<1x128xf32> to vector<8x128xf32>
    %336 = arith.addf %333, %335 : vector<8x128xf32>
    %c26 = arith.constant 26 : index
    %c0_137 = arith.constant 0 : index
    %337 = vector.load %arg1[%c26, %c0_137] : memref<32x512xf32, #tpu.memory_space<vmem>>, vector<1x128xf32>
    %c27 = arith.constant 27 : index
    %c0_138 = arith.constant 0 : index
    %338 = vector.load %arg1[%c27, %c0_138] : memref<32x512xf32, #tpu.memory_space<vmem>>, vector<1x128xf32>
    %cst_139 = arith.constant dense<0.000000e+00> : vector<128xf32>
    %339 = vector.multi_reduction <add>, %336, %cst_139 [0] : vector<8x128xf32> to vector<128xf32>
    %340 = vector.shape_cast %339 : vector<128xf32> to vector<1x128xf32>
    %cst_140 = arith.constant 8.000000e+00 : f32
    %341 = vector.broadcast %cst_140 : f32 to vector<1x128xf32>
    %342 = arith.divf %340, %341 : vector<1x128xf32>
    %343 = arith.mulf %336, %336 : vector<8x128xf32>
    %cst_141 = arith.constant dense<0.000000e+00> : vector<128xf32>
    %344 = vector.multi_reduction <add>, %343, %cst_141 [0] : vector<8x128xf32> to vector<128xf32>
    %345 = vector.shape_cast %344 : vector<128xf32> to vector<1x128xf32>
    %cst_142 = arith.constant 8.000000e+00 : f32
    %346 = vector.broadcast %cst_142 : f32 to vector<1x128xf32>
    %347 = arith.divf %345, %346 : vector<1x128xf32>
    %348 = arith.mulf %342, %342 : vector<1x128xf32>
    %349 = arith.subf %347, %348 : vector<1x128xf32>
    %cst_143 = arith.constant 0.000000e+00 : f32
    %350 = vector.broadcast %cst_143 : f32 to vector<1x128xf32>
    %351 = arith.maximumf %349, %350 : vector<1x128xf32>
    %352 = vector.broadcast %342 : vector<1x128xf32> to vector<8x128xf32>
    %353 = arith.subf %336, %352 : vector<8x128xf32>
    %cst_144 = arith.constant 9.99999974E-6 : f32
    %354 = vector.broadcast %cst_144 : f32 to vector<1x128xf32>
    %355 = arith.addf %351, %354 : vector<1x128xf32>
    %356 = math.rsqrt %355 : vector<1x128xf32>
    %357 = vector.broadcast %356 : vector<1x128xf32> to vector<8x128xf32>
    %358 = arith.mulf %353, %357 : vector<8x128xf32>
    %359 = vector.broadcast %337 : vector<1x128xf32> to vector<8x128xf32>
    %360 = arith.mulf %358, %359 : vector<8x128xf32>
    %361 = vector.broadcast %338 : vector<1x128xf32> to vector<8x128xf32>
    %362 = arith.addf %360, %361 : vector<8x128xf32>
    %cst_145 = arith.constant 0.000000e+00 : f32
    %363 = vector.broadcast %cst_145 : f32 to vector<8x128xf32>
    %364 = arith.cmpf ogt, %362, %363 : vector<8x128xf32>
    %cst_146 = arith.constant 0.00999999977 : f32
    %365 = vector.broadcast %cst_146 : f32 to vector<8x128xf32>
    %366 = arith.mulf %365, %362 : vector<8x128xf32>
    %367 = arith.select %364, %362, %366 : vector<8x128xi1>, vector<8x128xf32>
    %c0_147 = arith.constant 0 : index
    %c0_148 = arith.constant 0 : index
    %368 = vector.load %arg13[%c0_147, %c0_148] : memref<128x512xbf16, #tpu.memory_space<vmem>>, vector<128x512xbf16>
    %369 = arith.truncf %367 : vector<8x128xf32> to vector<8x128xbf16>
    %cst_149 = arith.constant dense<0.000000e+00> : vector<8x512xf32>
    %370 = tpu.matmul %369, %368, %cst_149 {dimension_numbers = #tpu.dot_dimension_numbers<[1], [0], [0], [1], [0, 0, 1, 1], [], []>} : vector<8x128xbf16>, vector<128x512xbf16>, vector<8x512xf32> -> vector<8x512xf32>
    %c28 = arith.constant 28 : index
    %c0_150 = arith.constant 0 : index
    %371 = vector.load %arg1[%c28, %c0_150] : memref<32x512xf32, #tpu.memory_space<vmem>>, vector<1x512xf32>
    %372 = vector.broadcast %371 : vector<1x512xf32> to vector<8x512xf32>
    %373 = arith.addf %370, %372 : vector<8x512xf32>
    %c0_151 = arith.constant 0 : index
    %c0_152 = arith.constant 0 : index
    %374 = vector.load %arg1[%c0_151, %c0_152] : memref<32x512xf32, #tpu.memory_space<vmem>>, vector<1x128xf32>
    %cst_153 = arith.constant -8.000000e+00 : f32
    %375 = vector.broadcast %cst_153 : f32 to vector<1x128xf32>
    %376 = arith.subf %374, %375 : vector<1x128xf32>
    %cst_154 = arith.constant 0.000000e+00 : f32
    %377 = vector.broadcast %cst_154 : f32 to vector<1x128xf32>
    %378 = arith.maximumf %376, %377 : vector<1x128xf32>
    %379 = math.absf %376 : vector<1x128xf32>
    %cst_155 = arith.constant 0.000000e+00 : f32
    %380 = vector.broadcast %cst_155 : f32 to vector<1x128xf32>
    %381 = arith.subf %380, %379 : vector<1x128xf32>
    %382 = math.exp %381 : vector<1x128xf32>
    %cst_156 = arith.constant 1.000000e+00 : f32
    %383 = vector.broadcast %cst_156 : f32 to vector<1x128xf32>
    %384 = arith.addf %383, %382 : vector<1x128xf32>
    %385 = math.log %384 : vector<1x128xf32>
    %386 = arith.addf %378, %385 : vector<1x128xf32>
    %cst_157 = arith.constant -8.000000e+00 : f32
    %387 = vector.broadcast %cst_157 : f32 to vector<1x128xf32>
    %388 = arith.addf %387, %386 : vector<1x128xf32>
    %cst_158 = arith.constant 8.000000e+00 : f32
    %389 = vector.broadcast %cst_158 : f32 to vector<1x128xf32>
    %390 = arith.subf %389, %388 : vector<1x128xf32>
    %cst_159 = arith.constant 0.000000e+00 : f32
    %391 = vector.broadcast %cst_159 : f32 to vector<1x128xf32>
    %392 = arith.maximumf %390, %391 : vector<1x128xf32>
    %393 = math.absf %390 : vector<1x128xf32>
    %cst_160 = arith.constant 0.000000e+00 : f32
    %394 = vector.broadcast %cst_160 : f32 to vector<1x128xf32>
    %395 = arith.subf %394, %393 : vector<1x128xf32>
    %396 = math.exp %395 : vector<1x128xf32>
    %cst_161 = arith.constant 1.000000e+00 : f32
    %397 = vector.broadcast %cst_161 : f32 to vector<1x128xf32>
    %398 = arith.addf %397, %396 : vector<1x128xf32>
    %399 = math.log %398 : vector<1x128xf32>
    %400 = arith.addf %392, %399 : vector<1x128xf32>
    %cst_162 = arith.constant 8.000000e+00 : f32
    %401 = vector.broadcast %cst_162 : f32 to vector<1x128xf32>
    %402 = arith.subf %401, %400 : vector<1x128xf32>
    %403 = arith.subf %0, %292 : vector<8x128xf32>
    %cst_163 = arith.constant 0.000000e+00 : f32
    %404 = vector.broadcast %cst_163 : f32 to vector<1x128xf32>
    %405 = arith.subf %404, %402 : vector<1x128xf32>
    %406 = math.exp %405 : vector<1x128xf32>
    %407 = vector.broadcast %406 : vector<1x128xf32> to vector<8x128xf32>
    %408 = arith.mulf %403, %407 : vector<8x128xf32>
    %cst_164 = arith.constant -5.000000e-01 : f32
    %409 = vector.broadcast %cst_164 : f32 to vector<8x128xf32>
    %410 = arith.mulf %409, %408 : vector<8x128xf32>
    %411 = arith.mulf %410, %408 : vector<8x128xf32>
    %412 = vector.broadcast %402 : vector<1x128xf32> to vector<8x128xf32>
    %413 = arith.subf %411, %412 : vector<8x128xf32>
    %cst_165 = arith.constant 0.918938517 : f32
    %414 = vector.broadcast %cst_165 : f32 to vector<8x128xf32>
    %415 = arith.subf %413, %414 : vector<8x128xf32>
    %c64_i32 = arith.constant 64 : i32
    %416 = vector.broadcast %c64_i32 : i32 to vector<1x128xi32>
    %417 = arith.cmpi slt, %4, %416 : vector<1x128xi32>
    %cst_166 = arith.constant 0.000000e+00 : f32
    %418 = vector.shape_cast %417 : vector<1x128xi1> to vector<1x128xi1>
    %419 = vector.broadcast %418 : vector<1x128xi1> to vector<8x128xi1>
    %420 = vector.broadcast %cst_166 : f32 to vector<8x128xf32>
    %421 = arith.select %419, %415, %420 : vector<8x128xi1>, vector<8x128xf32>
    %cst_167 = arith.constant dense<0.000000e+00> : vector<8xf32>
    %422 = vector.multi_reduction <add>, %421, %cst_167 [1] : vector<8x128xf32> to vector<8xf32>
    %423 = vector.shape_cast %422 : vector<8xf32> to vector<8x1xf32>
    %cst_168 = arith.constant dense<0.000000e+00> : vector<1xf32>
    %424 = vector.multi_reduction <add>, %423, %cst_168 [0] : vector<8x1xf32> to vector<1xf32>
    %425 = vector.shape_cast %424 : vector<1xf32> to vector<1x1xf32>
    %cst_169 = arith.constant 8.000000e+00 : f32
    %426 = vector.broadcast %cst_169 : f32 to vector<1x1xf32>
    %427 = arith.divf %425, %426 : vector<1x1xf32>
    %cst_170 = arith.constant 0.000000e+00 : f32
    %428 = vector.broadcast %cst_170 : f32 to vector<1x1xf32>
    %429 = arith.subf %428, %427 : vector<1x1xf32>
    %430 = vector.extract_strided_slice %87 {offsets = [0, 0], sizes = [8, 16], strides = [1, 1]} : vector<8x128xf32> to vector<8x16xf32>
    %431 = vector.extract_strided_slice %88 {offsets = [0, 0], sizes = [8, 16], strides = [1, 1]} : vector<8x128xf32> to vector<8x16xf32>
    %432 = math.exp %431 : vector<8x16xf32>
    %cst_171 = arith.constant 0.000000e+00 : f32
    %433 = vector.broadcast %cst_171 : f32 to vector<8x1xf32>
    %434 = vector.extract_strided_slice %373 {offsets = [0, 0], sizes = [8, 16], strides = [1, 1]} : vector<8x512xf32> to vector<8x16xf32>
    %435 = vector.extract_strided_slice %373 {offsets = [0, 256], sizes = [8, 16], strides = [1, 1]} : vector<8x512xf32> to vector<8x16xf32>
    %436 = arith.subf %430, %434 : vector<8x16xf32>
    %437 = arith.mulf %436, %436 : vector<8x16xf32>
    %438 = arith.addf %432, %437 : vector<8x16xf32>
    %cst_172 = arith.constant 0.000000e+00 : f32
    %439 = vector.broadcast %cst_172 : f32 to vector<8x16xf32>
    %440 = arith.subf %439, %435 : vector<8x16xf32>
    %441 = math.exp %440 : vector<8x16xf32>
    %442 = arith.mulf %438, %441 : vector<8x16xf32>
    %cst_173 = arith.constant -1.000000e+00 : f32
    %443 = vector.broadcast %cst_173 : f32 to vector<8x16xf32>
    %444 = arith.addf %443, %442 : vector<8x16xf32>
    %445 = arith.addf %444, %435 : vector<8x16xf32>
    %446 = arith.subf %445, %431 : vector<8x16xf32>
    %cst_174 = arith.constant 5.000000e-01 : f32
    %447 = vector.broadcast %cst_174 : f32 to vector<8x16xf32>
    %448 = arith.mulf %447, %446 : vector<8x16xf32>
    %cst_175 = arith.constant dense<0.000000e+00> : vector<8xf32>
    %449 = vector.multi_reduction <add>, %448, %cst_175 [1] : vector<8x16xf32> to vector<8xf32>
    %450 = vector.shape_cast %449 : vector<8xf32> to vector<8x1xf32>
    %451 = vector.extract_strided_slice %211 {offsets = [0, 0], sizes = [8, 1], strides = [1, 1]} : vector<8x128xf32> to vector<8x1xf32>
    %452 = arith.mulf %451, %450 : vector<8x1xf32>
    %453 = arith.addf %433, %452 : vector<8x1xf32>
    %454 = vector.extract_strided_slice %373 {offsets = [0, 16], sizes = [8, 16], strides = [1, 1]} : vector<8x512xf32> to vector<8x16xf32>
    %455 = vector.extract_strided_slice %373 {offsets = [0, 272], sizes = [8, 16], strides = [1, 1]} : vector<8x512xf32> to vector<8x16xf32>
    %456 = arith.subf %430, %454 : vector<8x16xf32>
    %457 = arith.mulf %456, %456 : vector<8x16xf32>
    %458 = arith.addf %432, %457 : vector<8x16xf32>
    %cst_176 = arith.constant 0.000000e+00 : f32
    %459 = vector.broadcast %cst_176 : f32 to vector<8x16xf32>
    %460 = arith.subf %459, %455 : vector<8x16xf32>
    %461 = math.exp %460 : vector<8x16xf32>
    %462 = arith.mulf %458, %461 : vector<8x16xf32>
    %cst_177 = arith.constant -1.000000e+00 : f32
    %463 = vector.broadcast %cst_177 : f32 to vector<8x16xf32>
    %464 = arith.addf %463, %462 : vector<8x16xf32>
    %465 = arith.addf %464, %455 : vector<8x16xf32>
    %466 = arith.subf %465, %431 : vector<8x16xf32>
    %cst_178 = arith.constant 5.000000e-01 : f32
    %467 = vector.broadcast %cst_178 : f32 to vector<8x16xf32>
    %468 = arith.mulf %467, %466 : vector<8x16xf32>
    %cst_179 = arith.constant dense<0.000000e+00> : vector<8xf32>
    %469 = vector.multi_reduction <add>, %468, %cst_179 [1] : vector<8x16xf32> to vector<8xf32>
    %470 = vector.shape_cast %469 : vector<8xf32> to vector<8x1xf32>
    %471 = vector.extract_strided_slice %211 {offsets = [0, 1], sizes = [8, 1], strides = [1, 1]} : vector<8x128xf32> to vector<8x1xf32>
    %472 = arith.mulf %471, %470 : vector<8x1xf32>
    %473 = arith.addf %453, %472 : vector<8x1xf32>
    %474 = vector.extract_strided_slice %373 {offsets = [0, 32], sizes = [8, 16], strides = [1, 1]} : vector<8x512xf32> to vector<8x16xf32>
    %475 = vector.extract_strided_slice %373 {offsets = [0, 288], sizes = [8, 16], strides = [1, 1]} : vector<8x512xf32> to vector<8x16xf32>
    %476 = arith.subf %430, %474 : vector<8x16xf32>
    %477 = arith.mulf %476, %476 : vector<8x16xf32>
    %478 = arith.addf %432, %477 : vector<8x16xf32>
    %cst_180 = arith.constant 0.000000e+00 : f32
    %479 = vector.broadcast %cst_180 : f32 to vector<8x16xf32>
    %480 = arith.subf %479, %475 : vector<8x16xf32>
    %481 = math.exp %480 : vector<8x16xf32>
    %482 = arith.mulf %478, %481 : vector<8x16xf32>
    %cst_181 = arith.constant -1.000000e+00 : f32
    %483 = vector.broadcast %cst_181 : f32 to vector<8x16xf32>
    %484 = arith.addf %483, %482 : vector<8x16xf32>
    %485 = arith.addf %484, %475 : vector<8x16xf32>
    %486 = arith.subf %485, %431 : vector<8x16xf32>
    %cst_182 = arith.constant 5.000000e-01 : f32
    %487 = vector.broadcast %cst_182 : f32 to vector<8x16xf32>
    %488 = arith.mulf %487, %486 : vector<8x16xf32>
    %cst_183 = arith.constant dense<0.000000e+00> : vector<8xf32>
    %489 = vector.multi_reduction <add>, %488, %cst_183 [1] : vector<8x16xf32> to vector<8xf32>
    %490 = vector.shape_cast %489 : vector<8xf32> to vector<8x1xf32>
    %491 = vector.extract_strided_slice %211 {offsets = [0, 2], sizes = [8, 1], strides = [1, 1]} : vector<8x128xf32> to vector<8x1xf32>
    %492 = arith.mulf %491, %490 : vector<8x1xf32>
    %493 = arith.addf %473, %492 : vector<8x1xf32>
    %494 = vector.extract_strided_slice %373 {offsets = [0, 48], sizes = [8, 16], strides = [1, 1]} : vector<8x512xf32> to vector<8x16xf32>
    %495 = vector.extract_strided_slice %373 {offsets = [0, 304], sizes = [8, 16], strides = [1, 1]} : vector<8x512xf32> to vector<8x16xf32>
    %496 = arith.subf %430, %494 : vector<8x16xf32>
    %497 = arith.mulf %496, %496 : vector<8x16xf32>
    %498 = arith.addf %432, %497 : vector<8x16xf32>
    %cst_184 = arith.constant 0.000000e+00 : f32
    %499 = vector.broadcast %cst_184 : f32 to vector<8x16xf32>
    %500 = arith.subf %499, %495 : vector<8x16xf32>
    %501 = math.exp %500 : vector<8x16xf32>
    %502 = arith.mulf %498, %501 : vector<8x16xf32>
    %cst_185 = arith.constant -1.000000e+00 : f32
    %503 = vector.broadcast %cst_185 : f32 to vector<8x16xf32>
    %504 = arith.addf %503, %502 : vector<8x16xf32>
    %505 = arith.addf %504, %495 : vector<8x16xf32>
    %506 = arith.subf %505, %431 : vector<8x16xf32>
    %cst_186 = arith.constant 5.000000e-01 : f32
    %507 = vector.broadcast %cst_186 : f32 to vector<8x16xf32>
    %508 = arith.mulf %507, %506 : vector<8x16xf32>
    %cst_187 = arith.constant dense<0.000000e+00> : vector<8xf32>
    %509 = vector.multi_reduction <add>, %508, %cst_187 [1] : vector<8x16xf32> to vector<8xf32>
    %510 = vector.shape_cast %509 : vector<8xf32> to vector<8x1xf32>
    %511 = vector.extract_strided_slice %211 {offsets = [0, 3], sizes = [8, 1], strides = [1, 1]} : vector<8x128xf32> to vector<8x1xf32>
    %512 = arith.mulf %511, %510 : vector<8x1xf32>
    %513 = arith.addf %493, %512 : vector<8x1xf32>
    %514 = vector.extract_strided_slice %373 {offsets = [0, 64], sizes = [8, 16], strides = [1, 1]} : vector<8x512xf32> to vector<8x16xf32>
    %515 = vector.extract_strided_slice %373 {offsets = [0, 320], sizes = [8, 16], strides = [1, 1]} : vector<8x512xf32> to vector<8x16xf32>
    %516 = arith.subf %430, %514 : vector<8x16xf32>
    %517 = arith.mulf %516, %516 : vector<8x16xf32>
    %518 = arith.addf %432, %517 : vector<8x16xf32>
    %cst_188 = arith.constant 0.000000e+00 : f32
    %519 = vector.broadcast %cst_188 : f32 to vector<8x16xf32>
    %520 = arith.subf %519, %515 : vector<8x16xf32>
    %521 = math.exp %520 : vector<8x16xf32>
    %522 = arith.mulf %518, %521 : vector<8x16xf32>
    %cst_189 = arith.constant -1.000000e+00 : f32
    %523 = vector.broadcast %cst_189 : f32 to vector<8x16xf32>
    %524 = arith.addf %523, %522 : vector<8x16xf32>
    %525 = arith.addf %524, %515 : vector<8x16xf32>
    %526 = arith.subf %525, %431 : vector<8x16xf32>
    %cst_190 = arith.constant 5.000000e-01 : f32
    %527 = vector.broadcast %cst_190 : f32 to vector<8x16xf32>
    %528 = arith.mulf %527, %526 : vector<8x16xf32>
    %cst_191 = arith.constant dense<0.000000e+00> : vector<8xf32>
    %529 = vector.multi_reduction <add>, %528, %cst_191 [1] : vector<8x16xf32> to vector<8xf32>
    %530 = vector.shape_cast %529 : vector<8xf32> to vector<8x1xf32>
    %531 = vector.extract_strided_slice %211 {offsets = [0, 4], sizes = [8, 1], strides = [1, 1]} : vector<8x128xf32> to vector<8x1xf32>
    %532 = arith.mulf %531, %530 : vector<8x1xf32>
    %533 = arith.addf %513, %532 : vector<8x1xf32>
    %534 = vector.extract_strided_slice %373 {offsets = [0, 80], sizes = [8, 16], strides = [1, 1]} : vector<8x512xf32> to vector<8x16xf32>
    %535 = vector.extract_strided_slice %373 {offsets = [0, 336], sizes = [8, 16], strides = [1, 1]} : vector<8x512xf32> to vector<8x16xf32>
    %536 = arith.subf %430, %534 : vector<8x16xf32>
    %537 = arith.mulf %536, %536 : vector<8x16xf32>
    %538 = arith.addf %432, %537 : vector<8x16xf32>
    %cst_192 = arith.constant 0.000000e+00 : f32
    %539 = vector.broadcast %cst_192 : f32 to vector<8x16xf32>
    %540 = arith.subf %539, %535 : vector<8x16xf32>
    %541 = math.exp %540 : vector<8x16xf32>
    %542 = arith.mulf %538, %541 : vector<8x16xf32>
    %cst_193 = arith.constant -1.000000e+00 : f32
    %543 = vector.broadcast %cst_193 : f32 to vector<8x16xf32>
    %544 = arith.addf %543, %542 : vector<8x16xf32>
    %545 = arith.addf %544, %535 : vector<8x16xf32>
    %546 = arith.subf %545, %431 : vector<8x16xf32>
    %cst_194 = arith.constant 5.000000e-01 : f32
    %547 = vector.broadcast %cst_194 : f32 to vector<8x16xf32>
    %548 = arith.mulf %547, %546 : vector<8x16xf32>
    %cst_195 = arith.constant dense<0.000000e+00> : vector<8xf32>
    %549 = vector.multi_reduction <add>, %548, %cst_195 [1] : vector<8x16xf32> to vector<8xf32>
    %550 = vector.shape_cast %549 : vector<8xf32> to vector<8x1xf32>
    %551 = vector.extract_strided_slice %211 {offsets = [0, 5], sizes = [8, 1], strides = [1, 1]} : vector<8x128xf32> to vector<8x1xf32>
    %552 = arith.mulf %551, %550 : vector<8x1xf32>
    %553 = arith.addf %533, %552 : vector<8x1xf32>
    %554 = vector.extract_strided_slice %373 {offsets = [0, 96], sizes = [8, 16], strides = [1, 1]} : vector<8x512xf32> to vector<8x16xf32>
    %555 = vector.extract_strided_slice %373 {offsets = [0, 352], sizes = [8, 16], strides = [1, 1]} : vector<8x512xf32> to vector<8x16xf32>
    %556 = arith.subf %430, %554 : vector<8x16xf32>
    %557 = arith.mulf %556, %556 : vector<8x16xf32>
    %558 = arith.addf %432, %557 : vector<8x16xf32>
    %cst_196 = arith.constant 0.000000e+00 : f32
    %559 = vector.broadcast %cst_196 : f32 to vector<8x16xf32>
    %560 = arith.subf %559, %555 : vector<8x16xf32>
    %561 = math.exp %560 : vector<8x16xf32>
    %562 = arith.mulf %558, %561 : vector<8x16xf32>
    %cst_197 = arith.constant -1.000000e+00 : f32
    %563 = vector.broadcast %cst_197 : f32 to vector<8x16xf32>
    %564 = arith.addf %563, %562 : vector<8x16xf32>
    %565 = arith.addf %564, %555 : vector<8x16xf32>
    %566 = arith.subf %565, %431 : vector<8x16xf32>
    %cst_198 = arith.constant 5.000000e-01 : f32
    %567 = vector.broadcast %cst_198 : f32 to vector<8x16xf32>
    %568 = arith.mulf %567, %566 : vector<8x16xf32>
    %cst_199 = arith.constant dense<0.000000e+00> : vector<8xf32>
    %569 = vector.multi_reduction <add>, %568, %cst_199 [1] : vector<8x16xf32> to vector<8xf32>
    %570 = vector.shape_cast %569 : vector<8xf32> to vector<8x1xf32>
    %571 = vector.extract_strided_slice %211 {offsets = [0, 6], sizes = [8, 1], strides = [1, 1]} : vector<8x128xf32> to vector<8x1xf32>
    %572 = arith.mulf %571, %570 : vector<8x1xf32>
    %573 = arith.addf %553, %572 : vector<8x1xf32>
    %574 = vector.extract_strided_slice %373 {offsets = [0, 112], sizes = [8, 16], strides = [1, 1]} : vector<8x512xf32> to vector<8x16xf32>
    %575 = vector.extract_strided_slice %373 {offsets = [0, 368], sizes = [8, 16], strides = [1, 1]} : vector<8x512xf32> to vector<8x16xf32>
    %576 = arith.subf %430, %574 : vector<8x16xf32>
    %577 = arith.mulf %576, %576 : vector<8x16xf32>
    %578 = arith.addf %432, %577 : vector<8x16xf32>
    %cst_200 = arith.constant 0.000000e+00 : f32
    %579 = vector.broadcast %cst_200 : f32 to vector<8x16xf32>
    %580 = arith.subf %579, %575 : vector<8x16xf32>
    %581 = math.exp %580 : vector<8x16xf32>
    %582 = arith.mulf %578, %581 : vector<8x16xf32>
    %cst_201 = arith.constant -1.000000e+00 : f32
    %583 = vector.broadcast %cst_201 : f32 to vector<8x16xf32>
    %584 = arith.addf %583, %582 : vector<8x16xf32>
    %585 = arith.addf %584, %575 : vector<8x16xf32>
    %586 = arith.subf %585, %431 : vector<8x16xf32>
    %cst_202 = arith.constant 5.000000e-01 : f32
    %587 = vector.broadcast %cst_202 : f32 to vector<8x16xf32>
    %588 = arith.mulf %587, %586 : vector<8x16xf32>
    %cst_203 = arith.constant dense<0.000000e+00> : vector<8xf32>
    %589 = vector.multi_reduction <add>, %588, %cst_203 [1] : vector<8x16xf32> to vector<8xf32>
    %590 = vector.shape_cast %589 : vector<8xf32> to vector<8x1xf32>
    %591 = vector.extract_strided_slice %211 {offsets = [0, 7], sizes = [8, 1], strides = [1, 1]} : vector<8x128xf32> to vector<8x1xf32>
    %592 = arith.mulf %591, %590 : vector<8x1xf32>
    %593 = arith.addf %573, %592 : vector<8x1xf32>
    %594 = vector.extract_strided_slice %373 {offsets = [0, 128], sizes = [8, 16], strides = [1, 1]} : vector<8x512xf32> to vector<8x16xf32>
    %595 = vector.extract_strided_slice %373 {offsets = [0, 384], sizes = [8, 16], strides = [1, 1]} : vector<8x512xf32> to vector<8x16xf32>
    %596 = arith.subf %430, %594 : vector<8x16xf32>
    %597 = arith.mulf %596, %596 : vector<8x16xf32>
    %598 = arith.addf %432, %597 : vector<8x16xf32>
    %cst_204 = arith.constant 0.000000e+00 : f32
    %599 = vector.broadcast %cst_204 : f32 to vector<8x16xf32>
    %600 = arith.subf %599, %595 : vector<8x16xf32>
    %601 = math.exp %600 : vector<8x16xf32>
    %602 = arith.mulf %598, %601 : vector<8x16xf32>
    %cst_205 = arith.constant -1.000000e+00 : f32
    %603 = vector.broadcast %cst_205 : f32 to vector<8x16xf32>
    %604 = arith.addf %603, %602 : vector<8x16xf32>
    %605 = arith.addf %604, %595 : vector<8x16xf32>
    %606 = arith.subf %605, %431 : vector<8x16xf32>
    %cst_206 = arith.constant 5.000000e-01 : f32
    %607 = vector.broadcast %cst_206 : f32 to vector<8x16xf32>
    %608 = arith.mulf %607, %606 : vector<8x16xf32>
    %cst_207 = arith.constant dense<0.000000e+00> : vector<8xf32>
    %609 = vector.multi_reduction <add>, %608, %cst_207 [1] : vector<8x16xf32> to vector<8xf32>
    %610 = vector.shape_cast %609 : vector<8xf32> to vector<8x1xf32>
    %611 = vector.extract_strided_slice %211 {offsets = [0, 8], sizes = [8, 1], strides = [1, 1]} : vector<8x128xf32> to vector<8x1xf32>
    %612 = arith.mulf %611, %610 : vector<8x1xf32>
    %613 = arith.addf %593, %612 : vector<8x1xf32>
    %614 = vector.extract_strided_slice %373 {offsets = [0, 144], sizes = [8, 16], strides = [1, 1]} : vector<8x512xf32> to vector<8x16xf32>
    %615 = vector.extract_strided_slice %373 {offsets = [0, 400], sizes = [8, 16], strides = [1, 1]} : vector<8x512xf32> to vector<8x16xf32>
    %616 = arith.subf %430, %614 : vector<8x16xf32>
    %617 = arith.mulf %616, %616 : vector<8x16xf32>
    %618 = arith.addf %432, %617 : vector<8x16xf32>
    %cst_208 = arith.constant 0.000000e+00 : f32
    %619 = vector.broadcast %cst_208 : f32 to vector<8x16xf32>
    %620 = arith.subf %619, %615 : vector<8x16xf32>
    %621 = math.exp %620 : vector<8x16xf32>
    %622 = arith.mulf %618, %621 : vector<8x16xf32>
    %cst_209 = arith.constant -1.000000e+00 : f32
    %623 = vector.broadcast %cst_209 : f32 to vector<8x16xf32>
    %624 = arith.addf %623, %622 : vector<8x16xf32>
    %625 = arith.addf %624, %615 : vector<8x16xf32>
    %626 = arith.subf %625, %431 : vector<8x16xf32>
    %cst_210 = arith.constant 5.000000e-01 : f32
    %627 = vector.broadcast %cst_210 : f32 to vector<8x16xf32>
    %628 = arith.mulf %627, %626 : vector<8x16xf32>
    %cst_211 = arith.constant dense<0.000000e+00> : vector<8xf32>
    %629 = vector.multi_reduction <add>, %628, %cst_211 [1] : vector<8x16xf32> to vector<8xf32>
    %630 = vector.shape_cast %629 : vector<8xf32> to vector<8x1xf32>
    %631 = vector.extract_strided_slice %211 {offsets = [0, 9], sizes = [8, 1], strides = [1, 1]} : vector<8x128xf32> to vector<8x1xf32>
    %632 = arith.mulf %631, %630 : vector<8x1xf32>
    %633 = arith.addf %613, %632 : vector<8x1xf32>
    %cst_212 = arith.constant dense<0.000000e+00> : vector<1xf32>
    %634 = vector.multi_reduction <add>, %633, %cst_212 [0] : vector<8x1xf32> to vector<1xf32>
    %635 = vector.shape_cast %634 : vector<1xf32> to vector<1x1xf32>
    %cst_213 = arith.constant 8.000000e+00 : f32
    %636 = vector.broadcast %cst_213 : f32 to vector<1x1xf32>
    %637 = arith.divf %635, %636 : vector<1x1xf32>
    %cst_214 = arith.constant 1.000000e+00 : f32
    %638 = vector.broadcast %cst_214 : f32 to vector<1x1xf32>
    %639 = arith.mulf %638, %637 : vector<1x1xf32>
    %cst_215 = arith.constant 1.000000e+00 : f32
    %640 = vector.broadcast %cst_215 : f32 to vector<8x128xf32>
    %641 = arith.addf %640, %86 : vector<8x128xf32>
    %642 = arith.mulf %85, %85 : vector<8x128xf32>
    %643 = arith.subf %641, %642 : vector<8x128xf32>
    %644 = math.exp %86 : vector<8x128xf32>
    %645 = arith.subf %643, %644 : vector<8x128xf32>
    %cst_216 = arith.constant -5.000000e-01 : f32
    %646 = vector.broadcast %cst_216 : f32 to vector<8x128xf32>
    %647 = arith.mulf %646, %645 : vector<8x128xf32>
    %cst_217 = arith.constant dense<0.000000e+00> : vector<8xf32>
    %648 = vector.multi_reduction <add>, %647, %cst_217 [1] : vector<8x128xf32> to vector<8xf32>
    %649 = vector.shape_cast %648 : vector<8xf32> to vector<8x1xf32>
    %cst_218 = arith.constant dense<0.000000e+00> : vector<1xf32>
    %650 = vector.multi_reduction <add>, %649, %cst_218 [0] : vector<8x1xf32> to vector<1xf32>
    %651 = vector.shape_cast %650 : vector<1xf32> to vector<1x1xf32>
    %cst_219 = arith.constant 8.000000e+00 : f32
    %652 = vector.broadcast %cst_219 : f32 to vector<1x1xf32>
    %653 = arith.divf %651, %652 : vector<1x1xf32>
    %cst_220 = arith.constant 1.000000e+00 : f32
    %654 = vector.broadcast %cst_220 : f32 to vector<1x1xf32>
    %655 = arith.mulf %654, %653 : vector<1x1xf32>
    %cst_221 = arith.constant dense<0xFF800000> : vector<8xf32>
    %656 = vector.multi_reduction <maximumf>, %211, %cst_221 [1] : vector<8x128xf32> to vector<8xf32>
    %657 = vector.shape_cast %656 : vector<8xf32> to vector<8x1xf32>
    %cst_222 = arith.constant dense<0.000000e+00> : vector<1xf32>
    %658 = vector.multi_reduction <add>, %657, %cst_222 [0] : vector<8x1xf32> to vector<1xf32>
    %659 = vector.shape_cast %658 : vector<1xf32> to vector<1x1xf32>
    %cst_223 = arith.constant 8.000000e+00 : f32
    %660 = vector.broadcast %cst_223 : f32 to vector<1x1xf32>
    %661 = arith.divf %659, %660 : vector<1x1xf32>
    %cst_224 = arith.constant 0.000000e+00 : f32
    %662 = vector.broadcast %cst_224 : f32 to vector<1x1xf32>
    %663 = arith.subf %662, %661 : vector<1x1xf32>
    %cst_225 = arith.constant 5.000000e-01 : f32
    %664 = vector.broadcast %cst_225 : f32 to vector<8x128xf32>
    %665 = arith.cmpf ogt, %211, %664 : vector<8x128xf32>
    %cst_226 = arith.constant 1.000000e+00 : f32
    %cst_227 = arith.constant 0.000000e+00 : f32
    %666 = vector.broadcast %cst_226 : f32 to vector<8x128xf32>
    %667 = vector.broadcast %cst_227 : f32 to vector<8x128xf32>
    %668 = arith.select %665, %666, %667 : vector<8x128xi1>, vector<8x128xf32>
    %cst_228 = arith.constant dense<0.000000e+00> : vector<128xf32>
    %669 = vector.multi_reduction <add>, %668, %cst_228 [0] : vector<8x128xf32> to vector<128xf32>
    %670 = vector.shape_cast %669 : vector<128xf32> to vector<1x128xf32>
    %cst_229 = arith.constant 0.000000e+00 : f32
    %671 = vector.broadcast %cst_229 : f32 to vector<1x128xf32>
    %672 = arith.cmpf ogt, %670, %671 : vector<1x128xf32>
    %cst_230 = arith.constant 1.000000e+00 : f32
    %cst_231 = arith.constant 0.000000e+00 : f32
    %673 = vector.broadcast %cst_230 : f32 to vector<1x128xf32>
    %674 = vector.broadcast %cst_231 : f32 to vector<1x128xf32>
    %675 = arith.select %672, %673, %674 : vector<1x128xi1>, vector<1x128xf32>
    %cst_232 = arith.constant dense<0.000000e+00> : vector<1xf32>
    %676 = vector.multi_reduction <add>, %675, %cst_232 [1] : vector<1x128xf32> to vector<1xf32>
    %677 = vector.shape_cast %676 : vector<1xf32> to vector<1x1xf32>
    %c0_i32 = arith.constant 0 : i32
    %678 = vector.broadcast %c0_i32 : i32 to vector<1x128xi32>
    %679 = arith.cmpi eq, %3, %678 : vector<1x128xi32>
    %cst_233 = arith.constant 0.000000e+00 : f32
    %680 = vector.shape_cast %429 : vector<1x1xf32> to vector<1x1xf32>
    %681 = vector.broadcast %680 : vector<1x1xf32> to vector<1x128xf32>
    %682 = vector.broadcast %cst_233 : f32 to vector<1x128xf32>
    %683 = arith.select %679, %681, %682 : vector<1x128xi1>, vector<1x128xf32>
    %c1_i32 = arith.constant 1 : i32
    %684 = vector.broadcast %c1_i32 : i32 to vector<1x128xi32>
    %685 = arith.cmpi eq, %3, %684 : vector<1x128xi32>
    %cst_234 = arith.constant 0.000000e+00 : f32
    %686 = vector.shape_cast %639 : vector<1x1xf32> to vector<1x1xf32>
    %687 = vector.broadcast %686 : vector<1x1xf32> to vector<1x128xf32>
    %688 = vector.broadcast %cst_234 : f32 to vector<1x128xf32>
    %689 = arith.select %685, %687, %688 : vector<1x128xi1>, vector<1x128xf32>
    %690 = arith.addf %683, %689 : vector<1x128xf32>
    %c2_i32 = arith.constant 2 : i32
    %691 = vector.broadcast %c2_i32 : i32 to vector<1x128xi32>
    %692 = arith.cmpi eq, %3, %691 : vector<1x128xi32>
    %cst_235 = arith.constant 0.000000e+00 : f32
    %693 = vector.shape_cast %655 : vector<1x1xf32> to vector<1x1xf32>
    %694 = vector.broadcast %693 : vector<1x1xf32> to vector<1x128xf32>
    %695 = vector.broadcast %cst_235 : f32 to vector<1x128xf32>
    %696 = arith.select %692, %694, %695 : vector<1x128xi1>, vector<1x128xf32>
    %697 = arith.addf %690, %696 : vector<1x128xf32>
    %c3_i32 = arith.constant 3 : i32
    %698 = vector.broadcast %c3_i32 : i32 to vector<1x128xi32>
    %699 = arith.cmpi eq, %3, %698 : vector<1x128xi32>
    %cst_236 = arith.constant 0.000000e+00 : f32
    %700 = vector.shape_cast %663 : vector<1x1xf32> to vector<1x1xf32>
    %701 = vector.broadcast %700 : vector<1x1xf32> to vector<1x128xf32>
    %702 = vector.broadcast %cst_236 : f32 to vector<1x128xf32>
    %703 = arith.select %699, %701, %702 : vector<1x128xi1>, vector<1x128xf32>
    %704 = arith.addf %697, %703 : vector<1x128xf32>
    %c4_i32 = arith.constant 4 : i32
    %705 = vector.broadcast %c4_i32 : i32 to vector<1x128xi32>
    %706 = arith.cmpi eq, %3, %705 : vector<1x128xi32>
    %cst_237 = arith.constant 0.000000e+00 : f32
    %707 = vector.shape_cast %677 : vector<1x1xf32> to vector<1x1xf32>
    %708 = vector.broadcast %707 : vector<1x1xf32> to vector<1x128xf32>
    %709 = vector.broadcast %cst_237 : f32 to vector<1x128xf32>
    %710 = arith.select %706, %708, %709 : vector<1x128xi1>, vector<1x128xf32>
    %711 = arith.addf %704, %710 : vector<1x128xf32>
    %c0_238 = arith.constant 0 : index
    %c0_239 = arith.constant 0 : index
    %712 = vector.load %arg16[%c0_238, %c0_239] : memref<1x128xf32, #tpu.memory_space<vmem>>, vector<1x128xf32>
    tpu.vector_store %arg16[%c0_238, %c0_239], %711 {strides = array<i32>} : memref<1x128xf32, #tpu.memory_space<vmem>>, vector<1x128xf32>,
    return
  }
}

</mosaic_0001>

<bundles_post_ra>
// kernel: vae_forward.5
= control target key start
LH: loop header
LB: loop body
LE: loop exit
PB: predicated region body
PF: predicated region fallthrough
CT: control target
= control target key end

     0   :  { %s4376_s0 = inlined_call_operand.vmem [shape: f32[8,384], index: 0, kind: input, shape index: {}]   ;;  %s4377_s1 = inlined_call_operand.hbm [shape: f32[32,512], index: 1, kind: input, shape index: {}]   ;;  %s4378_s2 = inlined_call_operand.vmem [shape: bf16[128,128], index: 2, kind: input, shape index: {}]   ;;  %s4379_s3 = inlined_call_operand.hbm [shape: bf16[128,128], index: 3, kind: input, shape index: {}]   ;;  %s4380_s4 = inlined_call_operand.vmem [shape: bf16[128,512], index: 4, kind: input, shape index: {}]   ;;  %s4381_s5 = inlined_call_operand.hbm [shape: bf16[384,128], index: 5, kind: input, shape index: {}]   ;;  %s4382_s6 = inlined_call_operand.hbm [shape: bf16[128,128], index: 6, kind: input, shape index: {}]   ;;  %s4383_s7 = inlined_call_operand.hbm [shape: bf16[128,256], index: 7, kind: input, shape index: {}]   ;;  %s4384_s8 = inlined_call_operand.hbm [shape: bf16[128,128], index: 8, kind: input, shape index: {}]   ;;  %s4385_s9 = inlined_call_operand.hbm [shape: bf16[128,128], index: 9, kind: input, shape index: {}]   ;;  %s4386_s10 = inlined_call_operand.hbm [shape: bf16[128,128], index: 10, kind: input, shape index: {}]   ;;  %s4387_s11 = inlined_call_operand.hbm [shape: bf16[128,128], index: 11, kind: input, shape index: {}]   ;;  %s4388_s12 = inlined_call_operand.hbm [shape: bf16[128,128], index: 12, kind: input, shape index: {}]   ;;  %s4389_s13 = inlined_call_operand.hbm [shape: bf16[128,512], index: 13, kind: input, shape index: {}]   ;;  %s4390_s14 = inlined_call_operand.vmem [shape: f32[8,1024], index: 14, kind: output, shape index: {0}]   ;;  %s4391_s15 = inlined_call_operand.hbm [shape: f32[8,128], index: 15, kind: output, shape index: {1}]   ;;  %s4392_s16 = inlined_call_operand.vmem [shape: f32[1,128], index: 16, kind: output, shape index: {2}]  }
   0x1   :  { %4394 = sst [smem:[#allocation28_spill]] %s4376_s0 }
   0x2   :  { %22 = vsyncpa [#allocation3], 0 }
   0x3   :  { %23 = vsyncpa [#allocation6], 0 }
   0x4   :  { %24 = vsyncpa [#allocation9], 0 }
   0x5   :  { %25 = vsyncpa [#allocation12], 0 }
   0x6   :  { %26 = vsyncpa [#allocation15], 0 }
   0x7   :  { %27 = vsyncpa [#allocation18], 0  ;;  %s50_s23 = sshll.u32 %s4379_s3, 4  ;;  %s51_s23 = int_to_ptr.hbm [resolvable:$true] %s50_s23 }
   0x8   :  { %28 = vsyncpa [#allocation4], 0  ;;  %s3716_s24 = smov [#allocation5]   ;;  %s78_s28 = sshll.u32 %s4382_s6, 4  ;;  %s79_s28 = int_to_ptr.hbm [resolvable:$true] %s78_s28 }
   0x9   :  { %s52_s25 = sshll.u32 %s3716_s24, 4  ;;  %s3717_s29 = smov 64   ;;  %s53_s25 = int_to_ptr.vmem [resolvable:$true] %s52_s25 }
   0xa   :  { %s3718_s30 = smov 4   ;;  %s3719_s0 = smov [#allocation8]  }
   0xb   :  { %58 = dma.hbm_to_vmem [thread:$0]  %s51_s23, 1024, %s53_s25, [#allocation6], %s3717_s29, %s3717_s29, %s3718_s30  }
   0xc   :  { %s80_s17 = sshll.u32 %s3719_s0, 4  ;;  %s104_s19 = sshll.u32 %s4384_s8, 4  ;;  %s81_s17 = int_to_ptr.vmem [resolvable:$true] %s80_s17  ;;  %s105_s19 = int_to_ptr.hbm [resolvable:$true] %s104_s19 }
   0xd   :  { %86 = dma.hbm_to_vmem [thread:$0]  %s79_s28, 1024, %s81_s17, [#allocation9], %s3717_s29, %s3717_s29, %s3718_s30  }
   0xe   :  { %s130_s21 = sshll.u32 %s4386_s10, 4  ;;  %s3720_s22 = smov [#allocation11]   ;;  %s131_s21 = int_to_ptr.hbm [resolvable:$true] %s130_s21 }
   0xf   :  { %s106_s24 = sshll.u32 %s3720_s22, 4  ;;  %s3721_s23 = smov [#allocation14]   ;;  %s107_s24 = int_to_ptr.vmem [resolvable:$true] %s106_s24 }
  0x10   :  { %112 = dma.hbm_to_vmem [thread:$0]  %s105_s19, 1024, %s107_s24, [#allocation12], %s3717_s29, %s3717_s29, %s3718_s30  }
  0x11   :  { %s132_s8 = sshll.u32 %s3721_s23, 4  ;;  %s156_s27 = sshll.u32 %s4388_s12, 4  ;;  %s133_s8 = int_to_ptr.vmem [resolvable:$true] %s132_s8  ;;  %s157_s27 = int_to_ptr.hbm [resolvable:$true] %s156_s27 }
  0x12   :  { %138 = dma.hbm_to_vmem [thread:$0]  %s131_s21, 1024, %s133_s8, [#allocation15], %s3717_s29, %s3717_s29, %s3718_s30  }
  0x13   :  { %s35_s0 = sshll.u32 %s4377_s1, 4  ;;  %s3722_s17 = smov [#allocation17]   ;;  %s36_s0 = int_to_ptr.hbm [resolvable:$true] %s35_s0 }
  0x14   :  { %s158_s18 = sshll.u32 %s3722_s17, 4  ;;  %s3723_s3 = smov [#allocation2]   ;;  %s159_s18 = int_to_ptr.vmem [resolvable:$true] %s158_s18 }
  0x15   :  { %164 = dma.hbm_to_vmem [thread:$0]  %s157_s27, 1024, %s159_s18, [#allocation18], %s3717_s29, %s3717_s29, %s3718_s30  }
  0x16   :  { %s37_s12 = sshll.u32 %s3723_s3, 4  ;;  %s3724_s19 = smov 512   ;;  %s38_s12 = int_to_ptr.vmem [resolvable:$true] %s37_s12 }
  0x17   :  { %s3725_s6 = smov 32   ;;  %s65_s22 = sshll.u32 %s4381_s5, 4  ;;  %s66_s22 = int_to_ptr.hbm [resolvable:$true] %s65_s22 }
  0x18   :  { %43 = dma.hbm_to_vmem [thread:$0]  %s36_s0, 2048, %s38_s12, [#allocation3], %s3724_s19, %s3724_s19, %s3725_s6  }
  0x19   :  { %s3726_s1 = smov [#allocation7]   ;;  %s91_s25 = sshll.u32 %s4383_s7, 4  ;;  %s92_s25 = int_to_ptr.hbm [resolvable:$true] %s91_s25 }
  0x1a   :  { %s67_s24 = sshll.u32 %s3726_s1, 4  ;;  %s3727_s26 = smov [#allocation10]   ;;  %s68_s24 = int_to_ptr.vmem [resolvable:$true] %s67_s24 }
  0x1b   :  { %73 = dma.hbm_to_vmem [thread:$0]  %s66_s22, 3072, %s68_s24, [#allocation6], %s3717_s29, %s3717_s29, %s3718_s30  }
  0x1c   :  { %s93_s27 = sshll.u32 %s3727_s26, 4  ;;  %s3728_s10 = smov 128   ;;  %s94_s27 = int_to_ptr.vmem [resolvable:$true] %s93_s27 }
  0x1d   :  { %s3729_s28 = smov 8   ;;  %s117_s17 = sshll.u32 %s4385_s9, 4  ;;  %s118_s17 = int_to_ptr.hbm [resolvable:$true] %s117_s17 }
  0x1e   :  { %99 = dma.hbm_to_vmem [thread:$0]  %s92_s25, 2048, %s94_s27, [#allocation9], %s3728_s10, %s3728_s10, %s3729_s28  }
  0x1f   :  { %s3730_s18 = smov [#allocation13]   ;;  %s143_s19 = sshll.u32 %s4387_s11, 4  ;;  %s144_s19 = int_to_ptr.hbm [resolvable:$true] %s143_s19 }
  0x20   :  { %s119_s3 = sshll.u32 %s3730_s18, 4  ;;  %s3731_s20 = smov [#allocation16]   ;;  %s120_s3 = int_to_ptr.vmem [resolvable:$true] %s119_s3 }
  0x21   :  { %125 = dma.hbm_to_vmem [thread:$0]  %s118_s17, 1024, %s120_s3, [#allocation12], %s3717_s29, %s3717_s29, %s3718_s30  }
  0x22   :  { %s145_s21 = sshll.u32 %s3731_s20, 4  ;;  %s169_s24 = sshll.u32 %s4389_s13, 4  ;;  %s146_s21 = int_to_ptr.vmem [resolvable:$true] %s145_s21  ;;  %s170_s24 = int_to_ptr.hbm [resolvable:$true] %s169_s24 }
  0x23   :  { %151 = dma.hbm_to_vmem [thread:$0]  %s144_s19, 1024, %s146_s21, [#allocation15], %s3717_s29, %s3717_s29, %s3718_s30  }
  0x24   :  { %s3732_s9 = smov [#allocation19]   ;;  %s3733_s11 = smov 256  }
  0x25   :  { %s171_s23 = sshll.u32 %s3732_s9, 4  ;;  %s3734_s8 = smov 16   ;;  %s172_s23 = int_to_ptr.vmem [resolvable:$true] %s171_s23 }
  0x26   :  { %177 = dma.hbm_to_vmem [thread:$0]  %s170_s24, 4096, %s172_s23, [#allocation18], %s3733_s11, %s3733_s11, %s3734_s8  }
  0x27   :  { %3702 = dma.done.wait [#allocation3], 2048  }
  0x28   :  { %3703 = vsyncadd [#allocation3], 4294965248 }
  0x29   :  { %3704 = dma.done.wait [#allocation6], 4096  }
  0x2a   :  { %3705 = vsyncadd [#allocation6], 4294963200 }
  0x2b   :  { %3706 = dma.done.wait [#allocation9], 3072  }
  0x2c   :  { %3707 = vsyncadd [#allocation9], 4294964224 }
  0x2d   :  { %3708 = dma.done.wait [#allocation12], 2048  }
  0x2e   :  { %3709 = vsyncadd [#allocation12], 4294965248 }
  0x2f   :  { %3710 = dma.done.wait [#allocation15], 2048  }
  0x30   :  { %3711 = vsyncadd [#allocation15], 4294965248 }
  0x31   :  { %3712 = dma.done.wait [#allocation18], 5120  }
  0x32   :  { %3713 = vsyncadd [#allocation18], 4294962176  ;;  %v3168_v0 = vld [vmem:[%s4378_s2 + $0x38] sm:$0xff]  ;;  %v3167_v1 = vld [vmem:[%s4378_s2 + $0x30] sm:$0xff]  ;;  %s4395_s1 = sld [smem:[#allocation28_spill]]  ;;  %v3735_v10 = vmov 8.0  }
  0x33   :  { %293 = vmatpush.bf16.msra.mxu0 %v3168_v0  ;;  %v3166_v2 = vld [vmem:[%s4378_s2 + $0x28] sm:$0xff]  ;;  %v3165_v3 = vld [vmem:[%s4378_s2 + $0x20] sm:$0xff]  ;;  %v3164_v4 = vld [vmem:[%s4378_s2 + $0x18] sm:$0xff]  ;;  %3367 = vrcp.f32 %v3735_v10  ;;  %s3736_s10 = smov 112   ;;  %s3737_s28 = smov 96  }
  0x34   :  { %v3163_v5 = vld [vmem:[%s4378_s2 + $0x10] sm:$0xff]  ;;  %v3162_v6 = vld [vmem:[%s4378_s2 + $0x8] sm:$0xff]  ;;  %v3161_v7 = vld [vmem:[%s4378_s2] sm:$0xff]  ;;  %s3738_s5 = smov 80   ;;  %s3744_s7 = smov 123  }
  0x35   :  { %v3176_v11 = vld [vmem:[#allocation5 + $0x38] sm:$0xff]  ;;  %v3175_v13 = vld [vmem:[#allocation5 + $0x30] sm:$0xff]  ;;  %v3174_v15 = vld [vmem:[#allocation5 + $0x28] sm:$0xff]  ;;  %s3745_s12 = smov 122   ;;  %s3746_s19 = smov 120  }
  0x36   :  { %417 = vmatpush.bf16.msra.mxu1 %v3176_v11  ;;  %v244_v16 = vld [vmem:[#allocation2 + $0x1] ss:$0 sm:$0xff]  ;;  %v3172_v23 = vld [vmem:[#allocation5 + $0x18] sm:$0xff]  ;;  %v3171_v29 = vld [vmem:[#allocation5 + $0x10] sm:$0xff]  ;;  %s3747_s20 = smov 121   ;;  %s3748_s21 = smov 119  }
  0x37   :  { %294 = vmatpush.bf16.msra.mxu0 %v3167_v1  ;;  %v3173_v19 = vld [vmem:[#allocation5 + $0x20] sm:$0xff]  ;;  %v3170_v36 = vld [vmem:[#allocation5 + $0x8] sm:$0xff]  ;;  %v3207_v1 = vld [vmem:[%s4380_s4 + $0xec] sm:$0xf0]  ;;  %s3751_s22 = smov [#allocation20]   ;;  %s2466_s23 = sshll.u32 %s4391_s15, 4  ;;  %s2467_s23 = int_to_ptr.hbm [resolvable:$true] %s2466_s23 }
  0x38   :  { %v222_v8 = vld [vmem:[%s4395_s1] sm:$0xff]  ;;  %v3206_v10 = vld [vmem:[%s4380_s4 + $0xec] sm:$0xf]  ;;  %v2675_v11 = vld [vmem:[%s4380_s4 + $0xf8] sm:$0xf0]  ;;  %s2464_s2 = sshll.u32 %s3751_s22, 4  ;;  %s2465_s2 = int_to_ptr.vmem [resolvable:$true] %s2464_s2 }
  0x39   :  { %v3923_v9 = vpack.c.bf16 %v222_v8, %v222_v8  ;;  %v3368_v12 = vpop.eup %3367  ;;  %v3169_v42 = vld [vmem:[#allocation5] sm:$0xff] }
  0x3a   :  { %418 = vmatpush.bf16.msra.mxu1 %v3175_v13  ;;  %v315_v14 = vmul.f32 8.0, %v3368_v12  ;;  %vm319_vm0 = vweird.f32 %v3368_v12  ;;  %v306_v55 = vld [vmem:[#allocation2 + $0x2] ss:$0 sm:$0xff]  ;;  %v307_v58 = vld [vmem:[#allocation2 + $0x3] ss:$0 sm:$0xff] }
  0x3b   :  { %295 = vmatpush.bf16.msra.mxu0 %v3166_v2  ;;  %v2665_v0 = vld [vmem:[%s4380_s4 + $0xe0] sm:$0xf]  ;;  %v3205_v2 = vld [vmem:[%s4380_s4 + $0xe4] sm:$0xf] }
  0x3c   :  { %v316_v18 = vsub.f32 1.0, %v315_v14  ;;  %v2649_v13 = vld [vmem:[%s4380_s4 + $0xc0] sm:$0xf]  ;;  %v3203_v14 = vld [vmem:[%s4380_s4 + $0xcc] sm:$0xf0] }
  0x3e   :  { %419 = vmatpush.bf16.msra.mxu1 %v3174_v15  ;;  %v317_v24 = vmul.f32 %v3368_v12, %v316_v18  ;;  %v3201_v15 = vld [vmem:[%s4380_s4 + $0xc4] sm:$0xf]  ;;  %v2657_v18 = vld [vmem:[%s4380_s4 + $0xc8] sm:$0xf] }
  0x3f   :  { %296 = vmatpush.bf16.msra.mxu0 %v3165_v3  ;;  %v2666_v3 = vor.u32 %v3207_v1, %v2665_v0  ;;  %v3192_v0 = vld [vmem:[%s4380_s4 + $0x74] sm:$0xf0]  ;;  %v3190_v1 = vld [vmem:[%s4380_s4 + $0x6c] sm:$0xf] }
  0x40   :  { %v318_v30 = vadd.f32 %v3368_v12, %v317_v24 }
  0x41   :  { %672 = vmatpush.bf16.msra.mxu2 %v2666_v3 }
  0x42   :  { %420 = vmatpush.bf16.msra.mxu1 %v3173_v19  ;;  %v3926_v37 = vsel %vm319_vm0, %v3368_v12, %v318_v30  ;;  %v2678_v12 = vor.u32 %v3206_v10, %v2675_v11  ;;  %v3204_v19 = vld [vmem:[%s4380_s4 + $0xd4] sm:$0xf0]  ;;  %v2641_v30 = vld [vmem:[%s4380_s4 + $0xa8] sm:$0xf]  ;;  %v3187_v10 = vld [vmem:[%s4380_s4 + $0x4c] sm:$0xf0] }
  0x43   :  { %297 = vmatpush.bf16.msra.mxu0 %v3164_v4  ;;  %v2667_v4 = vld [vmem:[%s4380_s4 + $0xf0] sm:$0xf0]  ;;  %v3185_v11 = vld [vmem:[%s4380_s4 + $0x44] sm:$0xf] }
  0x46   :  { %421 = vmatpush.bf16.msra.mxu1 %v3172_v23  ;;  %v2659_v23 = vld [vmem:[%s4380_s4 + $0xd8] sm:$0xf0] }
  0x47   :  { %298 = vmatpush.bf16.msra.mxu0 %v3163_v5  ;;  %v2673_v5 = vld [vmem:[%s4380_s4 + $0xe8] sm:$0xf] }
  0x4a   :  { %422 = vmatpush.bf16.msra.mxu1 %v3171_v29  ;;  %v2635_v29 = vld [vmem:[%s4380_s4 + $0xb0] sm:$0xf0] }
  0x4b   :  { %299 = vmatpush.bf16.msra.mxu0 %v3162_v6  ;;  %v3208_v6 = vld [vmem:[%s4380_s4 + $0xf4] sm:$0xf0] }
  0x4c   :  { %v2674_v8 = vor.u32 %v3208_v6, %v2673_v5 }
  0x4e   :  { %423 = vmatpush.bf16.msra.mxu1 %v3170_v36  ;;  %v2643_v36 = vld [vmem:[%s4380_s4 + $0xb8] sm:$0xf0] }
  0x4f   :  { %300 = vmatpush.bf16.msra.mxu0 %v3161_v7  ;;  %v2670_v7 = vor.u32 %v3205_v2, %v2667_v4  ;;  %v2611_v2 = vld [vmem:[%s4380_s4 + $0x78] sm:$0xf0] }
  0x50   :  { %v2614_v6 = vor.u32 %v3190_v1, %v2611_v2  ;;  %v3230_v1 = vld [vmem:[#allocation7 + $0xa8] sm:$0xff] }
  0x51   :  { %685 = vmatpush.bf16.msra.mxu3 %v2670_v7 }
  0x52   :  { %301 = vmatmul.bf16.vlgmr.msra.gmra.mxu0 %v3923_v9  ;;  %424 = vmatpush.bf16.msra.mxu1 %v3169_v42  ;;  %v3193_v42 = vld [vmem:[%s4380_s4 + $0x84] sm:$0xf] }
  0x53   :  { %698 = vmatpush.bf16.msrb.mxu0 %v2674_v8  ;;  %v2585_v8 = vld [vmem:[%s4380_s4 + $0x40] sm:$0xf] }
  0x56   :  { %711 = vmatpush.bf16.msrb.mxu1 %v2678_v12 }
  0xcf   :  { %v302_v17 = vpop.f32.mrf.mxu0 }
  0xd0   :  { %v303_v20 = vadd.f32 %v302_v17, %v244_v16  ;;  %v2650_v16 = vor.u32 %v3203_v14, %v2649_v13  ;;  %v2651_v17 = vld [vmem:[%s4380_s4 + $0xd0] sm:$0xf0]  ;;  %v2586_v14 = vor.u32 %v3187_v10, %v2585_v8  ;;  %v3228_v10 = vld [vmem:[#allocation7 + $0x98] sm:$0xff] }
  0xd2   :  { %v308_v21 = vrot.slane %v303_v20, 4  ;;  %v322_v22 = vmul.f32 %v303_v20, %v303_v20  ;;  %673 = vmatpush.bf16.msra.mxu2 %v2650_v16  ;;  %v2593_v16 = vld [vmem:[%s4380_s4 + $0x48] sm:$0xf] }
  0xd4   :  { %v309_v25 = vadd.f32 %v308_v21, %v303_v20  ;;  %v323_v26 = vrot.slane %v322_v22, 4  ;;  %v2658_v21 = vor.u32 %v3204_v19, %v2657_v18  ;;  %v3188_v18 = vld [vmem:[%s4380_s4 + $0x54] sm:$0xf0]  ;;  %v3186_v19 = vld [vmem:[%s4380_s4 + $0x4c] sm:$0xf] }
  0xd6   :  { %v310_v27 = vrot.slane %v309_v25, 2  ;;  %v324_v28 = vadd.f32 %v323_v26, %v322_v22  ;;  %v3202_v22 = vld [vmem:[%s4380_s4 + $0xcc] sm:$0xf]  ;;  %699 = vmatpush.bf16.msrb.mxu0 %v2658_v21  ;;  %v3199_v26 = vld [vmem:[%s4380_s4 + $0xac] sm:$0xf0] }
  0xd7   :  { %v304_v31 = vpop.f32.mrf.mxu0  ;;  %v2662_v24 = vor.u32 %v3202_v22, %v2659_v23  ;;  %v2594_v23 = vor.u32 %v3188_v18, %v2593_v16  ;;  %v431_v18 = vld [vmem:[#allocation2 + $0x6] ss:$0 sm:$0xff] }
  0xd8   :  { %v311_v32 = vadd.f32 %v310_v27, %v309_v25  ;;  %v325_v33 = vrot.slane %v324_v28, 2  ;;  %v2633_v25 = vld [vmem:[%s4380_s4 + $0xa0] sm:$0xf]  ;;  %v3197_v27 = vld [vmem:[%s4380_s4 + $0xa4] sm:$0xf] }
  0xd9   :  { %712 = vmatpush.bf16.msrb.mxu1 %v2662_v24  ;;  %v3200_v31 = vld [vmem:[%s4380_s4 + $0xb4] sm:$0xf0] }
  0xda   :  { %v312_v34 = vrot.slane %v311_v32, 1  ;;  %v326_v35 = vadd.f32 %v325_v33, %v324_v28  ;;  %v2634_v28 = vor.u32 %v3199_v26, %v2633_v25  ;;  %v2638_v33 = vor.u32 %v3197_v27, %v2635_v29  ;;  %v2569_v25 = vld [vmem:[%s4380_s4 + $0x20] sm:$0xf]  ;;  %v3183_v26 = vld [vmem:[%s4380_s4 + $0x2c] sm:$0xf0] }
  0xdb   :  { %v3181_v27 = vld [vmem:[%s4380_s4 + $0x24] sm:$0xf] }
  0xdc   :  { %v313_v38 = vadd.f32 %v312_v34, %v311_v32  ;;  %v327_v39 = vrot.slane %v326_v35, 1  ;;  %v368_v32 = vld [vmem:[#allocation2 + $0x4] ss:$0 sm:$0xff]  ;;  %v2642_v34 = vor.u32 %v3200_v31, %v2641_v30  ;;  %674 = vmatpush.bf16.msra.mxu2 %v2634_v28  ;;  %v2570_v30 = vor.u32 %v3183_v26, %v2569_v25  ;;  %v2571_v31 = vld [vmem:[%s4380_s4 + $0x30] sm:$0xf0]  ;;  %v3264_v26 = vld [vmem:[#allocation11 + $0x38] sm:$0xff] }
  0xde   :  { %v321_v40 = vmul.f32 %v3926_v37, %v313_v38  ;;  %v328_v41 = vadd.f32 %v327_v39, %v326_v35  ;;  %v3198_v35 = vld [vmem:[%s4380_s4 + $0xac] sm:$0xf]  ;;  %700 = vmatpush.bf16.msrb.mxu0 %v2642_v34  ;;  %v3184_v34 = vld [vmem:[%s4380_s4 + $0x34] sm:$0xf0] }
  0xdf   :  { %v2646_v38 = vor.u32 %v3198_v35, %v2643_v36  ;;  %v3182_v35 = vld [vmem:[%s4380_s4 + $0x2c] sm:$0xf]  ;;  %v2579_v36 = vld [vmem:[%s4380_s4 + $0x38] sm:$0xf0] }
  0xe0   :  { %v329_v43 = vmul.f32 %v328_v41, %v3926_v37  ;;  %v330_v44 = vmul.f32 %v321_v40, %v321_v40  ;;  %v333_v54 = vsub.f32 %v303_v20, %v321_v40  ;;  %v2654_v20 = vor.u32 %v3201_v15, %v2651_v17  ;;  %v2617_v40 = vld [vmem:[%s4380_s4 + $0x80] sm:$0xf]  ;;  %v3195_v41 = vld [vmem:[%s4380_s4 + $0x8c] sm:$0xf0]  ;;  %v2587_v15 = vld [vmem:[%s4380_s4 + $0x50] sm:$0xf0] }
  0xe1   :  { %713 = vmatpush.bf16.msrb.mxu1 %v2646_v38  ;;  %v2590_v17 = vor.u32 %v3185_v11, %v2587_v15  ;;  %v430_v15 = vld [vmem:[#allocation2 + $0x5] ss:$0 sm:$0xff] }
  0xe2   :  { %v331_v45 = vsub.f32 %v329_v43, %v330_v44  ;;  %686 = vmatpush.bf16.msra.mxu3 %v2654_v20  ;;  %v2618_v44 = vor.u32 %v3195_v41, %v2617_v40  ;;  %v2595_v20 = vld [vmem:[%s4380_s4 + $0x58] sm:$0xf0]  ;;  %v2582_v41 = vor.u32 %v3182_v35, %v2579_v36  ;;  %v3259_v35 = vld [vmem:[#allocation11 + $0x10] sm:$0xff] }
  0xe3   :  { %v2598_v24 = vor.u32 %v3186_v19, %v2595_v20  ;;  %v3226_v20 = vld [vmem:[#allocation7 + $0x88] sm:$0xff]  ;;  %v3212_v36 = vld [vmem:[#allocation7 + $0x18] sm:$0xff] }
  0xe4   :  { %v332_v46 = vmax.f32 %v331_v45, 0.0  ;;  %v2619_v45 = vld [vmem:[%s4380_s4 + $0x90] sm:$0xf0]  ;;  %675 = vmatpush.bf16.msra.mxu2 %v2618_v44  ;;  %v3179_v44 = vld [vmem:[%s4380_s4 + $0xc] sm:$0xf0] }
  0xe6   :  { %v334_v47 = vadd.f32 1e-05, %v332_v46  ;;  %687 = vmatpush.bf16.msra.mxu3 %v2638_v33  ;;  %v2625_v46 = vld [vmem:[%s4380_s4 + $0x88] sm:$0xf]  ;;  %v2574_v33 = vor.u32 %v3181_v27, %v2571_v31  ;;  %v3220_v31 = vld [vmem:[#allocation7 + $0x58] sm:$0xff] }
  0xe7   :  { %v3262_v27 = vld [vmem:[#allocation11 + $0x28] sm:$0xff] }
  0xe8   :  { %3369 = vrsqrt.f32 %v334_v47  ;;  %vm341_vm2 = vweird.f32 %v334_v47 }
  0xee   :  { %v3370_v48 = vpop.eup %3369 }
  0xef   :  { %v336_v49 = vmul.f32 %v3370_v48, %v334_v47  ;;  %vm342_vm1 = vweird.f32 %v3370_v48  ;;  %v3196_v47 = vld [vmem:[%s4380_s4 + $0x94] sm:$0xf0] }
  0xf0   :  { %vm343_vm3 = vmor %vm341_vm2, %vm342_vm1 }
  0xf1   :  { %v337_v50 = vmul.f32 %v3370_v48, %v336_v49  ;;  %v2626_v49 = vor.u32 %v3196_v47, %v2625_v46  ;;  %v2555_v47 = vld [vmem:[%s4380_s4 + $0x10] sm:$0xf0] }
  0xf3   :  { %v338_v51 = vmul.f32 0.5, %v337_v50  ;;  %v3194_v50 = vld [vmem:[%s4380_s4 + $0x8c] sm:$0xf]  ;;  %701 = vmatpush.bf16.msrb.mxu0 %v2626_v49  ;;  %v3180_v49 = vld [vmem:[%s4380_s4 + $0x14] sm:$0xf0] }
  0xf5   :  { %v339_v52 = vsub.f32 1.5, %v338_v51  ;;  %v2627_v51 = vld [vmem:[%s4380_s4 + $0x98] sm:$0xf0] }
  0xf7   :  { %v340_v53 = vmul.f32 %v3370_v48, %v339_v52 }
  0xf9   :  { %v344_v56 = vsel %vm343_vm3, %v3370_v48, %v340_v53  ;;  %v2622_v48 = vor.u32 %v3193_v42, %v2619_v45  ;;  %v2553_v42 = vld [vmem:[%s4380_s4] sm:$0xf]  ;;  %v3177_v45 = vld [vmem:[%s4380_s4 + $0x4] sm:$0xf] }
  0xfa   :  { %v345_v57 = vmul.f32 %v344_v56, %v333_v54  ;;  %v2630_v54 = vor.u32 %v3194_v50, %v2627_v51  ;;  %v3191_v56 = vld [vmem:[%s4380_s4 + $0x6c] sm:$0xf0]  ;;  %v2554_v46 = vor.u32 %v3179_v44, %v2553_v42  ;;  %v3210_v42 = vld [vmem:[#allocation7 + $0x8] sm:$0xff]  ;;  %v3209_v44 = vld [vmem:[#allocation7] sm:$0xff] }
  0xfb   :  { %688 = vmatpush.bf16.msra.mxu3 %v2622_v48  ;;  %v2561_v48 = vld [vmem:[%s4380_s4 + $0x8] sm:$0xf] }
  0xfc   :  { %v346_v59 = vmul.f32 %v345_v57, %v306_v55  ;;  %v2601_v55 = vld [vmem:[%s4380_s4 + $0x60] sm:$0xf]  ;;  %v3189_v57 = vld [vmem:[%s4380_s4 + $0x64] sm:$0xf]  ;;  %714 = vmatpush.bf16.msrb.mxu1 %v2630_v54  ;;  %v2558_v54 = vor.u32 %v3177_v45, %v2555_v47 }
  0xfd   :  { %v502_v45 = vld [vmem:[#allocation2 + $0x7] ss:$8 sm:$0xf] }
  0xfe   :  { %v347_v60 = vadd.f32 %v346_v59, %v307_v58  ;;  %v507_v47 = vperm.slane %v502_v45, 3 }
 0x100   :  { %vm348_vm4 = vcmp.gt.f32.partialorder %v347_v60, 0.0  ;;  %v349_v61 = vmul.f32 0.01, %v347_v60  ;;  %715 = vmatpush.bf16.msrb.mxu1 %v2614_v6  ;;  %v3229_v6 = vld [vmem:[#allocation7 + $0xa0] sm:$0xff] }
 0x102   :  { %v350_v62 = vsel %vm348_vm4, %v347_v60, %v349_v61  ;;  %v2602_v60 = vor.u32 %v3191_v56, %v2601_v55  ;;  %v2603_v61 = vld [vmem:[%s4380_s4 + $0x70] sm:$0xf0]  ;;  %v2562_v55 = vor.u32 %v3180_v49, %v2561_v48 }
 0x103   :  { %v367_v63 = vpack.c.bf16 %v350_v62, %v350_v62  ;;  %v2609_v62 = vld [vmem:[%s4380_s4 + $0x68] sm:$0xf] }
 0x104   :  { %676 = vmatpush.bf16.msra.mxu2 %v2602_v60  ;;  %v2610_v5 = vor.u32 %v3192_v0, %v2609_v62  ;;  %716 = vmatpush.bf16.msrb.mxu1 %v2598_v24  ;;  %v3232_v60 = vld [vmem:[#allocation7 + $0xb8] sm:$0xff] }
 0x105   :  { %425 = vmatmul.bf16.vlgmr.msra.gmra.mxu1 %v367_v63  ;;  %v2606_v63 = vor.u32 %v3189_v57, %v2603_v61  ;;  %v3231_v61 = vld [vmem:[#allocation7 + $0xb0] sm:$0xff]  ;;  %v3224_v62 = vld [vmem:[#allocation7 + $0x78] sm:$0xff] }
 0x106   :  { %702 = vmatpush.bf16.msrb.mxu0 %v2610_v5  ;;  %v3216_v0 = vld [vmem:[#allocation7 + $0x38] sm:$0xff]  ;;  %v3215_v5 = vld [vmem:[#allocation7 + $0x30] sm:$0xff] }
 0x107   :  { %689 = vmatpush.bf16.msra.mxu3 %v2606_v63  ;;  %v3223_v63 = vld [vmem:[#allocation7 + $0x70] sm:$0xff] }
 0x108   :  { %677 = vmatpush.bf16.msra.mxu2 %v2586_v14  ;;  %717 = vmatpush.bf16.msrb.mxu1 %v2582_v41  ;;  %v3227_v14 = vld [vmem:[#allocation7 + $0x90] sm:$0xff]  ;;  %v3257_v41 = vld [vmem:[#allocation11] sm:$0xff] }
 0x10a   :  { %703 = vmatpush.bf16.msrb.mxu0 %v2594_v23  ;;  %v3225_v23 = vld [vmem:[#allocation7 + $0x80] sm:$0xff] }
 0x10b   :  { %690 = vmatpush.bf16.msra.mxu3 %v2590_v17 }
 0x10c   :  { %678 = vmatpush.bf16.msra.mxu2 %v2570_v30  ;;  %v3214_v30 = vld [vmem:[#allocation7 + $0x28] sm:$0xff] }
 0x10f   :  { %691 = vmatpush.bf16.msra.mxu3 %v2574_v33  ;;  %v3213_v33 = vld [vmem:[#allocation7 + $0x20] sm:$0xff] }
 0x110   :  { %679 = vmatpush.bf16.msra.mxu2 %v2554_v46  ;;  %v506_v46 = vperm.slane %v502_v45, 2 }
 0x113   :  { %692 = vmatpush.bf16.msra.mxu3 %v2558_v54 }
 0x114   :  { %935 = vmatpush.bf16.msrb.mxu2 %v3216_v0 }
 0x117   :  { %948 = vmatpush.bf16.msrb.mxu3 %v3224_v62 }
 0x118   :  { %936 = vmatpush.bf16.msrb.mxu2 %v3215_v5 }
 0x11b   :  { %949 = vmatpush.bf16.msrb.mxu3 %v3223_v63 }
 0x11c   :  { %937 = vmatpush.bf16.msrb.mxu2 %v3214_v30  ;;  %v3237_v30 = vld [vmem:[#allocation8 + $0x20] sm:$0xff] }
 0x120   :  { %938 = vmatpush.bf16.msrb.mxu2 %v3213_v33 }
 0x124   :  { %939 = vmatpush.bf16.msrb.mxu2 %v3212_v36 }
 0x182   :  { %v426_v39 = vpop.f32.mrf.mxu1 }
 0x183   :  { %v4011_v43 = vadd.f32 %v426_v39, %v368_v32  ;;  %v2577_v32 = vld [vmem:[%s4380_s4 + $0x28] sm:$0xf] }
 0x184   :  { %v2578_v40 = vor.u32 %v3184_v34, %v2577_v32  ;;  %v3260_v32 = vld [vmem:[#allocation11 + $0x18] sm:$0xff]  ;;  %v3219_v34 = vld [vmem:[#allocation7 + $0x50] sm:$0xff] }
 0x185   :  { %v432_v52 = vrot.slane %v4011_v43, 4  ;;  %v439_v53 = vmul.f32 %v4011_v43, %v4011_v43 }
 0x186   :  { %704 = vmatpush.bf16.msrb.mxu0 %v2578_v40  ;;  %v3217_v40 = vld [vmem:[#allocation7 + $0x40] sm:$0xff] }
 0x187   :  { %v433_v58 = vadd.f32 %v432_v52, %v4011_v43  ;;  %v440_v59 = vrot.slane %v439_v53, 4  ;;  %v3178_v52 = vld [vmem:[%s4380_s4 + $0xc] sm:$0xf] }
 0x189   :  { %v434_v3 = vrot.slane %v433_v58, 2  ;;  %v441_v4 = vadd.f32 %v440_v59, %v439_v53  ;;  %v2563_v53 = vld [vmem:[%s4380_s4 + $0x18] sm:$0xf0]  ;;  %s3739_s4 = smov 48  }
 0x18a   :  { %v428_v7 = vpop.f32.mrf.mxu1  ;;  %v2566_v56 = vor.u32 %v3178_v52, %v2563_v53  ;;  %705 = vmatpush.bf16.msrb.mxu0 %v2562_v55  ;;  %v504_v52 = vperm.slane %v502_v45, 0  ;;  %v505_v53 = vperm.slane %v502_v45, 1 }
 0x18b   :  { %v435_v12 = vadd.f32 %v434_v3, %v433_v58  ;;  %v442_v13 = vrot.slane %v441_v4, 2  ;;  %v3222_v3 = vld [vmem:[#allocation7 + $0x68] sm:$0xff] }
 0x18c   :  { %718 = vmatpush.bf16.msrb.mxu1 %v2566_v56  ;;  %950 = vmatpush.bf16.msrb.mxu3 %v3222_v3 }
 0x18d   :  { %v436_v21 = vrot.slane %v435_v12, 1  ;;  %v443_v22 = vadd.f32 %v442_v13, %v441_v4 }
 0x18e   :  { %961 = vmatpush.bf16.msra.mxu0 %v3232_v60 }
 0x18f   :  { %v437_v28 = vadd.f32 %v436_v21, %v435_v12  ;;  %v444_v29 = vrot.slane %v443_v22, 1 }
 0x191   :  { %v4105_v38 = vmul.f32 %v437_v28, %v3926_v37  ;;  %v445_v39 = vadd.f32 %v444_v29, %v443_v22  ;;  %v3221_v28 = vld [vmem:[#allocation7 + $0x60] sm:$0xff] }
 0x192   :  { %962 = vmatpush.bf16.msra.mxu0 %v3231_v61  ;;  %v3261_v29 = vld [vmem:[#allocation11 + $0x20] sm:$0xff]  ;;  %951 = vmatpush.bf16.msrb.mxu3 %v3221_v28 }
 0x193   :  { %v446_v50 = vmul.f32 %v445_v39, %v3926_v37  ;;  %v447_v51 = vmul.f32 %v4105_v38, %v4105_v38  ;;  %v450_v13 = vsub.f32 %v4011_v43, %v4105_v38  ;;  %v3263_v43 = vld [vmem:[#allocation11 + $0x30] sm:$0xff]  ;;  %v3218_v38 = vld [vmem:[#allocation7 + $0x48] sm:$0xff] }
 0x194   :  { %v3211_v39 = vld [vmem:[#allocation7 + $0x10] sm:$0xff] }
 0x195   :  { %v448_v57 = vsub.f32 %v446_v50, %v447_v51  ;;  %940 = vmatpush.bf16.msrb.mxu2 %v3211_v39 }
 0x196   :  { %963 = vmatpush.bf16.msra.mxu0 %v3230_v1  ;;  %952 = vmatpush.bf16.msrb.mxu3 %v3220_v31 }
 0x197   :  { %v449_v58 = vmax.f32 %v448_v57, 0.0 }
 0x199   :  { %v451_v59 = vadd.f32 1e-05, %v449_v58  ;;  %941 = vmatpush.bf16.msrb.mxu2 %v3210_v42 }
 0x19a   :  { %964 = vmatpush.bf16.msra.mxu0 %v3229_v6  ;;  %953 = vmatpush.bf16.msrb.mxu3 %v3219_v34 }
 0x19b   :  { %3371 = vrsqrt.f32 %v451_v59  ;;  %vm458_vm6 = vweird.f32 %v451_v59 }
 0x19d   :  { %942 = vmatpush.bf16.msrb.mxu2 %v3209_v44 }
 0x19e   :  { %965 = vmatpush.bf16.msra.mxu0 %v3228_v10  ;;  %954 = vmatpush.bf16.msrb.mxu3 %v3218_v38  ;;  %v790_v38 = vld [vmem:[#allocation2 + $0x20] ss:$0 sm:$0xff] }
 0x1a1   :  { %v3372_v2 = vpop.eup %3371 }
 0x1a2   :  { %v453_v4 = vmul.f32 %v3372_v2, %v451_v59  ;;  %vm459_vm5 = vweird.f32 %v3372_v2  ;;  %966 = vmatpush.bf16.msra.mxu0 %v3227_v14  ;;  %955 = vmatpush.bf16.msrb.mxu3 %v3217_v40 }
 0x1a3   :  { %vm460_vm7 = vmor %vm458_vm6, %vm459_vm5 }
 0x1a4   :  { %v454_v7 = vmul.f32 %v3372_v2, %v453_v4  ;;  %v224_v4 = vld [vmem:[%s4395_s1 + $0x10] sm:$0xff] }
 0x1a6   :  { %v455_v8 = vmul.f32 0.5, %v454_v7  ;;  %967 = vmatpush.bf16.msra.mxu0 %v3226_v20 }
 0x1a8   :  { %v456_v11 = vsub.f32 1.5, %v455_v8 }
 0x1aa   :  { %v457_v12 = vmul.f32 %v3372_v2, %v456_v11  ;;  %968 = vmatpush.bf16.msra.mxu0 %v3225_v23  ;;  %v1305_v23 = vld [vmem:[#allocation2 + $0x27] ss:$0 sm:$0xff] }
 0x1ac   :  { %v461_v16 = vsel %vm460_vm7, %v3372_v2, %v457_v12  ;;  %v223_v12 = vld [vmem:[%s4395_s1 + $0x8] sm:$0xff] }
 0x1ad   :  { %v462_v17 = vmul.f32 %v461_v16, %v450_v13 }
 0x1af   :  { %v463_v19 = vmul.f32 %v462_v17, %v430_v15 }
 0x1b1   :  { %v464_v21 = vadd.f32 %v463_v19, %v431_v18 }
 0x1b3   :  { %vm465_vm8 = vcmp.gt.f32.partialorder %v464_v21, 0.0  ;;  %v466_v22 = vmul.f32 0.01, %v464_v21 }
 0x1b5   :  { %v467_v24 = vsel %vm465_vm8, %v464_v21, %v466_v22  ;;  %v3240_v21 = vld [vmem:[#allocation8 + $0x38] sm:$0xff]  ;;  %v3239_v22 = vld [vmem:[#allocation8 + $0x30] sm:$0xff] }
 0x1b6   :  { %v500_v25 = vpack.c.bf16 %v467_v24, %v467_v24  ;;  %1078 = vmatpush.bf16.msra.mxu1 %v3240_v21  ;;  %v3268_v21 = vld [vmem:[#allocation13 + $0x18] sm:$0xff] }
 0x1b8   :  { %680 = vmatmul.bf16.vlgmr.msra.gmra.mxu2 %v500_v25  ;;  %693 = vmatmul.bf16.vlgmr.msra.gmra.mxu3 %v500_v25 }
 0x1b9   :  { %706 = vmatmul.bf16.vlgmr.msrb.gmra.mxu0 %v500_v25  ;;  %719 = vmatmul.bf16.vlgmr.msrb.gmra.mxu1 %v500_v25 }
 0x1ba   :  { %1354 = vmatpush.bf16.msrb.mxu0 %v3264_v26  ;;  %1079 = vmatpush.bf16.msra.mxu1 %v3239_v22  ;;  %v3238_v26 = vld [vmem:[#allocation8 + $0x28] sm:$0xff] }
 0x1be   :  { %1355 = vmatpush.bf16.msrb.mxu0 %v3263_v43  ;;  %1080 = vmatpush.bf16.msra.mxu1 %v3238_v26 }
 0x1c2   :  { %1356 = vmatpush.bf16.msrb.mxu0 %v3262_v27  ;;  %1081 = vmatpush.bf16.msra.mxu1 %v3237_v30  ;;  %v3265_v30 = vld [vmem:[#allocation13] sm:$0xff] }
 0x1c6   :  { %1357 = vmatpush.bf16.msrb.mxu0 %v3261_v29 }
 0x1c9   :  { %969 = vmatmul.bf16.vlgmr.msra.gmra.mxu0 %v3923_v9  ;;  %v3258_v9 = vld [vmem:[#allocation11 + $0x8] sm:$0xff] }
 0x1ca   :  { %1358 = vmatpush.bf16.msrb.mxu0 %v3260_v32 }
 0x1ce   :  { %1359 = vmatpush.bf16.msrb.mxu0 %v3259_v35 }
 0x1d2   :  { %1360 = vmatpush.bf16.msrb.mxu0 %v3258_v9  ;;  %v3236_v9 = vld [vmem:[#allocation8 + $0x18] sm:$0xff] }
 0x1d3   :  { %1082 = vmatpush.bf16.msra.mxu1 %v3236_v9 }
 0x1d6   :  { %1361 = vmatpush.bf16.msrb.mxu0 %v3257_v41 }
 0x236   :  { %v707_v48 = vpop.f32.mrf.mxu0  ;;  %v720_v49 = vpop.f32.mrf.mxu1 }
 0x237   :  { %v708_v50 = vadd.f32 %v707_v48, %v506_v46  ;;  %v721_v51 = vadd.f32 %v720_v49, %v507_v47  ;;  %v3235_v46 = vld [vmem:[#allocation8 + $0x10] sm:$0xff] }
 0x238   :  { %1083 = vmatpush.bf16.msra.mxu1 %v3235_v46 }
 0x239   :  { %726 = vst [vmem:[%s4390_s14 + $0x10] sm:$0xff] %v708_v50  ;;  %v733_v54 = vmul.f32 0.5, %v721_v51 }
 0x23a   :  { %727 = vst [vmem:[%s4390_s14 + $0x18] sm:$0xff] %v721_v51 }
 0x23b   :  { %v681_v55 = vpop.f32.mrf.mxu2  ;;  %v694_v56 = vpop.f32.mrf.mxu3  ;;  %v734_v57 = vmul.f32 1.442695, %v733_v54  ;;  %v3234_v54 = vld [vmem:[#allocation8 + $0x8] sm:$0xff] }
 0x23c   :  { %v682_v58 = vadd.f32 %v681_v55, %v504_v52  ;;  %v695_v59 = vadd.f32 %v694_v56, %v505_v53  ;;  %1084 = vmatpush.bf16.msra.mxu1 %v3234_v54 }
 0x23d   :  { %3373 = vpow2.f32 %v734_v57 }
 0x23e   :  { %724 = vst [vmem:[%s4390_s14] sm:$0xff] %v682_v58  ;;  %v2400_v60 = vmul.f32 %v682_v58, %v682_v58  ;;  %v728_v61 = vmul.f32 0.5, %v695_v59  ;;  %v2402_v62 = vmul.f32 1.442695, %v695_v59  ;;  %v709_v63 = vpop.f32.mrf.mxu0  ;;  %v722_v0 = vpop.f32.mrf.mxu1  ;;  %v2399_v1 = vadd.f32 1.0, %v695_v59 }
 0x23f   :  { %725 = vst [vmem:[%s4390_s14 + $0x8] sm:$0xff] %v695_v59  ;;  %v3272_v0 = vld [vmem:[#allocation13 + $0x38] sm:$0xff] }
 0x240   :  { %v729_v2 = vmul.f32 1.442695, %v728_v61  ;;  %v2401_v3 = vsub.f32 %v2399_v1, %v2400_v60  ;;  %3375 = vpow2.f32 %v2402_v62  ;;  %v3233_v61 = vld [vmem:[#allocation8] sm:$0xff] }
 0x241   :  { %1085 = vmatpush.bf16.msra.mxu1 %v3233_v61  ;;  %v3256_v61 = vld [vmem:[#allocation10 + $0x74] sm:$0xf0] }
 0x242   :  { %3377 = vpow2.f32 %v729_v2 }
 0x243   :  { %v3374_v5 = vpop.eup %3373  ;;  %v683_v6 = vpop.f32.mrf.mxu2 }
 0x244   :  { %v696_v7 = vpop.f32.mrf.mxu3  ;;  %v736_v8 = vmul.f32 %v3374_v5, %v224_v4  ;;  %v3271_v6 = vld [vmem:[#allocation13 + $0x30] sm:$0xff] }
 0x245   :  { %1471 = vmatpush.bf16.msrb.mxu1 %v3272_v0  ;;  %v2857_v0 = vld [vmem:[#allocation10 + $0x60] sm:$0xf] }
 0x246   :  { %v3376_v10 = vpop.eup %3375  ;;  %v737_v11 = vadd.f32 %v736_v8, %v708_v50  ;;  %v970_v13 = vpop.f32.mrf.mxu0 }
 0x247   :  { %v4155_v14 = vsub.f32 %v2401_v3, %v3376_v10 }
 0x248   :  { %v3378_v15 = vpop.eup %3377  ;;  %739 = vst [vmem:[%s4390_s14 + $0x28] sm:$0xff] %v737_v11  ;;  %v789_v16 = vpack.c.bf16 %v737_v11, %v737_v11  ;;  %v3270_v11 = vld [vmem:[#allocation13 + $0x28] sm:$0xff] }
 0x249   :  { %v731_v17 = vmul.f32 %v3378_v15, %v223_v12  ;;  %1472 = vmatpush.bf16.msrb.mxu1 %v3271_v6  ;;  %v2849_v6 = vld [vmem:[#allocation10 + $0x50] sm:$0xf] }
 0x24a   :  { %956 = vmatmul.bf16.vlgmr.msrb.gmra.mxu3 %v789_v16  ;;  %1362 = vmatmul.bf16.vlgmr.msrb.gmra.mxu0 %v789_v16 }
 0x24b   :  { %v732_v18 = vadd.f32 %v731_v17, %v682_v58  ;;  %v3269_v17 = vld [vmem:[#allocation13 + $0x20] sm:$0xff] }
 0x24d   :  { %738 = vst [vmem:[%s4390_s14 + $0x20] sm:$0xff] %v732_v18  ;;  %v4163_v19 = vpack.c.bf16 %v732_v18, %v732_v18  ;;  %1473 = vmatpush.bf16.msrb.mxu1 %v3270_v11  ;;  %v2851_v11 = vld [vmem:[#allocation10 + $0x58] sm:$0xf0] }
 0x24e   :  { %v972_v20 = vpop.f32.mrf.mxu0 }
 0x24f   :  { %943 = vmatmul.bf16.vlgmr.msrb.gmra.mxu2 %v4163_v19 }
 0x251   :  { %1474 = vmatpush.bf16.msrb.mxu1 %v3269_v17 }
 0x255   :  { %1475 = vmatpush.bf16.msrb.mxu1 %v3268_v21  ;;  %v2833_v21 = vld [vmem:[#allocation10 + $0x30] sm:$0xf] }
 0x2c7   :  { %v1363_v24 = vpop.f32.mrf.mxu0 }
 0x2c8   :  { %v4166_v25 = vadd.f32 %v1363_v24, %v1305_v23  ;;  %v3267_v24 = vld [vmem:[#allocation13 + $0x10] sm:$0xff] }
 0x2c9   :  { %1476 = vmatpush.bf16.msrb.mxu1 %v3267_v24 }
 0x2ca   :  { %v1369_v43 = vrot.slane %v4166_v25, 4  ;;  %v1376_v27 = vmul.f32 %v4166_v25, %v4166_v25 }
 0x2cc   :  { %v1370_v28 = vadd.f32 %v1369_v43, %v4166_v25  ;;  %v1377_v29 = vrot.slane %v1376_v27, 4  ;;  %v3266_v43 = vld [vmem:[#allocation13 + $0x8] sm:$0xff] }
 0x2cd   :  { %v957_v31 = vpop.f32.mrf.mxu3  ;;  %1477 = vmatpush.bf16.msrb.mxu1 %v3266_v43 }
 0x2ce   :  { %v1371_v32 = vrot.slane %v1370_v28, 2  ;;  %v1378_v33 = vadd.f32 %v1377_v29, %v1376_v27 }
 0x2cf   :  { %v1365_v34 = vpop.f32.mrf.mxu0 }
 0x2d0   :  { %v1372_v35 = vadd.f32 %v1371_v32, %v1370_v28  ;;  %v1379_v36 = vrot.slane %v1378_v33, 2 }
 0x2d1   :  { %1478 = vmatpush.bf16.msrb.mxu1 %v3265_v30  ;;  %v1029_v30 = vld [vmem:[#allocation2 + $0x23] ss:$0 sm:$0xff] }
 0x2d2   :  { %v1373_v39 = vrot.slane %v1372_v35, 1  ;;  %v1380_v40 = vadd.f32 %v1379_v36, %v1378_v33  ;;  %v944_v41 = vpop.f32.mrf.mxu2 }
 0x2d3   :  { %v945_v42 = vadd.f32 %v944_v41, %v790_v38 }
 0x2d4   :  { %v1374_v44 = vadd.f32 %v1373_v39, %v1372_v35  ;;  %v1381_v45 = vrot.slane %v1380_v40, 1 }
 0x2d5   :  { %v958_v47 = vadd.f32 %v957_v31, %v945_v42  ;;  %v959_v48 = vpop.f32.mrf.mxu3  ;;  %v975_v42 = vld [vmem:[#allocation2 + $0x22] ss:$0 sm:$0xff] }
 0x2d6   :  { %v4173_v49 = vmul.f32 %v1374_v44, %v3926_v37  ;;  %v1382_v50 = vadd.f32 %v1381_v45, %v1380_v40  ;;  %v974_v40 = vld [vmem:[#allocation2 + $0x21] ss:$0 sm:$0xff] }
 0x2d7   :  { %v4175_v51 = vadd.f32 %v970_v13, %v958_v47 }
 0x2d8   :  { %v1383_v52 = vmul.f32 %v1382_v50, %v3926_v37  ;;  %v1384_v53 = vmul.f32 %v4173_v49, %v4173_v49  ;;  %v1387_v46 = vsub.f32 %v4166_v25, %v4173_v49  ;;  %v2867_v49 = vld [vmem:[#allocation10 + $0x78] sm:$0xf0] }
 0x2d9   :  { %v976_v55 = vrot.slane %v4175_v51, 4  ;;  %v983_v56 = vmul.f32 %v4175_v51, %v4175_v51 }
 0x2da   :  { %v946_v57 = vpop.f32.mrf.mxu2  ;;  %v1385_v58 = vsub.f32 %v1383_v52, %v1384_v53  ;;  %v1367_v52 = vld [vmem:[#allocation2 + $0x40] ss:$0 sm:$0xff] }
 0x2db   :  { %v977_v59 = vadd.f32 %v976_v55, %v4175_v51  ;;  %v984_v60 = vrot.slane %v983_v56, 4  ;;  %v1368_v55 = vld [vmem:[#allocation2 + $0x41] ss:$0 sm:$0xff] }
 0x2dc   :  { %v1386_v1 = vmax.f32 %v1385_v58, 0.0 }
 0x2dd   :  { %v978_v62 = vrot.slane %v977_v59, 2  ;;  %v985_v63 = vadd.f32 %v984_v60, %v983_v56  ;;  %v2865_v60 = vld [vmem:[#allocation10 + $0x70] sm:$0xf] }
 0x2de   :  { %v1388_v7 = vadd.f32 1e-05, %v1386_v1  ;;  %v2866_v25 = vor.u32 %v3256_v61, %v2865_v60  ;;  %v3254_v1 = vld [vmem:[#allocation10 + $0x64] sm:$0xf0] }
 0x2df   :  { %v979_v2 = vadd.f32 %v978_v62, %v977_v59  ;;  %v986_v3 = vrot.slane %v985_v63, 2  ;;  %v3255_v62 = vld [vmem:[#allocation10 + $0x74] sm:$0xf] }
 0x2e0   :  { %3379 = vrsqrt.f32 %v1388_v7  ;;  %vm1395_vm13 = vweird.f32 %v1388_v7  ;;  %1233 = vmatpush.bf16.msra.mxu2 %v2866_v25  ;;  %v3279_v25 = vld [vmem:[#allocation14 + $0x30] sm:$0xff] }
 0x2e1   :  { %v980_v4 = vrot.slane %v979_v2, 1  ;;  %v987_v5 = vadd.f32 %v986_v3, %v985_v63  ;;  %v2870_v63 = vor.u32 %v3255_v62, %v2867_v49  ;;  %v2858_v3 = vor.u32 %v3254_v1, %v2857_v0  ;;  %v3287_v49 = vld [vmem:[#allocation16 + $0x30] sm:$0xff]  ;;  %v1422_v1 = vld [vmem:[#allocation2 + $0x42] ss:$0 sm:$0xff] }
 0x2e3   :  { %v981_v8 = vadd.f32 %v980_v4, %v979_v2  ;;  %v988_v10 = vrot.slane %v987_v5, 1  ;;  %1246 = vmatpush.bf16.msra.mxu3 %v2870_v63  ;;  %v3253_v2 = vld [vmem:[#allocation10 + $0x64] sm:$0xf]  ;;  %v2859_v4 = vld [vmem:[#allocation10 + $0x68] sm:$0xf0] }
 0x2e4   :  { %1234 = vmatpush.bf16.msra.mxu2 %v2858_v3 }
 0x2e5   :  { %v982_v12 = vmul.f32 %v981_v8, %v3926_v37  ;;  %v989_v13 = vadd.f32 %v988_v10, %v987_v5  ;;  %v2862_v5 = vor.u32 %v3253_v2, %v2859_v4  ;;  %v3251_v8 = vld [vmem:[#allocation10 + $0x54] sm:$0xf]  ;;  %v3278_v4 = vld [vmem:[#allocation14 + $0x28] sm:$0xff] }
 0x2e6   :  { %v3380_v22 = vpop.eup %3379 }
 0x2e7   :  { %v990_v15 = vmul.f32 %v989_v13, %v3926_v37  ;;  %v991_v16 = vmul.f32 %v982_v12, %v982_v12  ;;  %v1390_v26 = vmul.f32 %v3380_v22, %v1388_v7  ;;  %v994_v38 = vsub.f32 %v4175_v51, %v982_v12  ;;  %1247 = vmatpush.bf16.msra.mxu3 %v2862_v5  ;;  %v3252_v7 = vld [vmem:[#allocation10 + $0x54] sm:$0xf0]  ;;  %v2841_v13 = vld [vmem:[#allocation10 + $0x40] sm:$0xf]  ;;  %v3286_v5 = vld [vmem:[#allocation16 + $0x28] sm:$0xff] }
 0x2e8   :  { %vm1396_vm12 = vweird.f32 %v3380_v22  ;;  %v2850_v10 = vor.u32 %v3252_v7, %v2849_v6  ;;  %v2854_v12 = vor.u32 %v3251_v8, %v2851_v11 }
 0x2e9   :  { %v992_v18 = vsub.f32 %v990_v15, %v991_v16  ;;  %v1391_v27 = vmul.f32 %v3380_v22, %v1390_v26  ;;  %vm1397_vm14 = vmor %vm1395_vm13, %vm1396_vm12  ;;  %v3250_v15 = vld [vmem:[#allocation10 + $0x44] sm:$0xf0]  ;;  %v3249_v16 = vld [vmem:[#allocation10 + $0x44] sm:$0xf] }
 0x2ea   :  { %1235 = vmatpush.bf16.msra.mxu2 %v2850_v10  ;;  %v2842_v17 = vor.u32 %v3250_v15, %v2841_v13  ;;  %v2835_v26 = vld [vmem:[#allocation10 + $0x38] sm:$0xf0]  ;;  %v3277_v15 = vld [vmem:[#allocation14 + $0x20] sm:$0xff] }
 0x2eb   :  { %v993_v20 = vmax.f32 %v992_v18, 0.0  ;;  %v1392_v31 = vmul.f32 0.5, %v1391_v27  ;;  %1248 = vmatpush.bf16.msra.mxu3 %v2854_v12  ;;  %v2843_v18 = vld [vmem:[#allocation10 + $0x48] sm:$0xf0]  ;;  %v2825_v27 = vld [vmem:[#allocation10 + $0x20] sm:$0xf] }
 0x2ed   :  { %v995_v23 = vadd.f32 1e-05, %v993_v20  ;;  %v1393_v34 = vsub.f32 1.5, %v1392_v31  ;;  %v2846_v20 = vor.u32 %v3249_v16, %v2843_v18  ;;  %v3285_v16 = vld [vmem:[#allocation16 + $0x20] sm:$0xff] }
 0x2ee   :  { %1236 = vmatpush.bf16.msra.mxu2 %v2842_v17 }
 0x2ef   :  { %3381 = vrsqrt.f32 %v995_v23  ;;  %vm1002_vm10 = vweird.f32 %v995_v23  ;;  %v1394_v9 = vmul.f32 %v3380_v22, %v1393_v34  ;;  %1249 = vmatpush.bf16.msra.mxu3 %v2846_v20 }
 0x2f1   :  { %v1398_v45 = vsel %vm1397_vm14, %v3380_v22, %v1394_v9  ;;  %v3248_v22 = vld [vmem:[#allocation10 + $0x34] sm:$0xf0]  ;;  %v3243_v9 = vld [vmem:[#allocation10 + $0x14] sm:$0xf] }
 0x2f2   :  { %v1399_v48 = vmul.f32 %v1398_v45, %v1387_v46  ;;  %v2834_v24 = vor.u32 %v3248_v22, %v2833_v21 }
 0x2f4   :  { %v1400_v54 = vmul.f32 %v1399_v48, %v1367_v52  ;;  %1237 = vmatpush.bf16.msra.mxu2 %v2834_v24  ;;  %v3242_v48 = vld [vmem:[#allocation10 + $0x4] sm:$0xf0]  ;;  %v3241_v52 = vld [vmem:[#allocation10 + $0x4] sm:$0xf]  ;;  %v3276_v24 = vld [vmem:[#allocation14 + $0x18] sm:$0xff] }
 0x2f5   :  { %v3382_v28 = vpop.eup %3381 }
 0x2f6   :  { %v997_v29 = vmul.f32 %v3382_v28, %v995_v23  ;;  %vm1003_vm9 = vweird.f32 %v3382_v28  ;;  %v1401_v56 = vadd.f32 %v1400_v54, %v1368_v55  ;;  %v3247_v23 = vld [vmem:[#allocation10 + $0x34] sm:$0xf] }
 0x2f7   :  { %vm1004_vm11 = vmor %vm1002_vm10, %vm1003_vm9  ;;  %v2838_v43 = vor.u32 %v3247_v23, %v2835_v26  ;;  %v3284_v26 = vld [vmem:[#allocation16 + $0x18] sm:$0xff] }
 0x2f8   :  { %v998_v32 = vmul.f32 %v3382_v28, %v997_v29  ;;  %v1403_v57 = vmul.f32 0.01, %v1401_v56  ;;  %vm1402_vm0 = vcmp.gt.f32.partialorder %v1401_v56, 0.0  ;;  %v3245_v29 = vld [vmem:[#allocation10 + $0x24] sm:$0xf] }
 0x2f9   :  { %1250 = vmatpush.bf16.msra.mxu3 %v2838_v43 }
 0x2fa   :  { %v999_v33 = vmul.f32 0.5, %v998_v32  ;;  %v1404_v58 = vsel %vm1402_vm0, %v1401_v56, %v1403_v57  ;;  %v2827_v32 = vld [vmem:[#allocation10 + $0x28] sm:$0xf0]  ;;  %v3280_v56 = vld [vmem:[#allocation14 + $0x38] sm:$0xff] }
 0x2fb   :  { %v1421_v59 = vpack.c.bf16 %v1404_v58, %v1404_v58  ;;  %v3288_v57 = vld [vmem:[#allocation16 + $0x38] sm:$0xff] }
 0x2fc   :  { %v1000_v35 = vsub.f32 1.5, %v999_v33  ;;  %v2830_v33 = vor.u32 %v3245_v29, %v2827_v32  ;;  %v3283_v32 = vld [vmem:[#allocation16 + $0x10] sm:$0xff] }
 0x2fe   :  { %v1001_v36 = vmul.f32 %v3382_v28, %v1000_v35  ;;  %1251 = vmatpush.bf16.msra.mxu3 %v2830_v33 }
 0x300   :  { %v1005_v39 = vsel %vm1004_vm11, %v3382_v28, %v1001_v36  ;;  %v3246_v28 = vld [vmem:[#allocation10 + $0x24] sm:$0xf0]  ;;  %v2817_v36 = vld [vmem:[#allocation10 + $0x10] sm:$0xf] }
 0x301   :  { %v1006_v41 = vmul.f32 %v1005_v39, %v994_v38  ;;  %v2826_v31 = vor.u32 %v3246_v28, %v2825_v27  ;;  %v3244_v38 = vld [vmem:[#allocation10 + $0x14] sm:$0xf0] }
 0x302   :  { %v2818_v39 = vor.u32 %v3244_v38, %v2817_v36  ;;  %v3274_v36 = vld [vmem:[#allocation14 + $0x8] sm:$0xff] }
 0x303   :  { %v1007_v44 = vmul.f32 %v1006_v41, %v974_v40  ;;  %1238 = vmatpush.bf16.msra.mxu2 %v2826_v31  ;;  %v2819_v40 = vld [vmem:[#allocation10 + $0x18] sm:$0xf0]  ;;  %v3275_v31 = vld [vmem:[#allocation14 + $0x10] sm:$0xff]  ;;  %v3282_v38 = vld [vmem:[#allocation16 + $0x8] sm:$0xff] }
 0x305   :  { %v1008_v47 = vadd.f32 %v1007_v44, %v975_v42  ;;  %v2822_v44 = vor.u32 %v3243_v9, %v2819_v40 }
 0x307   :  { %vm1009_vm15 = vcmp.gt.f32.partialorder %v1008_v47, 0.0  ;;  %v1010_v50 = vmul.f32 0.01, %v1008_v47  ;;  %1239 = vmatpush.bf16.msra.mxu2 %v2818_v39  ;;  %1252 = vmatpush.bf16.msra.mxu3 %v2822_v44 }
 0x309   :  { %v1011_v51 = vsel %vm1009_vm15, %v1008_v47, %v1010_v50  ;;  %v2809_v47 = vld [vmem:[#allocation10] sm:$0xf] }
 0x30a   :  { %v1028_v53 = vpack.c.bf16 %v1011_v51, %v1011_v51  ;;  %v2810_v50 = vor.u32 %v3242_v48, %v2809_v47  ;;  %v2811_v51 = vld [vmem:[#allocation10 + $0x8] sm:$0xf0]  ;;  %v3281_v47 = vld [vmem:[#allocation16] sm:$0xff] }
 0x30b   :  { %v2814_v55 = vor.u32 %v3241_v52, %v2811_v51 }
 0x30c   :  { %1086 = vmatmul.bf16.vlgmr.msra.gmra.mxu1 %v1028_v53  ;;  %1240 = vmatpush.bf16.msra.mxu2 %v2810_v50 }
 0x30d   :  { %1253 = vmatpush.bf16.msra.mxu3 %v2814_v55 }
 0x310   :  { %1588 = vmatpush.bf16.msrb.mxu2 %v3280_v56  ;;  %v1091_v56 = vld [vmem:[#allocation2 + $0x24] ss:$0 sm:$0xff] }
 0x311   :  { %1667 = vmatpush.bf16.msrb.mxu3 %v3288_v57 }
 0x314   :  { %1589 = vmatpush.bf16.msrb.mxu2 %v3279_v25 }
 0x315   :  { %1668 = vmatpush.bf16.msrb.mxu3 %v3287_v49 }
 0x318   :  { %1590 = vmatpush.bf16.msrb.mxu2 %v3278_v4 }
 0x319   :  { %1669 = vmatpush.bf16.msrb.mxu3 %v3286_v5  ;;  %v1484_v5 = vld [vmem:[#allocation2 + $0x43] ss:$0 sm:$0xff] }
 0x31c   :  { %1479 = vmatmul.bf16.vlgmr.msrb.gmra.mxu1 %v1421_v59  ;;  %1591 = vmatpush.bf16.msrb.mxu2 %v3277_v15 }
 0x31d   :  { %1670 = vmatpush.bf16.msrb.mxu3 %v3285_v16 }
 0x320   :  { %1592 = vmatpush.bf16.msrb.mxu2 %v3276_v24 }
 0x321   :  { %1671 = vmatpush.bf16.msrb.mxu3 %v3284_v26 }
 0x324   :  { %1593 = vmatpush.bf16.msrb.mxu2 %v3275_v31 }
 0x325   :  { %1672 = vmatpush.bf16.msrb.mxu3 %v3283_v32 }
 0x328   :  { %1594 = vmatpush.bf16.msrb.mxu2 %v3274_v36  ;;  %v225_v36 = vlaneseq }
 0x329   :  { %1673 = vmatpush.bf16.msrb.mxu3 %v3282_v38 }
 0x32d   :  { %1674 = vmatpush.bf16.msrb.mxu3 %v3281_v47 }
 0x389   :  { %v1087_v34 = vpop.f32.mrf.mxu1 }
 0x38a   :  { %v4189_v35 = vadd.f32 %v1087_v34, %v1029_v30 }
 0x38c   :  { %v1093_v41 = vrot.slane %v4189_v35, 4  ;;  %v1100_v42 = vmul.f32 %v4189_v35, %v4189_v35 }
 0x38e   :  { %v1094_v45 = vadd.f32 %v1093_v41, %v4189_v35  ;;  %v1101_v46 = vrot.slane %v1100_v42, 4 }
 0x390   :  { %v1095_v53 = vrot.slane %v1094_v45, 2  ;;  %v1102_v54 = vadd.f32 %v1101_v46, %v1100_v42 }
 0x391   :  { %v1089_v58 = vpop.f32.mrf.mxu1 }
 0x392   :  { %v1096_v59 = vadd.f32 %v1095_v53, %v1094_v45  ;;  %v1103_v60 = vrot.slane %v1102_v54, 2  ;;  %v3273_v45 = vld [vmem:[#allocation14] sm:$0xff] }
 0x393   :  { %1595 = vmatpush.bf16.msrb.mxu2 %v3273_v45 }
 0x394   :  { %v1097_v61 = vrot.slane %v1096_v59, 1  ;;  %v1104_v62 = vadd.f32 %v1103_v60, %v1102_v54 }
 0x396   :  { %v1098_v63 = vadd.f32 %v1097_v61, %v1096_v59  ;;  %v1105_v0 = vrot.slane %v1104_v62, 1  ;;  %v1092_v59 = vld [vmem:[#allocation2 + $0x25] ss:$0 sm:$0xff] }
 0x398   :  { %v4196_v2 = vmul.f32 %v1098_v63, %v3926_v37  ;;  %v1106_v3 = vadd.f32 %v1105_v0, %v1104_v62 }
 0x399   :  { %v1480_v6 = vpop.f32.mrf.mxu1 }
 0x39a   :  { %v1107_v7 = vmul.f32 %v1106_v3, %v3926_v37  ;;  %v1108_v8 = vmul.f32 %v4196_v2, %v4196_v2  ;;  %v4201_v10 = vadd.f32 %v1480_v6, %v1422_v1  ;;  %v1111_v55 = vsub.f32 %v4189_v35, %v4196_v2 }
 0x39c   :  { %v1109_v11 = vsub.f32 %v1107_v7, %v1108_v8  ;;  %v1486_v12 = vrot.slane %v4201_v10, 4  ;;  %v1493_v13 = vmul.f32 %v4201_v10, %v4201_v10  ;;  %v1485_v8 = vld [vmem:[#allocation2 + $0x44] ss:$0 sm:$0xff] }
 0x39e   :  { %v1110_v17 = vmax.f32 %v1109_v11, 0.0  ;;  %v1487_v18 = vadd.f32 %v1486_v12, %v4201_v10  ;;  %v1494_v20 = vrot.slane %v1493_v13, 4 }
 0x3a0   :  { %v1112_v21 = vadd.f32 1e-05, %v1110_v17  ;;  %v1488_v22 = vrot.slane %v1487_v18, 2  ;;  %v1495_v23 = vadd.f32 %v1494_v20, %v1493_v13  ;;  %v2091_v17 = vld [vmem:[#allocation2] ss:$0 sm:$0xff] }
 0x3a1   :  { %v1482_v43 = vpop.f32.mrf.mxu1 }
 0x3a2   :  { %3383 = vrsqrt.f32 %v1112_v21  ;;  %v1489_v27 = vadd.f32 %v1488_v22, %v1487_v18  ;;  %v1496_v28 = vrot.slane %v1495_v23, 2  ;;  %vm1119_vm2 = vweird.f32 %v1112_v21 }
 0x3a3   :  { %v3159_v18 = vadd.f32 8.0, %v2091_v17 }
 0x3a4   :  { %v1490_v29 = vrot.slane %v1489_v27, 1  ;;  %v1497_v30 = vadd.f32 %v1496_v28, %v1495_v23 }
 0x3a5   :  { %v2094_v20 = vand.u32 2147483647, %v3159_v18  ;;  %v2093_v26 = vmax.f32 %v3159_v18, 0.0 }
 0x3a6   :  { %v1491_v33 = vadd.f32 %v1490_v29, %v1489_v27  ;;  %v1498_v34 = vrot.slane %v1497_v30, 1 }
 0x3a8   :  { %v3384_v9 = vpop.eup %3383  ;;  %v1492_v39 = vmul.f32 %v1491_v33, %v3926_v37  ;;  %v1499_v40 = vadd.f32 %v1498_v34, %v1497_v30 }
 0x3a9   :  { %v1114_v41 = vmul.f32 %v3384_v9, %v1112_v21  ;;  %vm1120_vm1 = vweird.f32 %v3384_v9  ;;  %v2095_v21 = vsub.f32 0.0, %v2094_v20 }
 0x3aa   :  { %v1500_v42 = vmul.f32 %v1499_v40, %v3926_v37  ;;  %v1501_v44 = vmul.f32 %v1492_v39, %v1492_v39  ;;  %vm1121_vm3 = vmor %vm1119_vm2, %vm1120_vm1  ;;  %v1504_v2 = vsub.f32 %v4201_v10, %v1492_v39  ;;  %v1147_v39 = vld [vmem:[#allocation2 + $0x26] ss:$8 sm:$0x3]  ;;  %v4213_v40 = vand.u32 127, %v225_v36 }
 0x3ab   :  { %v1115_v46 = vmul.f32 %v3384_v9, %v1114_v41  ;;  %v2096_v22 = vmul.f32 1.442695, %v2095_v21 }
 0x3ac   :  { %v1502_v48 = vsub.f32 %v1500_v42, %v1501_v44  ;;  %v1149_v42 = vperm.slane %v1147_v39, 0  ;;  %v1150_v44 = vperm.slane %v1147_v39, 1  ;;  %vm1260_vm9 = vcmp.lt.s32.totalorder %v4213_v40, 10 }
 0x3ad   :  { %v1116_v50 = vmul.f32 0.5, %v1115_v46  ;;  %vm2123_vm10 = vcmp.lt.s32.totalorder %v4213_v40, 64 }
 0x3ae   :  { %v1503_v52 = vmax.f32 %v1502_v48, 0.0 }
 0x3af   :  { %v1117_v51 = vsub.f32 1.5, %v1116_v50 }
 0x3b0   :  { %v1505_v53 = vadd.f32 1e-05, %v1503_v52 }
 0x3b1   :  { %v1118_v54 = vmul.f32 %v3384_v9, %v1117_v51 }
 0x3b2   :  { %3385 = vrsqrt.f32 %v1505_v53  ;;  %vm1512_vm6 = vweird.f32 %v1505_v53 }
 0x3b3   :  { %v1122_v57 = vsel %vm1121_vm3, %v3384_v9, %v1118_v54  ;;  %3387 = vpow2.f32 %v2096_v22 }
 0x3b4   :  { %v1123_v58 = vmul.f32 %v1122_v57, %v1111_v55  ;;  %v3295_v57 = vld [vmem:[#allocation17 + $0x30] sm:$0xff] }
 0x3b6   :  { %v1124_v60 = vmul.f32 %v1123_v58, %v1091_v56  ;;  %v1539_v58 = vld [vmem:[#allocation2 + $0x45] ss:$0 sm:$0xff] }
 0x3b8   :  { %v3386_v61 = vpop.eup %3385  ;;  %v1125_v62 = vadd.f32 %v1124_v60, %v1092_v59  ;;  %v1618_v59 = vld [vmem:[#allocation2 + $0x46] ss:$0 sm:$0xff]  ;;  %v3294_v60 = vld [vmem:[#allocation17 + $0x28] sm:$0xff] }
 0x3b9   :  { %v1507_v25 = vmul.f32 %v3386_v61, %v1505_v53  ;;  %vm1513_vm5 = vweird.f32 %v3386_v61  ;;  %v3388_v10 = vpop.eup %3387  ;;  %v3296_v53 = vld [vmem:[#allocation17 + $0x38] sm:$0xff] }
 0x3ba   :  { %vm1126_vm4 = vcmp.gt.f32.partialorder %v1125_v62, 0.0  ;;  %v1127_v49 = vmul.f32 0.01, %v1125_v62  ;;  %vm1514_vm7 = vmor %vm1512_vm6, %vm1513_vm5  ;;  %v2098_v23 = vadd.f32 1.0, %v3388_v10  ;;  %1784 = vmatpush.bf16.msra.mxu0 %v3296_v53  ;;  %v3291_v10 = vld [vmem:[#allocation17 + $0x10] sm:$0xff] }
 0x3bb   :  { %v1508_v63 = vmul.f32 %v3386_v61, %v1507_v25 }
 0x3bc   :  { %v1128_v0 = vsel %vm1126_vm4, %v1125_v62, %v1127_v49  ;;  %3389 = vlog2.f32 %v2098_v23 }
 0x3bd   :  { %v1509_v1 = vmul.f32 0.5, %v1508_v63  ;;  %v1145_v3 = vpack.c.bf16 %v1128_v0, %v1128_v0  ;;  %v3411_v0 = vld [vmem:[%s4395_s1] sm:$0xff] }
 0x3be   :  { %1785 = vmatpush.bf16.msra.mxu0 %v3295_v57 }
 0x3bf   :  { %v1510_v4 = vsub.f32 1.5, %v1509_v1  ;;  %1241 = vmatmul.bf16.vlgmr.msra.gmra.mxu2 %v1145_v3  ;;  %1254 = vmatmul.bf16.vlgmr.msra.gmra.mxu3 %v1145_v3 }
 0x3c1   :  { %v1511_v35 = vmul.f32 %v3386_v61, %v1510_v4 }
 0x3c2   :  { %v3390_v24 = vpop.eup %3389  ;;  %1786 = vmatpush.bf16.msra.mxu0 %v3294_v60  ;;  %v3145_v60 = vld [vmem:[#allocation19 + $0xe0] sm:$0xf] }
 0x3c3   :  { %v1515_v6 = vsel %vm1514_vm7, %v3386_v61, %v1511_v35  ;;  %v2100_v43 = vmul.f32 0.6931472, %v3390_v24  ;;  %v3293_v35 = vld [vmem:[#allocation17 + $0x20] sm:$0xff]  ;;  %vm2150_vm7 = vcmask 130048  }
 0x3c4   :  { %v1516_v7 = vmul.f32 %v1515_v6, %v1504_v2 }
 0x3c5   :  { %v2101_v27 = vadd.f32 %v2100_v43, %v2093_v26  ;;  %v3290_v43 = vld [vmem:[#allocation17 + $0x8] sm:$0xff] }
 0x3c6   :  { %v1517_v11 = vmul.f32 %v1516_v7, %v1484_v5  ;;  %1787 = vmatpush.bf16.msra.mxu0 %v3293_v35  ;;  %v3155_v35 = vld [vmem:[#allocation19 + $0xf8] sm:$0xf0] }
 0x3c7   :  { %v2102_v28 = vadd.f32 -8.0, %v2101_v27 }
 0x3c8   :  { %v1518_v12 = vadd.f32 %v1517_v11, %v1485_v8 }
 0x3c9   :  { %v2103_v29 = vsub.f32 8.0, %v2102_v28 }
 0x3ca   :  { %vm1519_vm8 = vcmp.gt.f32.partialorder %v1518_v12, 0.0  ;;  %v1520_v13 = vmul.f32 0.01, %v1518_v12 }
 0x3cb   :  { %v2105_v30 = vand.u32 2147483647, %v2103_v29  ;;  %v2104_v38 = vmax.f32 %v2103_v29, 0.0 }
 0x3cc   :  { %v1521_v15 = vsel %vm1519_vm8, %v1518_v12, %v1520_v13  ;;  %v3292_v12 = vld [vmem:[#allocation17 + $0x18] sm:$0xff] }
 0x3cd   :  { %v1538_v16 = vpack.c.bf16 %v1521_v15, %v1521_v15  ;;  %v2106_v31 = vsub.f32 0.0, %v2105_v30  ;;  %1788 = vmatpush.bf16.msra.mxu0 %v3292_v12  ;;  %v3324_v12 = vld [vmem:[#allocation19 + $0xd4] sm:$0xf0] }
 0x3cf   :  { %1596 = vmatmul.bf16.vlgmr.msrb.gmra.mxu2 %v1538_v16  ;;  %1675 = vmatmul.bf16.vlgmr.msrb.gmra.mxu3 %v4163_v19  ;;  %v2107_v32 = vmul.f32 1.442695, %v2106_v31 }
 0x3d1   :  { %3391 = vpow2.f32 %v2107_v32  ;;  %1789 = vmatpush.bf16.msra.mxu0 %v3291_v10  ;;  %v3289_v32 = vld [vmem:[#allocation17] sm:$0xff] }
 0x3d2   :  { %v3317_v10 = vld [vmem:[#allocation19 + $0xa4] sm:$0xf] }
 0x3d5   :  { %1790 = vmatpush.bf16.msra.mxu0 %v3290_v43  ;;  %v3320_v43 = vld [vmem:[#allocation19 + $0xb4] sm:$0xf0] }
 0x3d7   :  { %v3392_v19 = vpop.eup %3391 }
 0x3d8   :  { %v2109_v33 = vadd.f32 1.0, %v3392_v19 }
 0x3d9   :  { %1791 = vmatpush.bf16.msra.mxu0 %v3289_v32 }
 0x3da   :  { %3393 = vlog2.f32 %v2109_v33 }
 0x3e0   :  { %v3394_v34 = vpop.eup %3393 }
 0x3e1   :  { %v2111_v9 = vmul.f32 0.6931472, %v3394_v34 }
 0x3e3   :  { %v2112_v41 = vadd.f32 %v2111_v9, %v2104_v38 }
 0x3e5   :  { %v2113_v47 = vsub.f32 8.0, %v2112_v41 }
 0x3e7   :  { %v2115_v51 = vsub.f32 0.0, %v2113_v47 }
 0x3e9   :  { %v2116_v56 = vmul.f32 1.442695, %v2115_v51 }
 0x3eb   :  { %3395 = vpow2.f32 %v2116_v56 }
 0x3f1   :  { %v3396_v63 = vpop.eup %3395 }
 0x442   :  { %v1242_v45 = vpop.f32.mrf.mxu2  ;;  %v1255_v46 = vpop.f32.mrf.mxu3 }
 0x443   :  { %v1243_v48 = vadd.f32 %v1242_v45, %v1149_v42  ;;  %v1256_v50 = vadd.f32 %v1255_v46, %v1150_v44  ;;  %v1680_v45 = vld [vmem:[#allocation2 + $0x47] ss:$0 sm:$0xff] }
 0x445   :  { %1259 = vst [vmem:[%s4390_s14 + $0x38] sm:$0xff] %v1256_v50  ;;  %v4221_v52 = vsel %vm1260_vm9, %v1243_v48, -1e+30  ;;  %v1681_v48 = vld [vmem:[#allocation2 + $0x60] ss:$0 sm:$0xff] }
 0x446   :  { %1264 = vmax.xlane.f32.xlu0 %v4221_v52 }
 0x44a   :  { %v1244_v54 = vpop.f32.mrf.mxu2  ;;  %v1257_v55 = vpop.f32.mrf.mxu3 }
 0x452   :  { %v1597_v61 = vpop.f32.mrf.mxu2  ;;  %v1676_v62 = vpop.f32.mrf.mxu3 }
 0x453   :  { %v1598_v25 = vadd.f32 %v1597_v61, %v1539_v58  ;;  %v1677_v49 = vadd.f32 %v1676_v62, %v1618_v59  ;;  %v3327_v61 = vld [vmem:[#allocation19 + $0xec] sm:$0xf0]  ;;  %v3325_v62 = vld [vmem:[#allocation19 + $0xe4] sm:$0xf] }
 0x455   :  { %1601 = vst [vmem:[#allocation20] sm:$0xff] %v1598_v25  ;;  %v2114_v1 = vsub.f32 %v3411_v0, %v1598_v25  ;;  %v1682_v3 = vrot.slane %v1677_v49, 4  ;;  %v1689_v4 = vmul.f32 %v1677_v49, %v1677_v49  ;;  %v3146_v25 = vor.u32 %v3327_v61, %v3145_v60  ;;  %v3328_v0 = vld [vmem:[#allocation19 + $0xf4] sm:$0xf0]  ;;  %v3083_v61 = vld [vmem:[#allocation19 + $0x70] sm:$0xf0] }
 0x456   :  { %2469 = dma.vmem_to_hbm [thread:$0]  %s2465_s2, 128, %s2467_s23, [#allocation4]  }
 0x457   :  { %v1683_v2 = vadd.f32 %v1682_v3, %v1677_v49  ;;  %v1690_v5 = vrot.slane %v1689_v4, 4  ;;  %v2118_v6 = vmul.f32 %v3396_v63, %v2114_v1  ;;  %v3153_v63 = vld [vmem:[#allocation19 + $0xe8] sm:$0xf]  ;;  %2039 = vmatpush.bf16.msra.mxu1 %v3146_v25 }
 0x458   :  { %v3154_v3 = vor.u32 %v3328_v0, %v3153_v63  ;;  %v3312_v63 = vld [vmem:[#allocation19 + $0x74] sm:$0xf0]  ;;  %v3310_v0 = vld [vmem:[#allocation19 + $0x6c] sm:$0xf] }
 0x459   :  { %v1684_v7 = vrot.slane %v1683_v2, 2  ;;  %v1691_v8 = vadd.f32 %v1690_v5, %v1689_v4  ;;  %v2119_v11 = vmul.f32 -0.5, %v2118_v6  ;;  %v3326_v4 = vld [vmem:[#allocation19 + $0xec] sm:$0xf]  ;;  %v3323_v5 = vld [vmem:[#allocation19 + $0xcc] sm:$0xf0] }
 0x45a   :  { %v1599_v13 = vpop.f32.mrf.mxu2  ;;  %v1678_v15 = vpop.f32.mrf.mxu3  ;;  %2065 = vmatpush.bf16.msra.mxu3 %v3154_v3 }
 0x45b   :  { %v1685_v16 = vadd.f32 %v1684_v7, %v1683_v2  ;;  %v1692_v17 = vrot.slane %v1691_v8, 2  ;;  %v2120_v18 = vmul.f32 %v2119_v11, %v2118_v6  ;;  %v3158_v2 = vor.u32 %v3326_v4, %v3155_v35  ;;  %v3321_v6 = vld [vmem:[#allocation19 + $0xc4] sm:$0xf]  ;;  %v3137_v11 = vld [vmem:[#allocation19 + $0xc8] sm:$0xf] }
 0x45c   :  { %v3138_v15 = vor.u32 %v3324_v12, %v3137_v11  ;;  %v3067_v12 = vld [vmem:[#allocation19 + $0x50] sm:$0xf0] }
 0x45d   :  { %v1686_v20 = vrot.slane %v1685_v16, 1  ;;  %v1693_v21 = vadd.f32 %v1692_v17, %v1691_v8  ;;  %v2121_v22 = vsub.f32 %v2120_v18, %v2113_v47  ;;  %2078 = vmatpush.bf16.msrb.mxu0 %v3158_v2  ;;  %v3131_v8 = vld [vmem:[#allocation19 + $0xd0] sm:$0xf0]  ;;  %v3139_v17 = vld [vmem:[#allocation19 + $0xd8] sm:$0xf0] }
 0x45e   :  { %v3134_v13 = vor.u32 %v3321_v6, %v3131_v8  ;;  %v1735_v18 = vld [vmem:[#allocation2 + $0x61] ss:$0 sm:$0xff]  ;;  %2066 = vmatpush.bf16.msra.mxu3 %v3138_v15  ;;  %v3305_v6 = vld [vmem:[#allocation19 + $0x44] sm:$0xf] }
 0x45f   :  { %v1687_v23 = vadd.f32 %v1686_v20, %v1685_v16  ;;  %v1694_v24 = vrot.slane %v1693_v21, 1  ;;  %v3160_v26 = vadd.f32 -0.9189385, %v2121_v22  ;;  %v3322_v16 = vld [vmem:[#allocation19 + $0xcc] sm:$0xf]  ;;  %v3070_v15 = vor.u32 %v3305_v6, %v3067_v12 }
 0x460   :  { %v3142_v20 = vor.u32 %v3322_v16, %v3139_v17  ;;  %v3319_v22 = vld [vmem:[#allocation19 + $0xac] sm:$0xf0]  ;;  %v3308_v16 = vld [vmem:[#allocation19 + $0x54] sm:$0xf0]  ;;  %v3306_v17 = vld [vmem:[#allocation19 + $0x4c] sm:$0xf] }
 0x461   :  { %v1688_v27 = vmul.f32 %v1687_v23, %v3926_v37  ;;  %v1695_v28 = vadd.f32 %v1694_v24, %v1693_v21  ;;  %v2126_v29 = vsel %vm2123_vm10, %v3160_v26, 0.0  ;;  %v3113_v21 = vld [vmem:[#allocation19 + $0xa0] sm:$0xf]  ;;  %v3115_v24 = vld [vmem:[#allocation19 + $0xb0] sm:$0xf0]  ;;  %vm2390_vm10 = vcmask 7168  }
 0x462   :  { %2127 = vadd.xlane.f32.xlu1 %v2126_v29  ;;  %2079 = vmatpush.bf16.msrb.mxu0 %v3142_v20  ;;  %v3114_v23 = vor.u32 %v3319_v22, %v3113_v21  ;;  %v3121_v26 = vld [vmem:[#allocation19 + $0xa8] sm:$0xf] }
 0x463   :  { %v1696_v30 = vmul.f32 %v1695_v28, %v3926_v37  ;;  %v1697_v31 = vmul.f32 %v1688_v27, %v1688_v27  ;;  %v1700_v44 = vsub.f32 %v1677_v49, %v1688_v27  ;;  %v3147_v49 = vld [vmem:[#allocation19 + $0xf0] sm:$0xf0]  ;;  %v3118_v28 = vor.u32 %v3317_v10, %v3115_v24  ;;  %v3303_v24 = vld [vmem:[#allocation19 + $0x2c] sm:$0xf0] }
 0x464   :  { %v3150_v1 = vor.u32 %v3325_v62, %v3147_v49  ;;  %v3122_v29 = vor.u32 %v3320_v43, %v3121_v26  ;;  %v3089_v62 = vld [vmem:[#allocation19 + $0x68] sm:$0xf]  ;;  %v3301_v43 = vld [vmem:[#allocation19 + $0x24] sm:$0xf] }
 0x465   :  { %v1698_v19 = vsub.f32 %v1696_v30, %v1697_v31  ;;  %v3318_v30 = vld [vmem:[#allocation19 + $0xac] sm:$0xf]  ;;  %v3123_v31 = vld [vmem:[#allocation19 + $0xb8] sm:$0xf0]  ;;  %v3090_v35 = vor.u32 %v3312_v63, %v3089_v62 }
 0x466   :  { %2052 = vmatpush.bf16.msra.mxu2 %v3150_v1  ;;  %2067 = vmatpush.bf16.msra.mxu3 %v3122_v29  ;;  %v3091_v1 = vld [vmem:[#allocation19 + $0x78] sm:$0xf0] }
 0x467   :  { %v1699_v33 = vmax.f32 %v1698_v19, 0.0  ;;  %v3126_v19 = vor.u32 %v3318_v30, %v3123_v31  ;;  %v3094_v2 = vor.u32 %v3310_v0, %v3091_v1  ;;  %v1797_v1 = vld [vmem:[#allocation2 + $0x62] ss:$0 sm:$0xff] }
 0x469   :  { %v1701_v34 = vadd.f32 1e-05, %v1699_v33  ;;  %v3097_v33 = vld [vmem:[#allocation19 + $0x80] sm:$0xf]  ;;  %2080 = vmatpush.bf16.msrb.mxu0 %v3126_v19  ;;  %v3304_v19 = vld [vmem:[#allocation19 + $0x34] sm:$0xf0] }
 0x46a   :  { %2053 = vmatpush.bf16.msra.mxu2 %v3134_v13  ;;  %v3073_v13 = vld [vmem:[#allocation19 + $0x48] sm:$0xf] }
 0x46b   :  { %3397 = vrsqrt.f32 %v1701_v34  ;;  %vm1708_vm12 = vweird.f32 %v1701_v34  ;;  %v3074_v22 = vor.u32 %v3308_v16, %v3073_v13 }
 0x46e   :  { %2054 = vmatpush.bf16.msra.mxu2 %v3118_v28  ;;  %v3057_v28 = vld [vmem:[#allocation19 + $0x28] sm:$0xf] }
 0x471   :  { %v3398_v36 = vpop.eup %3397 }
 0x472   :  { %v1703_v38 = vmul.f32 %v3398_v36, %v1701_v34  ;;  %vm1709_vm11 = vweird.f32 %v3398_v36  ;;  %v3315_v34 = vld [vmem:[#allocation19 + $0x8c] sm:$0xf0] }
 0x473   :  { %vm1710_vm13 = vmor %vm1708_vm12, %vm1709_vm11  ;;  %vm2437_vm11 = vcmp.eq.s32.totalorder %v4213_v40, 0  ;;  %vm2439_vm12 = vcmp.eq.s32.totalorder %v4213_v40, 1 }
 0x474   :  { %v1704_v9 = vmul.f32 %v3398_v36, %v1703_v38 }
 0x476   :  { %v1705_v39 = vmul.f32 0.5, %v1704_v9 }
 0x478   :  { %v1706_v41 = vsub.f32 1.5, %v1705_v39  ;;  %v3098_v39 = vor.u32 %v3315_v34, %v3097_v33  ;;  %v3302_v33 = vld [vmem:[#allocation19 + $0x2c] sm:$0xf]  ;;  %v3059_v34 = vld [vmem:[#allocation19 + $0x38] sm:$0xf0] }
 0x47a   :  { %v1707_v42 = vmul.f32 %v3398_v36, %v1706_v41  ;;  %v3099_v41 = vld [vmem:[#allocation19 + $0x90] sm:$0xf0] }
 0x47c   :  { %v1711_v46 = vsel %vm1710_vm13, %v3398_v36, %v1707_v42  ;;  %v3313_v36 = vld [vmem:[#allocation19 + $0x84] sm:$0xf]  ;;  %v3105_v42 = vld [vmem:[#allocation19 + $0x88] sm:$0xf]  ;;  %vm2447_vm13 = vcmp.eq.s32.totalorder %v4213_v40, 2 }
 0x47d   :  { %v1712_v47 = vmul.f32 %v1711_v46, %v1700_v44  ;;  %v3102_v44 = vor.u32 %v3313_v36, %v3099_v41  ;;  %v3314_v46 = vld [vmem:[#allocation19 + $0x8c] sm:$0xf]  ;;  %v3058_v36 = vor.u32 %v3304_v19, %v3057_v28  ;;  %v3297_v41 = vld [vmem:[#allocation19 + $0x4] sm:$0xf] }
 0x47f   :  { %v1713_v50 = vmul.f32 %v1712_v47, %v1680_v45  ;;  %v3316_v45 = vld [vmem:[#allocation19 + $0x94] sm:$0xf0]  ;;  %v3107_v47 = vld [vmem:[#allocation19 + $0x98] sm:$0xf0]  ;;  %2055 = vmatpush.bf16.msra.mxu2 %v3102_v44 }
 0x481   :  { %v1714_v51 = vadd.f32 %v1713_v50, %v1681_v48 }
 0x483   :  { %vm1715_vm14 = vcmp.gt.f32.partialorder %v1714_v51, 0.0  ;;  %v1716_v53 = vmul.f32 0.01, %v1714_v51 }
 0x485   :  { %v1717_v54 = vsel %vm1715_vm14, %v1714_v51, %v1716_v53  ;;  %v3106_v51 = vor.u32 %v3316_v45, %v3105_v42  ;;  %v3110_v53 = vor.u32 %v3314_v46, %v3107_v47  ;;  %v3035_v46 = vld [vmem:[#allocation19 + $0x10] sm:$0xf0]  ;;  %v3041_v47 = vld [vmem:[#allocation19 + $0x8] sm:$0xf]  ;;  %vm2450_vm14 = vcmp.eq.s32.totalorder %v4213_v40, 3 }
 0x486   :  { %v1734_v55 = vpack.c.bf16 %v1717_v54, %v1717_v54  ;;  %v3081_v54 = vld [vmem:[#allocation19 + $0x60] sm:$0xf] }
 0x487   :  { %2068 = vmatpush.bf16.msra.mxu3 %v3106_v51  ;;  %2081 = vmatpush.bf16.msrb.mxu0 %v3110_v53  ;;  %v3298_v51 = vld [vmem:[#allocation19 + $0xc] sm:$0xf]  ;;  %v3043_v53 = vld [vmem:[#allocation19 + $0x18] sm:$0xf0] }
 0x488   :  { %1792 = vmatmul.bf16.vlgmr.msra.gmra.mxu0 %v1734_v55  ;;  %v3311_v55 = vld [vmem:[#allocation19 + $0x6c] sm:$0xf0] }
 0x489   :  { %v3082_v60 = vor.u32 %v3311_v55, %v3081_v54 }
 0x48b   :  { %2069 = vmatpush.bf16.msra.mxu3 %v3090_v35  ;;  %2082 = vmatpush.bf16.msrb.mxu0 %v3094_v2  ;;  %v1798_v35 = vld [vmem:[#allocation2 + $0x63] ss:$0 sm:$0xff] }
 0x48f   :  { %2070 = vmatpush.bf16.msra.mxu3 %v3074_v22 }
 0x493   :  { %2071 = vmatpush.bf16.msra.mxu3 %v3058_v36 }
 0x4b9   :  { %v1265_v56 = vpop.xlane.xlu0 %1264 }
 0x4ba   :  { %v1266_v57 = vsub.f32 %v4221_v52, %v1265_v56  ;;  %v3129_v52 = vld [vmem:[#allocation19 + $0xc0] sm:$0xf]  ;;  %v3309_v56 = vld [vmem:[#allocation19 + $0x64] sm:$0xf] }
 0x4bb   :  { %v3130_v7 = vor.u32 %v3323_v5, %v3129_v52  ;;  %v3086_v49 = vor.u32 %v3309_v56, %v3083_v61  ;;  %v3065_v52 = vld [vmem:[#allocation19 + $0x40] sm:$0xf]  ;;  %v3307_v5 = vld [vmem:[#allocation19 + $0x4c] sm:$0xf0]  ;;  %v3046_v56 = vor.u32 %v3298_v51, %v3043_v53 }
 0x4bc   :  { %v1267_v58 = vmul.f32 1.442695, %v1266_v57  ;;  %v3066_v11 = vor.u32 %v3307_v5, %v3065_v52  ;;  %v4275_v51 = vld [vmem:[%s4390_s14 + $0x10] sm:$0xff] }
 0x4bd   :  { %2040 = vmatpush.bf16.msra.mxu1 %v3130_v7  ;;  %2056 = vmatpush.bf16.msra.mxu2 %v3086_v49 }
 0x4be   :  { %3399 = vpow2.f32 %v1267_v58 }
 0x4c1   :  { %2041 = vmatpush.bf16.msra.mxu1 %v3114_v23  ;;  %v3049_v23 = vld [vmem:[#allocation19 + $0x20] sm:$0xf]  ;;  %2057 = vmatpush.bf16.msra.mxu2 %v3070_v15 }
 0x4c2   :  { %v3050_v26 = vor.u32 %v3303_v24, %v3049_v23  ;;  %v1869_v24 = vld [vmem:[#allocation2 + $0x64] ss:$8 sm:$0xf] }
 0x4c4   :  { %v4231_v59 = vpop.eup %3399 }
 0x4c5   :  { %1269 = vadd.xlane.f32.xlu0 %v4231_v59  ;;  %2042 = vmatpush.bf16.msra.mxu1 %v3098_v39  ;;  %v3299_v39 = vld [vmem:[#allocation19 + $0xc] sm:$0xf0] }
 0x4c9   :  { %2043 = vmatpush.bf16.msra.mxu1 %v3082_v60 }
 0x4cd   :  { %2044 = vmatpush.bf16.msra.mxu1 %v3066_v11 }
 0x4d1   :  { %2045 = vmatpush.bf16.msra.mxu1 %v3050_v26  ;;  %v1871_v26 = vperm.slane %v1869_v24, 0 }
 0x505   :  { %v1793_v27 = vpop.f32.mrf.mxu0 }
 0x506   :  { %v4234_v32 = vadd.f32 %v1793_v27, %v1735_v18  ;;  %v3075_v18 = vld [vmem:[#allocation19 + $0x58] sm:$0xf0]  ;;  %v3051_v27 = vld [vmem:[#allocation19 + $0x30] sm:$0xf0] }
 0x507   :  { %v3078_v10 = vor.u32 %v3306_v17, %v3075_v18  ;;  %v3054_v31 = vor.u32 %v3301_v43, %v3051_v27 }
 0x508   :  { %v1799_v38 = vrot.slane %v4234_v32, 4  ;;  %v1806_v9 = vmul.f32 %v4234_v32, %v4234_v32 }
 0x509   :  { %2083 = vmatpush.bf16.msrb.mxu0 %v3078_v10  ;;  %2058 = vmatpush.bf16.msra.mxu2 %v3054_v31 }
 0x50a   :  { %v1800_v48 = vadd.f32 %v1799_v38, %v4234_v32  ;;  %v1807_v50 = vrot.slane %v1806_v9, 4  ;;  %v3062_v38 = vor.u32 %v3302_v33, %v3059_v34 }
 0x50c   :  { %v1801_v57 = vrot.slane %v1800_v48, 2  ;;  %v1808_v58 = vadd.f32 %v1807_v50, %v1806_v9  ;;  %v3033_v9 = vld [vmem:[#allocation19] sm:$0xf]  ;;  %v3038_v50 = vor.u32 %v3297_v41, %v3035_v46 }
 0x50d   :  { %v1795_v25 = vpop.f32.mrf.mxu0  ;;  %v3034_v45 = vor.u32 %v3299_v39, %v3033_v9  ;;  %2084 = vmatpush.bf16.msrb.mxu0 %v3062_v38 }
 0x50e   :  { %v1802_v3 = vadd.f32 %v1801_v57, %v1800_v48  ;;  %v1809_v4 = vrot.slane %v1808_v58, 2  ;;  %v3300_v48 = vld [vmem:[#allocation19 + $0x14] sm:$0xf0]  ;;  %2059 = vmatpush.bf16.msra.mxu2 %v3038_v50 }
 0x50f   :  { %v3042_v55 = vor.u32 %v3300_v48, %v3041_v47  ;;  %2046 = vmatpush.bf16.msra.mxu1 %v3034_v45  ;;  %v1872_v45 = vperm.slane %v1869_v24, 1  ;;  %v4267_v48 = vld [vmem:[%s4390_s14 + $0x18] sm:$0xff] }
 0x510   :  { %v1803_v7 = vrot.slane %v1802_v3, 1  ;;  %v1810_v8 = vadd.f32 %v1809_v4, %v1808_v58  ;;  %v2137_v50 = vmul.f32 1.442695, %v4267_v48 }
 0x511   :  { %2072 = vmatpush.bf16.msra.mxu3 %v3042_v55  ;;  %2085 = vmatpush.bf16.msrb.mxu0 %v3046_v56 }
 0x512   :  { %v1804_v20 = vadd.f32 %v1803_v7, %v1802_v3  ;;  %v1811_v21 = vrot.slane %v1810_v8, 1 }
 0x514   :  { %v1805_v29 = vmul.f32 %v1804_v20, %v3926_v37  ;;  %v1812_v30 = vadd.f32 %v1811_v21, %v1810_v8 }
 0x516   :  { %v1813_v42 = vmul.f32 %v1812_v30, %v3926_v37  ;;  %v1814_v44 = vmul.f32 %v1805_v29, %v1805_v29  ;;  %v1817_v0 = vsub.f32 %v4234_v32, %v1805_v29  ;;  %v1874_v29 = vperm.slane %v1869_v24, 3 }
 0x518   :  { %v1815_v54 = vsub.f32 %v1813_v42, %v1814_v44 }
 0x51a   :  { %v1816_v57 = vmax.f32 %v1815_v54, 0.0 }
 0x51c   :  { %v1818_v58 = vadd.f32 1e-05, %v1816_v57 }
 0x51e   :  { %3401 = vrsqrt.f32 %v1818_v58  ;;  %vm1825_vm0 = vweird.f32 %v1818_v58 }
 0x524   :  { %v3402_v60 = vpop.eup %3401 }
 0x525   :  { %v1820_v61 = vmul.f32 %v3402_v60, %v1818_v58  ;;  %vm1826_vm15 = vweird.f32 %v3402_v60 }
 0x526   :  { %vm1827_vm1 = vmor %vm1825_vm0, %vm1826_vm15  ;;  %vm2453_vm15 = vcmp.eq.s32.totalorder %v4213_v40, 4 }
 0x527   :  { %v1821_v62 = vmul.f32 %v3402_v60, %v1820_v61 }
 0x529   :  { %v1822_v25 = vmul.f32 0.5, %v1821_v62 }
 0x52b   :  { %v1823_v49 = vsub.f32 1.5, %v1822_v25 }
 0x52d   :  { %v1824_v63 = vmul.f32 %v3402_v60, %v1823_v49 }
 0x52f   :  { %v1828_v3 = vsel %vm1827_vm1, %v3402_v60, %v1824_v63 }
 0x530   :  { %v1829_v4 = vmul.f32 %v1828_v3, %v1817_v0 }
 0x532   :  { %v1830_v2 = vmul.f32 %v1829_v4, %v1797_v1 }
 0x534   :  { %v1831_v52 = vadd.f32 %v1830_v2, %v1798_v35 }
 0x536   :  { %vm1832_vm2 = vcmp.gt.f32.partialorder %v1831_v52, 0.0  ;;  %v1833_v5 = vmul.f32 0.01, %v1831_v52 }
 0x538   :  { %v1270_v6 = vpop.xlane.xlu0 %1269  ;;  %v1834_v7 = vsel %vm1832_vm2, %v1831_v52, %v1833_v5 }
 0x539   :  { %3403 = vrcp.f32 %v1270_v6  ;;  %v1867_v8 = vpack.c.bf16 %v1834_v7, %v1834_v7  ;;  %v1282_v13 = vand.u32 2147483648, %v1270_v6  ;;  %v1280_v16 = vand.u32 2147483647, %v1270_v6 }
 0x53a   :  { %vm1276_vm4 = vweird.f32 %v1270_v6 }
 0x53b   :  { %2047 = vmatmul.bf16.vlgmr.msra.gmra.mxu1 %v1867_v8  ;;  %2060 = vmatmul.bf16.vlgmr.msra.gmra.mxu2 %v1867_v8  ;;  %v1283_v18 = vor.u32 1.1754944e-38, %v1282_v13  ;;  %vm1281_vm6 = vcmp.eq.f32.partialorder %v1280_v16, 8.507059e+37 }
 0x53c   :  { %2073 = vmatmul.bf16.vlgmr.msra.gmra.mxu3 %v1867_v8  ;;  %2086 = vmatmul.bf16.vlgmr.msrb.gmra.mxu0 %v1867_v8 }
 0x53f   :  { %v3404_v11 = vpop.eup %3403 }
 0x540   :  { %v1272_v12 = vmul.f32 %v3404_v11, %v1270_v6  ;;  %vm1277_vm3 = vweird.f32 %v3404_v11 }
 0x541   :  { %vm1278_vm5 = vmor %vm1276_vm4, %vm1277_vm3 }
 0x542   :  { %v1273_v32 = vsub.f32 1.0, %v1272_v12  ;;  %v4299_v12 = vpop.xlane.xlu1 %2127 }
 0x544   :  { %v1274_v15 = vmul.f32 %v3404_v11, %v1273_v32 }
 0x546   :  { %v1275_v17 = vadd.f32 %v3404_v11, %v1274_v15 }
 0x548   :  { %v1279_v20 = vsel %vm1278_vm5, %v3404_v11, %v1275_v17 }
 0x549   :  { %v1284_v21 = vsel %vm1281_vm6, %v1283_v18, %v1279_v20 }
 0x54a   :  { %v1285_v22 = vmul.f32 %v4231_v59, %v1284_v21  ;;  %v1873_v59 = vperm.slane %v1869_v24, 2 }
 0x54c   :  { %v1286_v10 = vadd.f32 1e-09, %v1285_v22 }
 0x54e   :  { %v4246_v23 = vsel %vm1260_vm9, %v1286_v10, 0.0 }
 0x54f   :  { %1288 = vst [vmem:[%s4390_s14 + $0x30] sm:$0xff] %v4246_v23  ;;  %s3740_s14 = smov 127   ;;  %vm2425_vm8 = vcmp.gt.f32.partialorder %v4246_v23, 0.5 }
 0x5b8   :  { %v2048_v43 = vpop.f32.mrf.mxu1 }
 0x5b9   :  { %v2049_v27 = vadd.f32 %v2048_v43, %v1871_v26  ;;  %v2087_v28 = vpop.f32.mrf.mxu0 }
 0x5ba   :  { %v2088_v34 = vadd.f32 %v2087_v28, %v1874_v29 }
 0x5bb   :  { %2157 = vrot.lane.b32.xlu2 %v2049_v27, %s3736_s10  ;;  %2185 = vrot.lane.b32.xlu1 %v2049_v27, %s3737_s28  ;;  %v2139_v58 = vsub.f32 %v4275_v51, %v2049_v27 }
 0x5bc   :  { %2289 = vrot.lane.b32.xlu0 %v2049_v27, %s3725_s6  ;;  %v2344_v44 = vsub.f32 0.0, %v2088_v34 }
 0x5bd   :  { %v2140_v61 = vmul.f32 %v2139_v58, %v2139_v58 }
 0x5be   :  { %v2061_v30 = vpop.f32.mrf.mxu2  ;;  %v2345_v46 = vmul.f32 1.442695, %v2344_v44 }
 0x5bf   :  { %v2074_v31 = vpop.f32.mrf.mxu3  ;;  %v2062_v47 = vadd.f32 %v2061_v30, %v1872_v45 }
 0x5c0   :  { %v2075_v19 = vadd.f32 %v2074_v31, %v1873_v59  ;;  %v2050_v33 = vpop.f32.mrf.mxu1 }
 0x5c1   :  { %v2089_v36 = vpop.f32.mrf.mxu0  ;;  %v2341_v53 = vsub.f32 %v4275_v51, %v2062_v47 }
 0x5c2   :  { %v2142_v38 = vsub.f32 0.0, %v2075_v19 }
 0x5c3   :  { %2211 = vrot.lane.b32.xlu2 %v2049_v27, %s3738_s5  ;;  %2375 = vrot.lane.b32.xlu1 %v2088_v34, %s3736_s10  ;;  %v2342_v54 = vmul.f32 %v2341_v53, %v2341_v53 }
 0x5c4   :  { %v2143_v9 = vmul.f32 1.442695, %v2142_v38  ;;  %2170 = vrot.lane.b32.xlu0 %v2075_v19, %s3736_s10 }
 0x5c6   :  { %3405 = vpow2.f32 %v2143_v9  ;;  %v2063_v39 = vpop.f32.mrf.mxu2 }
 0x5c7   :  { %v2076_v41 = vpop.f32.mrf.mxu3  ;;  %3407 = vpow2.f32 %v2345_v46 }
 0x5c8   :  { %3409 = vpow2.f32 %v2137_v50 }
 0x5cb   :  { %2237 = vrot.lane.b32.xlu2 %v2049_v27, %s3717_s29 }
 0x5cc   :  { %v3406_v42 = vpop.eup %3405  ;;  %2248 = vrot.lane.b32.xlu0 %v2075_v19, %s3717_s29 }
 0x5cd   :  { %2217 = vrot.lane.b32.xlu1 %v3406_v42, %s3738_s5  ;;  %v3408_v55 = vpop.eup %3407 }
 0x5ce   :  { %v4280_v56 = vpop.eup %3409 }
 0x5cf   :  { %v2343_v57 = vadd.f32 %v4280_v56, %v2342_v54  ;;  %v2141_v25 = vadd.f32 %v4280_v56, %v2140_v61 }
 0x5d1   :  { %v2347_v60 = vmul.f32 %v3408_v55, %v2343_v57  ;;  %v2145_v63 = vmul.f32 %v3406_v42, %v2141_v25 }
 0x5d3   :  { %2263 = vrot.lane.b32.xlu2 %v2049_v27, %s3739_s4  ;;  %v2348_v62 = vadd.f32 -1.0, %v2347_v60  ;;  %v2146_v1 = vadd.f32 -1.0, %v2145_v63 }
 0x5d4   :  { %2274 = vrot.lane.b32.xlu0 %v2075_v19, %s3739_s4 }
 0x5d5   :  { %2295 = vrot.lane.b32.xlu1 %v3406_v42, %s3725_s6  ;;  %v2349_v49 = vadd.f32 %v2348_v62, %v2088_v34  ;;  %v2147_v4 = vadd.f32 %v2146_v1, %v2075_v19 }
 0x5d7   :  { %v2350_v0 = vsub.f32 %v2349_v49, %v4267_v48  ;;  %v2148_v2 = vsub.f32 %v2147_v4, %v4267_v48 }
 0x5d9   :  { %v2351_v3 = vmul.f32 0.5, %v2350_v0  ;;  %v2149_v52 = vmul.f32 0.5, %v2148_v2 }
 0x5db   :  { %2315 = vrot.lane.b32.xlu2 %v2049_v27, %s3734_s8  ;;  %v2352_v35 = vsel %vm2150_vm7, %v2351_v3, 0.0  ;;  %v2151_v5 = vsel %vm2150_vm7, %v2149_v52, 0.0 }
 0x5dc   :  { %2300 = vrot.lane.b32.xlu0 %v2075_v19, %s3725_s6  ;;  %s3742_s6 = smov 125  }
 0x5e3   :  { %2196 = vrot.lane.b32.xlu2 %v2075_v19, %s3737_s28 }
 0x5e4   :  { %2369 = vrot.lane.b32.xlu0 %v3408_v55, %s3736_s10 }
 0x5eb   :  { %2222 = vrot.lane.b32.xlu2 %v2075_v19, %s3738_s5 }
 0x5f3   :  { %2362 = vrot.lane.b32.xlu2 %v2062_v47, %s3736_s10 }
 0x5fb   :  { %2326 = vrot.lane.b32.xlu2 %v2075_v19, %s3734_s8 }
 0x5ff   :  { %2353 = vadd.xlane.f32.xlu1 %v2352_v35 }
 0x603   :  { %2164 = vrot.lane.b32.xlu2 %v3406_v42, %s3736_s10 }
 0x607   :  { %2152 = vadd.xlane.f32.xlu1 %v2151_v5 }
 0x60b   :  { %2191 = vrot.lane.b32.xlu2 %v3406_v42, %s3737_s28 }
 0x613   :  { %2243 = vrot.lane.b32.xlu2 %v3406_v42, %s3717_s29  ;;  %s3741_s29 = smov 126  }
 0x615   :  { %v2158_v6 = vpop.permute.xlu2 %2157 }
 0x616   :  { %v2160_v29 = vsub.f32 %v4275_v51, %v2158_v6 }
 0x618   :  { %v2161_v39 = vmul.f32 %v2160_v29, %v2160_v29 }
 0x61a   :  { %v2162_v50 = vadd.f32 %v4280_v56, %v2161_v39 }
 0x61b   :  { %2269 = vrot.lane.b32.xlu2 %v3406_v42, %s3739_s4 }
 0x61d   :  { %v2212_v7 = vpop.permute.xlu2 %2211 }
 0x61e   :  { %v2214_v30 = vsub.f32 %v4275_v51, %v2212_v7 }
 0x620   :  { %v2215_v41 = vmul.f32 %v2214_v30, %v2214_v30 }
 0x622   :  { %v2216_v47 = vadd.f32 %v4280_v56, %v2215_v41 }
 0x623   :  { %2321 = vrot.lane.b32.xlu2 %v3406_v42, %s3734_s8  ;;  %s3743_s8 = smov 124  }
 0x625   :  { %v2238_v8 = vpop.permute.xlu2 %2237 }
 0x626   :  { %v2240_v1 = vsub.f32 %v4275_v51, %v2238_v8 }
 0x628   :  { %v2241_v7 = vmul.f32 %v2240_v1, %v2240_v1 }
 0x62d   :  { %v4297_v11 = vpop.permute.xlu2 %2263  ;;  %v2186_v15 = vpop.permute.xlu1 %2185 }
 0x62e   :  { %v2290_v32 = vpop.permute.xlu0 %2289  ;;  %v2188_v46 = vsub.f32 %v4275_v51, %v2186_v15  ;;  %v2266_v8 = vsub.f32 %v4275_v51, %v4297_v11 }
 0x62f   :  { %v2292_v24 = vsub.f32 %v4275_v51, %v2290_v32 }
 0x630   :  { %v2189_v61 = vmul.f32 %v2188_v46, %v2188_v46 }
 0x631   :  { %v2293_v28 = vmul.f32 %v2292_v24, %v2292_v24 }
 0x632   :  { %v2190_v4 = vadd.f32 %v4280_v56, %v2189_v61 }
 0x633   :  { %v2294_v19 = vadd.f32 %v4280_v56, %v2293_v28 }
 0x635   :  { %v4301_v13 = vpop.permute.xlu2 %2315  ;;  %v2376_v20 = vpop.permute.xlu1 %2375 }
 0x636   :  { %v2171_v16 = vpop.permute.xlu0 %2170  ;;  %v2318_v11 = vsub.f32 %v4275_v51, %v4301_v13 }
 0x638   :  { %v2319_v39 = vmul.f32 %v2318_v11, %v2318_v11 }
 0x63d   :  { %v2197_v17 = vpop.permute.xlu2 %2196 }
 0x63e   :  { %v4303_v18 = vpop.permute.xlu0 %2248 }
 0x63f   :  { %v2218_v10 = vpop.permute.xlu1 %2217 }
 0x640   :  { %v2220_v57 = vmul.f32 %v2218_v10, %v2216_v47 }
 0x642   :  { %v2221_v63 = vadd.f32 -1.0, %v2220_v57 }
 0x645   :  { %v2223_v21 = vpop.permute.xlu2 %2222 }
 0x646   :  { %v4305_v22 = vpop.permute.xlu0 %2274  ;;  %v2225_v3 = vadd.f32 %v2223_v21, %v2221_v63  ;;  %v2242_v21 = vadd.f32 %v4280_v56, %v2241_v7 }
 0x647   :  { %v2296_v31 = vpop.permute.xlu1 %2295 }
 0x648   :  { %v2298_v38 = vmul.f32 %v2296_v31, %v2294_v19  ;;  %v2226_v32 = vsub.f32 %v2225_v3, %v4267_v48 }
 0x64a   :  { %v2299_v44 = vadd.f32 -1.0, %v2298_v38 }
 0x64d   :  { %v2363_v26 = vpop.permute.xlu2 %2362 }
 0x64e   :  { %v2365_v43 = vsub.f32 %v4275_v51, %v2363_v26  ;;  %v2301_v27 = vpop.permute.xlu0 %2300  ;;  %v2227_v26 = vmul.f32 0.5, %v2226_v32 }
 0x64f   :  { %v2303_v53 = vadd.f32 %v2301_v27, %v2299_v44 }
 0x650   :  { %v2366_v59 = vmul.f32 %v2365_v43, %v2365_v43  ;;  %v2228_v31 = vsel %vm2150_vm7, %v2227_v26, 0.0 }
 0x651   :  { %v2304_v25 = vsub.f32 %v2303_v53, %v4267_v48 }
 0x652   :  { %v2367_v34 = vadd.f32 %v4280_v56, %v2366_v59  ;;  %v2267_v59 = vmul.f32 %v2266_v8, %v2266_v8 }
 0x653   :  { %v2305_v52 = vmul.f32 0.5, %v2304_v25 }
 0x654   :  { %v2268_v19 = vadd.f32 %v4280_v56, %v2267_v59  ;;  %v3750_v59 = vmov 0  }
 0x655   :  { %v4312_v33 = vpop.permute.xlu2 %2326  ;;  %3365 = vset.pattern.permute.xlu2 %v3750_v59  ;;  %3366 = vset.pattern.permute.xlu0 %v3750_v59 }
 0x656   :  { %v2370_v36 = vpop.permute.xlu0 %2369 }
 0x657   :  { %v2372_v9 = vmul.f32 %v2370_v36, %v2367_v34 }
 0x659   :  { %v2373_v42 = vadd.f32 -1.0, %v2372_v9 }
 0x65b   :  { %v2378_v45 = vadd.f32 %v2376_v20, %v2373_v42 }
 0x65d   :  { %v2165_v54 = vpop.permute.xlu2 %2164  ;;  %v2379_v55 = vsub.f32 %v2378_v45, %v4267_v48  ;;  %v2320_v45 = vadd.f32 %v4280_v56, %v2319_v39 }
 0x65e   :  { %v2167_v58 = vmul.f32 %v2165_v54, %v2162_v50 }
 0x65f   :  { %v2380_v60 = vmul.f32 0.5, %v2379_v55 }
 0x660   :  { %v2168_v62 = vadd.f32 -1.0, %v2167_v58 }
 0x661   :  { %v2381_v49 = vsel %vm2150_vm7, %v2380_v60, 0.0 }
 0x662   :  { %v2173_v0 = vadd.f32 %v2171_v16, %v2168_v62  ;;  %2382 = vadd.xlane.f32.xlu2 %v2381_v49  ;;  %v2306_v16 = vsel %vm2150_vm7, %v2305_v52, 0.0 }
 0x664   :  { %v2174_v35 = vsub.f32 %v2173_v0, %v4267_v48 }
 0x665   :  { %v2192_v2 = vpop.permute.xlu2 %2191 }
 0x666   :  { %v2194_v5 = vmul.f32 %v2192_v2, %v2190_v4  ;;  %v2175_v6 = vmul.f32 0.5, %v2174_v35 }
 0x668   :  { %v2195_v15 = vadd.f32 -1.0, %v2194_v5  ;;  %v2176_v20 = vsel %vm2150_vm7, %v2175_v6, 0.0  ;;  %v3749_v6 = vmov 0.0  }
 0x669   :  { %2177 = vadd.xlane.f32.xlu1 %v2176_v20  ;;  %v2426_v7 = vsel %vm2425_vm8, 1.0, %v3749_v6 }
 0x66a   :  { %v2199_v10 = vadd.f32 %v2197_v17, %v2195_v15  ;;  %2307 = vadd.xlane.f32.xlu2 %v2306_v16  ;;  %v2427_v32 = vrot.slane %v2426_v7, 4  ;;  %v2405_v16 = vmul.f32 -0.5, %v4155_v14 }
 0x66c   :  { %v2200_v24 = vsub.f32 %v2199_v10, %v4267_v48  ;;  %v2428_v15 = vadd.f32 %v2427_v32, %v2426_v7 }
 0x66d   :  { %v2244_v43 = vpop.permute.xlu2 %2243 }
 0x66e   :  { %v2246_v27 = vmul.f32 %v2244_v43, %v2242_v21  ;;  %v2201_v28 = vmul.f32 0.5, %v2200_v24  ;;  %v2429_v20 = vrot.slane %v2428_v15, 2 }
 0x670   :  { %v2247_v29 = vadd.f32 -1.0, %v2246_v27  ;;  %v2202_v30 = vsel %vm2150_vm7, %v2201_v28, 0.0  ;;  %v2430_v10 = vadd.f32 %v2429_v20, %v2428_v15 }
 0x671   :  { %2203 = vadd.xlane.f32.xlu0 %v2202_v30  ;;  %2229 = vadd.xlane.f32.xlu1 %v2228_v31 }
 0x672   :  { %v2251_v17 = vadd.f32 %v4303_v18, %v2247_v29  ;;  %v2431_v8 = vrot.slane %v2430_v10, 1 }
 0x674   :  { %v2252_v34 = vsub.f32 %v2251_v17, %v4267_v48  ;;  %v2432_v21 = vadd.f32 %v2431_v8, %v2430_v10 }
 0x675   :  { %v2270_v36 = vpop.permute.xlu2 %2269 }
 0x676   :  { %v2272_v38 = vmul.f32 %v2270_v36, %v2268_v19  ;;  %v2253_v9 = vmul.f32 0.5, %v2252_v34  ;;  %vm2433_vm9 = vcmp.gt.f32.partialorder %v2432_v21, 0.0 }
 0x677   :  { %v2434_v24 = vsel %vm2433_vm9, 1.0, %v3749_v6 }
 0x678   :  { %v2273_v41 = vadd.f32 -1.0, %v2272_v38  ;;  %v2254_v42 = vsel %vm2150_vm7, %v2253_v9, 0.0 }
 0x679   :  { %2255 = vadd.xlane.f32.xlu0 %v2254_v42 }
 0x67a   :  { %v2277_v44 = vadd.f32 %v4305_v22, %v2273_v41  ;;  %v2354_v22 = vpop.xlane.xlu1 %2353 }
 0x67b   :  { %v2355_v2 = vmul.f32 %v2354_v22, %v4246_v23 }
 0x67c   :  { %v2278_v18 = vsub.f32 %v2277_v44, %v4267_v48 }
 0x67d   :  { %v2322_v46 = vpop.permute.xlu2 %2321 }
 0x67e   :  { %v2324_v51 = vmul.f32 %v2322_v46, %v2320_v45  ;;  %v2279_v13 = vmul.f32 0.5, %v2278_v18 }
 0x680   :  { %v2325_v47 = vadd.f32 -1.0, %v2324_v51  ;;  %v2280_v50 = vsel %vm2150_vm7, %v2279_v13, 0.0 }
 0x681   :  { %2281 = vadd.xlane.f32.xlu1 %v2280_v50 }
 0x682   :  { %v2329_v53 = vadd.f32 %v4312_v33, %v2325_v47  ;;  %v2153_v58 = vpop.xlane.xlu1 %2152 }
 0x683   :  { %v2154_v27 = vmul.f32 %v2153_v58, %v4246_v23 }
 0x684   :  { %v2330_v54 = vsub.f32 %v2329_v53, %v4267_v48  ;;  %v2129_v53 = vrot.slane %v4299_v12, 4 }
 0x686   :  { %v2331_v55 = vmul.f32 0.5, %v2330_v54 }
 0x688   :  { %v2332_v57 = vsel %vm2150_vm7, %v2331_v55, 0.0 }
 0x689   :  { %2333 = vadd.xlane.f32.xlu0 %v2332_v57  ;;  %v2130_v57 = vadd.f32 %v2129_v53, %v4299_v12 }
 0x6d5   :  { %v2383_v25 = vpop.xlane.xlu2 %2382 }
 0x6d6   :  { %v2384_v5 = vmul.f32 %v2383_v25, %v4246_v23 }
 0x6dc   :  { %v2178_v56 = vpop.xlane.xlu1 %2177 }
 0x6dd   :  { %v2179_v60 = vmul.f32 %v2178_v56, %v4246_v23  ;;  %v2308_v0 = vpop.xlane.xlu2 %2307  ;;  %v2131_v56 = vrot.slane %v2130_v57, 2 }
 0x6de   :  { %v2309_v3 = vmul.f32 %v2308_v0, %v4246_v23 }
 0x6df   :  { %2181 = vrot.lane.b32.xlu2 %v2179_v60, %s3740_s14 }
 0x6e4   :  { %v2204_v61 = vpop.xlane.xlu0 %2203  ;;  %v2230_v33 = vpop.xlane.xlu1 %2229 }
 0x6e5   :  { %v2205_v62 = vmul.f32 %v2204_v61, %v4246_v23  ;;  %v2231_v48 = vmul.f32 %v2230_v33, %v4246_v23 }
 0x6e7   :  { %2207 = vrot.lane.b32.xlu2 %v2205_v62, %s3741_s29  ;;  %v2132_v62 = vadd.f32 %v2131_v56, %v2130_v57 }
 0x6ec   :  { %v2256_v49 = vpop.xlane.xlu0 %2255 }
 0x6ed   :  { %v2257_v63 = vmul.f32 %v2256_v49, %v4246_v23  ;;  %v2133_v49 = vrot.slane %v2132_v62, 1 }
 0x6ef   :  { %2233 = vrot.lane.b32.xlu2 %v2231_v48, %s3742_s6  ;;  %2259 = vrot.lane.b32.xlu0 %v2257_v63, %s3743_s8  ;;  %v2134_v0 = vadd.f32 %v2133_v49, %v2132_v62 }
 0x6f4   :  { %v2282_v1 = vpop.xlane.xlu1 %2281 }
 0x6f5   :  { %v2283_v4 = vmul.f32 %v2282_v1, %v4246_v23 }
 0x6f7   :  { %2285 = vrot.lane.b32.xlu1 %v2283_v4, %s3744_s7  ;;  %2311 = vrot.lane.b32.xlu2 %v2309_v3, %s3745_s12 }
 0x6fc   :  { %v2334_v35 = vpop.xlane.xlu0 %2333 }
 0x6fd   :  { %v2335_v52 = vmul.f32 %v2334_v35, %v4246_v23  ;;  %v2135_v35 = vmul.f32 %v2134_v0, %v3926_v37 }
 0x6ff   :  { %2357 = vrot.lane.b32.xlu1 %v2355_v2, %s3746_s19  ;;  %2337 = vrot.lane.b32.xlu0 %v2335_v52, %s3747_s20  ;;  %v2136_v52 = vsub.f32 0.0, %v2135_v35 }
 0x701   :  { %v2438_v32 = vsel %vm2437_vm11, %v2136_v52, 0.0 }
 0x707   :  { %2386 = vrot.lane.b32.xlu0 %v2384_v5, %s3748_s21 }
 0x720   :  { %2406 = vadd.xlane.f32.xlu2 %v2405_v16 }
 0x729   :  { %2415 = vmax.xlane.f32.xlu1 %v4246_v23 }
 0x731   :  { %2435 = vadd.xlane.f32.xlu0 %v2434_v24 }
 0x739   :  { %v2182_v26 = vpop.permute.xlu2 %2181 }
 0x73a   :  { %v2184_v28 = vadd.f32 %v2182_v26, %v2154_v27 }
 0x741   :  { %v2208_v43 = vpop.permute.xlu2 %2207 }
 0x742   :  { %v2210_v30 = vadd.f32 %v2208_v43, %v2184_v28 }
 0x749   :  { %v2234_v29 = vpop.permute.xlu2 %2233 }
 0x74a   :  { %v2236_v31 = vadd.f32 %v2234_v29, %v2210_v30 }
 0x751   :  { %v2312_v23 = vpop.permute.xlu2 %2311 }
 0x761   :  { %v2260_v14 = vpop.permute.xlu0 %2259 }
 0x762   :  { %v2262_v11 = vadd.f32 %v2260_v14, %v2236_v31 }
 0x769   :  { %v2286_v17 = vpop.permute.xlu1 %2285 }
 0x76a   :  { %v2288_v19 = vadd.f32 %v2286_v17, %v2262_v11 }
 0x76c   :  { %v2314_v36 = vadd.f32 %v2312_v23, %v2288_v19 }
 0x771   :  { %v2338_v34 = vpop.permute.xlu0 %2337  ;;  %v2358_v9 = vpop.permute.xlu1 %2357 }
 0x772   :  { %v2340_v38 = vadd.f32 %v2338_v34, %v2314_v36 }
 0x774   :  { %v2360_v39 = vadd.f32 %v2358_v9, %v2340_v38 }
 0x779   :  { %v2387_v41 = vpop.permute.xlu0 %2386 }
 0x77a   :  { %v2389_v42 = vadd.f32 %v2387_v41, %v2360_v39 }
 0x77c   :  { %v2391_v44 = vsel %vm2390_vm10, %v2389_v42, 0.0 }
 0x77d   :  { %v2392_v45 = vrot.slane %v2391_v44, 4 }
 0x77f   :  { %v2393_v18 = vadd.f32 %v2392_v45, %v2391_v44 }
 0x781   :  { %v2394_v46 = vrot.slane %v2393_v18, 2 }
 0x783   :  { %v2395_v51 = vadd.f32 %v2394_v46, %v2393_v18 }
 0x785   :  { %v2396_v13 = vrot.slane %v2395_v51, 1 }
 0x787   :  { %v2397_v47 = vadd.f32 %v2396_v13, %v2395_v51 }
 0x789   :  { %v2398_v50 = vmul.f32 %v2397_v47, %v3926_v37 }
 0x78b   :  { %2442 = vperm.xlu2 %3365, %v2398_v50  }
 0x793   :  { %v2407_v55 = vpop.xlane.xlu2 %2406 }
 0x794   :  { %v2408_v58 = vrot.slane %v2407_v55, 4 }
 0x796   :  { %v2409_v61 = vadd.f32 %v2408_v58, %v2407_v55 }
 0x798   :  { %v2410_v33 = vrot.slane %v2409_v61, 2 }
 0x79a   :  { %v2411_v63 = vadd.f32 %v2410_v33, %v2409_v61 }
 0x79c   :  { %v2416_v54 = vpop.xlane.xlu1 %2415  ;;  %v2412_v3 = vrot.slane %v2411_v63, 1 }
 0x79d   :  { %v2417_v22 = vrot.slane %v2416_v54, 4 }
 0x79e   :  { %v2413_v2 = vadd.f32 %v2412_v3, %v2411_v63 }
 0x79f   :  { %v2418_v60 = vadd.f32 %v2417_v22, %v2416_v54 }
 0x7a0   :  { %v2414_v5 = vmul.f32 %v2413_v2, %v3926_v37 }
 0x7a1   :  { %v2419_v25 = vrot.slane %v2418_v60, 2 }
 0x7a2   :  { %v2448_v16 = vsel %vm2447_vm13, %v2414_v5, 0.0 }
 0x7a3   :  { %v2420_v48 = vadd.f32 %v2419_v25, %v2418_v60 }
 0x7a4   :  { %v2436_v10 = vpop.xlane.xlu0 %2435 }
 0x7a5   :  { %v2421_v1 = vrot.slane %v2420_v48, 1  ;;  %v2454_v26 = vsel %vm2453_vm15, %v2436_v10, 0.0 }
 0x7a7   :  { %v2422_v4 = vadd.f32 %v2421_v1, %v2420_v48 }
 0x7a9   :  { %v2423_v12 = vmul.f32 %v2422_v4, %v3926_v37 }
 0x7ab   :  { %v2424_v7 = vsub.f32 0.0, %v2423_v12 }
 0x7ad   :  { %v2451_v21 = vsel %vm2450_vm14, %v2424_v7, 0.0 }
 0x7e5   :  { %v2443_v6 = vpop.permute.xlu2 %2442 }
 0x7e6   :  { %v2445_v15 = vsel %vm2439_vm12, %v2443_v6, 0.0 }
 0x7e7   :  { %v2446_v20 = vadd.f32 %v2445_v15, %v2438_v32 }
 0x7e9   :  { %v2449_v8 = vadd.f32 %v2448_v16, %v2446_v20 }
 0x7eb   :  { %v2452_v24 = vadd.f32 %v2451_v21, %v2449_v8 }
 0x7ed   :  { %v2455_v43 = vadd.f32 %v2454_v26, %v2452_v24 }
 0x7ef   :  { %2456 = vst [vmem:[%s4392_s16] sm:$0x1] %v2455_v43 }
 0x7f0   :  { %3714 = dma.done.wait [#allocation4], 128  }
 0x7f1   :  { %3715 = vsyncadd [#allocation4], 4294967168 }
 0x7f2   :  { %2480 = vsyncpa [#allocation3], 1 }
 0x7f3   :  { %2481 = vsyncpa [#allocation6], 1 }
 0x7f4   :  { %2482 = vsyncpa [#allocation9], 1 }
 0x7f5   :  { %2483 = vsyncpa [#allocation12], 1 }
 0x7f6   :  { %2484 = vsyncpa [#allocation15], 1 }
 0x7f7   :  { %2485 = vsyncpa [#allocation18], 1 }
 0x7f8   :  { %2486 = vsyncpa [#allocation4], 1 }

</bundles_post_ra>
